<compile_context>
chip_gen: v7x
topology: tpu7x:2x2x1
jax: 0.10.0
libtpu: 0.0.40
codegen_flags: <defaults>
</compile_context>

<pallas_src>
import jax
import jax.numpy as jnp
from jax.experimental import pallas as pl
from jax.experimental.pallas import tpu as pltpu


_LANE = 128
_BLOCK_M = 512  # M-tile (multiple of 128); ~0.6 MB bf16 cols block worst case


# ----------------------------------------------------------------------------
# Pallas kernel 1: lane-dense fused conv matmul   relu(W @ cols + b)
#   W: (Cout, K) bf16,  cols block: (K, BM) bf16,  b: (Cout, 1) f32
#   out block: (Cout, BM) bf16   (BM is the lane-dense dim)
# ----------------------------------------------------------------------------
def _convmm_kernel(w_ref, b_ref, x_ref, o_ref):
    y = jnp.dot(w_ref[...], x_ref[...], preferred_element_type=jnp.float32)
    y = jnp.maximum(y + b_ref[...], 0.0)          # bias (Cout,1) broadcasts over lanes
    o_ref[...] = y.astype(o_ref.dtype)


def conv_matmul_lanedense(w_t, b_col, cols_t):
    """relu(w_t @ cols_t + b), M-tiled over the lane dimension.

    w_t: (Cout, K) bf16; b_col: (Cout, 1) f32; cols_t: (K, M) bf16.
    Returns (Cout, M) bf16.
    """
    cout, k = w_t.shape
    m = cols_t.shape[1]
    if m >= _BLOCK_M:
        bm = _BLOCK_M
        m_pad = pl.cdiv(m, bm) * bm
    else:
        m_pad = pl.cdiv(m, _LANE) * _LANE
        bm = m_pad
    if m_pad != m:
        cols_t = jnp.pad(cols_t, ((0, 0), (0, m_pad - m)))

    out = pl.pallas_call(
        _convmm_kernel,
        out_shape=jax.ShapeDtypeStruct((cout, m_pad), jnp.bfloat16),
        grid=(m_pad // bm,),
        in_specs=[
            pl.BlockSpec((cout, k), lambda i: (0, 0)),   # weights resident
            pl.BlockSpec((cout, 1), lambda i: (0, 0)),   # bias resident
            pl.BlockSpec((k, bm), lambda i: (0, i)),     # cols: tile M
        ],
        out_specs=pl.BlockSpec((cout, bm), lambda i: (0, i)),
        compiler_params=pltpu.CompilerParams(
            dimension_semantics=("parallel",)),          # megacore-shardable
    )(w_t, b_col, cols_t)

    if m_pad != m:
        out = out[:, :m]
    return out


# ----------------------------------------------------------------------------
# Pallas kernel 2: fused FC tail  sigmoid(L4(relu(L3(relu(L2(relu(L1 x)))))))
# ----------------------------------------------------------------------------
def _fc_tail_kernel(x_ref, w1_ref, b1_ref, w2_ref, b2_ref,
                    w3_ref, b3_ref, w4_ref, b4_ref, o_ref):
    def dense(h, w_ref, b_ref):
        return jnp.dot(h, w_ref[...], preferred_element_type=jnp.float32) + b_ref[...]

    h = jnp.maximum(dense(x_ref[...], w1_ref, b1_ref), 0.0).astype(jnp.bfloat16)
    h = jnp.maximum(dense(h, w2_ref, b2_ref), 0.0).astype(jnp.bfloat16)
    h = jnp.maximum(dense(h, w3_ref, b3_ref), 0.0).astype(jnp.bfloat16)
    y = dense(h, w4_ref, b4_ref)                  # last layer, f32
    o_ref[...] = jax.nn.sigmoid(y).astype(o_ref.dtype)


def fc_tail(x_flat, params):
    """x_flat: (N, 1152) bf16 -> (N, a_dim) f32; all 4 FC layers in one kernel."""
    n = x_flat.shape[0]
    a_dim = params["last"][0].shape[1]
    return pl.pallas_call(
        _fc_tail_kernel,
        out_shape=jax.ShapeDtypeStruct((n, a_dim), jnp.float32),
    )(x_flat,
      *params["fcn1"], *params["fcn2"], *params["fcn3"], *params["last"])


# ----------------------------------------------------------------------------
# im2col in CNHW layout (pure layout glue: slices + stack + reshape, NO transposes)
#   x: (C, N, H, W) -> cols^T: (C*KH*KW, N*OH*OW)
#   K-order (C, KH, KW) matches weight.reshape(Cout, C*KH*KW)
#   M-order (N, OH, OW) so the kernel output reshapes straight back to CNHW.
# ----------------------------------------------------------------------------
def _im2col_cnhw(x, kh, kw, stride):
    c, n, h, w = x.shape
    oh = (h - kh) // stride + 1
    ow = (w - kw) // stride + 1
    taps = []
    for i in range(kh):
        for j in range(kw):
            taps.append(x[:, :,
                          i:i + stride * (oh - 1) + 1:stride,
                          j:j + stride * (ow - 1) + 1:stride])
    cols = jnp.stack(taps, axis=1)                      # (C, KH*KW, N, OH, OW)
    return cols.reshape(c * kh * kw, n * oh * ow), oh, ow


def conv_relu_cnhw(x_cnhw, w_t, b_col, kh, kw, stride):
    """x_cnhw: (Cin, N, H, W) bf16 -> (Cout, N, OH, OW) bf16 (VALID conv + ReLU)."""
    n = x_cnhw.shape[1]
    cols, oh, ow = _im2col_cnhw(x_cnhw, kh, kw, stride)     # (K, N*OH*OW) bf16
    y = conv_matmul_lanedense(w_t, b_col, cols)             # (Cout, N*OH*OW) bf16
    return y.reshape(w_t.shape[0], n, oh, ow)


# ----------------------------------------------------------------------------
# Deterministic parameter init (PyTorch-default-like uniform bounds), stored in
# kernel-ready layouts:
#   conv: (W_flat (Cout, Cin*KH*KW) bf16, b (Cout, 1) f32)
#   fc:   (W (in, out) bf16, b (1, out) f32)
# ----------------------------------------------------------------------------
def _init_conv(key, cout, cin, kh, kw):
    k_w, k_b = jax.random.split(key)
    fan_in = cin * kh * kw
    bound = 1.0 / jnp.sqrt(float(fan_in))
    w = jax.random.uniform(k_w, (cout, cin, kh, kw), jnp.float32, -bound, bound)
    b = jax.random.uniform(k_b, (cout,), jnp.float32, -bound, bound)
    return w.reshape(cout, cin * kh * kw).astype(jnp.bfloat16), b.reshape(cout, 1)


def _init_linear(key, in_f, out_f):
    k_w, k_b = jax.random.split(key)
    bound = 1.0 / jnp.sqrt(float(in_f))
    w = jax.random.uniform(k_w, (in_f, out_f), jnp.float32, -bound, bound)
    b = jax.random.uniform(k_b, (out_f,), jnp.float32, -bound, bound)
    return w.astype(jnp.bfloat16), b.reshape(1, out_f)


def init_policy_params(key, a_dim):
    keys = jax.random.split(key, 9)
    return {
        "cnn1": _init_conv(keys[0], 24, 3, 5, 5),
        "cnn2": _init_conv(keys[1], 36, 24, 5, 5),
        "cnn3": _init_conv(keys[2], 48, 36, 5, 5),
        "cnn4": _init_conv(keys[3], 64, 48, 3, 3),
        "cnn5": _init_conv(keys[4], 64, 64, 3, 3),
        "fcn1": _init_linear(keys[5], 1152, 100),
        "fcn2": _init_linear(keys[6], 100, 50),
        "fcn3": _init_linear(keys[7], 50, 10),
        "last": _init_linear(keys[8], 10, a_dim),
    }


# ----------------------------------------------------------------------------
# Forward pass (mirrors Policy.forward exactly)
# ----------------------------------------------------------------------------
def policy_forward(params, x):
    # x: (N, 3, 66, 200) f32 NCHW (PyTorch layout)
    n = x.shape[0]
    a = jnp.transpose(x, (1, 0, 2, 3)).astype(jnp.bfloat16)      # CNHW, once

    a = conv_relu_cnhw(a, *params["cnn1"], 5, 5, 2)   # (24, N, 31, 98)
    a = conv_relu_cnhw(a, *params["cnn2"], 5, 5, 2)   # (36, N, 14, 47)
    a = conv_relu_cnhw(a, *params["cnn3"], 5, 5, 2)   # (48, N, 5, 22)
    a = conv_relu_cnhw(a, *params["cnn4"], 3, 3, 1)   # (64, N, 3, 20)
    a = conv_relu_cnhw(a, *params["cnn5"], 3, 3, 1)   # (64, N, 1, 18)

    # Flatten in PyTorch NCHW order: per-sample (C, H, W) -> 1152 features.
    x_flat = jnp.transpose(a, (1, 0, 2, 3)).reshape(n, -1)       # (N, 1152) bf16

    return fc_tail(x_flat, params)                               # (N, a_dim) f32


if __name__ == "__main__":
    key = jax.random.PRNGKey(0)
    k_params, k_x = jax.random.split(key)

    A_DIM = 3
    BATCH = 2
    # The architecture requires 3x66x200 input so conv5 flattens to 1152.
    x = jax.random.normal(k_x, (BATCH, 3, 66, 200), jnp.float32)

    params = init_policy_params(k_params, A_DIM)

    fwd = jax.jit(policy_forward)
    out = jax.block_until_ready(fwd(params, x))

    assert out.shape == (BATCH, A_DIM), out.shape
    assert bool(jnp.all((out >= 0.0) & (out <= 1.0)))  # sigmoid output range
    print("KERNEL_OK")
</pallas_src>

<mosaic_0001>
module attributes {stable_mosaic.version = 11 : i64} {
  func.func @_convmm_kernel(%arg0: i32, %arg1: memref<24x75xbf16, #tpu.memory_space<vmem>>, %arg2: memref<24x1xf32, #tpu.memory_space<vmem>>, %arg3: memref<75x512xbf16, #tpu.memory_space<vmem>>, %arg4: memref<24x512xbf16, #tpu.memory_space<vmem>>) attributes {dimension_semantics = [#tpu.dimension_semantics<parallel>], iteration_bounds = array<i64: 12>, scalar_prefetch = 0 : i64, scratch_operands = 0 : i64, tpu.core_type = #tpu.core_type<tc>, window_params = [{pipeline_mode = #tpu.pipeline_mode<synchronous>, transform_indices = @transform_0, window_bounds = array<i64: 24, 75>}, {pipeline_mode = #tpu.pipeline_mode<synchronous>, transform_indices = @transform_1, window_bounds = array<i64: 24, 1>}, {transform_indices = @transform_2, window_bounds = array<i64: 75, 512>}, {transform_indices = @transform_3, window_bounds = array<i64: 24, 512>}]} {
    %c0 = arith.constant 0 : index
    %c0_0 = arith.constant 0 : index
    %0 = vector.load %arg1[%c0, %c0_0] : memref<24x75xbf16, #tpu.memory_space<vmem>>, vector<24x75xbf16>
    %c0_1 = arith.constant 0 : index
    %c0_2 = arith.constant 0 : index
    %1 = vector.load %arg3[%c0_1, %c0_2] : memref<75x512xbf16, #tpu.memory_space<vmem>>, vector<75x512xbf16>
    %cst = arith.constant dense<0.000000e+00> : vector<24x512xf32>
    %2 = tpu.matmul %0, %1, %cst {dimension_numbers = #tpu.dot_dimension_numbers<[1], [0], [0], [1], [0, 0, 1, 1], [], []>} : vector<24x75xbf16>, vector<75x512xbf16>, vector<24x512xf32> -> vector<24x512xf32>
    %c0_3 = arith.constant 0 : index
    %c0_4 = arith.constant 0 : index
    %3 = vector.load %arg2[%c0_3, %c0_4] : memref<24x1xf32, #tpu.memory_space<vmem>>, vector<24x1xf32>
    %4 = vector.broadcast %3 : vector<24x1xf32> to vector<24x512xf32>
    %5 = arith.addf %2, %4 : vector<24x512xf32>
    %cst_5 = arith.constant 0.000000e+00 : f32
    %6 = vector.broadcast %cst_5 : f32 to vector<24x512xf32>
    %7 = arith.maximumf %5, %6 : vector<24x512xf32>
    %8 = arith.truncf %7 : vector<24x512xf32> to vector<24x512xbf16>
    %c0_6 = arith.constant 0 : index
    %c0_7 = arith.constant 0 : index
    %9 = vector.load %arg4[%c0_6, %c0_7] : memref<24x512xbf16, #tpu.memory_space<vmem>>, vector<24x512xbf16>
    tpu.vector_store %arg4[%c0_6, %c0_7], %8 {strides = array<i32>} : memref<24x512xbf16, #tpu.memory_space<vmem>>, vector<24x512xbf16>,
    return
  }
  func.func @transform_0(%arg0: i32) -> (i32, i32) {
    %c0_i32 = arith.constant 0 : i32
    %c0_i32_0 = arith.constant 0 : i32
    %c0_i32_1 = arith.constant 0 : i32
    return %c0_i32, %c0_i32_0 : i32, i32
  }
  func.func @transform_1(%arg0: i32) -> (i32, i32) {
    %c0_i32 = arith.constant 0 : i32
    %c0_i32_0 = arith.constant 0 : i32
    %c0_i32_1 = arith.constant 0 : i32
    return %c0_i32, %c0_i32_0 : i32, i32
  }
  func.func @transform_2(%arg0: i32) -> (i32, i32) {
    %c0_i32 = arith.constant 0 : i32
    %c0_i32_0 = arith.constant 0 : i32
    return %c0_i32, %arg0 : i32, i32
  }
  func.func @transform_3(%arg0: i32) -> (i32, i32) {
    %c0_i32 = arith.constant 0 : i32
    %c0_i32_0 = arith.constant 0 : i32
    return %c0_i32, %arg0 : i32, i32
  }
}

module attributes {stable_mosaic.version = 11 : i64} {
  func.func @_convmm_kernel(%arg0: i32, %arg1: memref<36x600xbf16, #tpu.memory_space<vmem>>, %arg2: memref<36x1xf32, #tpu.memory_space<vmem>>, %arg3: memref<600x512xbf16, #tpu.memory_space<vmem>>, %arg4: memref<36x512xbf16, #tpu.memory_space<vmem>>) attributes {dimension_semantics = [#tpu.dimension_semantics<parallel>], iteration_bounds = array<i64: 3>, scalar_prefetch = 0 : i64, scratch_operands = 0 : i64, tpu.core_type = #tpu.core_type<tc>, window_params = [{pipeline_mode = #tpu.pipeline_mode<synchronous>, transform_indices = @transform_0, window_bounds = array<i64: 36, 600>}, {pipeline_mode = #tpu.pipeline_mode<synchronous>, transform_indices = @transform_1, window_bounds = array<i64: 36, 1>}, {transform_indices = @transform_2, window_bounds = array<i64: 600, 512>}, {transform_indices = @transform_3, window_bounds = array<i64: 36, 512>}]} {
    %c0 = arith.constant 0 : index
    %c0_0 = arith.constant 0 : index
    %0 = vector.load %arg1[%c0, %c0_0] : memref<36x600xbf16, #tpu.memory_space<vmem>>, vector<36x600xbf16>
    %c0_1 = arith.constant 0 : index
    %c0_2 = arith.constant 0 : index
    %1 = vector.load %arg3[%c0_1, %c0_2] : memref<600x512xbf16, #tpu.memory_space<vmem>>, vector<600x512xbf16>
    %cst = arith.constant dense<0.000000e+00> : vector<36x512xf32>
    %2 = tpu.matmul %0, %1, %cst {dimension_numbers = #tpu.dot_dimension_numbers<[1], [0], [0], [1], [0, 0, 1, 1], [], []>} : vector<36x600xbf16>, vector<600x512xbf16>, vector<36x512xf32> -> vector<36x512xf32>
    %c0_3 = arith.constant 0 : index
    %c0_4 = arith.constant 0 : index
    %3 = vector.load %arg2[%c0_3, %c0_4] : memref<36x1xf32, #tpu.memory_space<vmem>>, vector<36x1xf32>
    %4 = vector.broadcast %3 : vector<36x1xf32> to vector<36x512xf32>
    %5 = arith.addf %2, %4 : vector<36x512xf32>
    %cst_5 = arith.constant 0.000000e+00 : f32
    %6 = vector.broadcast %cst_5 : f32 to vector<36x512xf32>
    %7 = arith.maximumf %5, %6 : vector<36x512xf32>
    %8 = arith.truncf %7 : vector<36x512xf32> to vector<36x512xbf16>
    %c0_6 = arith.constant 0 : index
    %c0_7 = arith.constant 0 : index
    %9 = vector.load %arg4[%c0_6, %c0_7] : memref<36x512xbf16, #tpu.memory_space<vmem>>, vector<36x512xbf16>
    tpu.vector_store %arg4[%c0_6, %c0_7], %8 {strides = array<i32>} : memref<36x512xbf16, #tpu.memory_space<vmem>>, vector<36x512xbf16>,
    return
  }
  func.func @transform_0(%arg0: i32) -> (i32, i32) {
    %c0_i32 = arith.constant 0 : i32
    %c0_i32_0 = arith.constant 0 : i32
    %c0_i32_1 = arith.constant 0 : i32
    return %c0_i32, %c0_i32_0 : i32, i32
  }
  func.func @transform_1(%arg0: i32) -> (i32, i32) {
    %c0_i32 = arith.constant 0 : i32
    %c0_i32_0 = arith.constant 0 : i32
    %c0_i32_1 = arith.constant 0 : i32
    return %c0_i32, %c0_i32_0 : i32, i32
  }
  func.func @transform_2(%arg0: i32) -> (i32, i32) {
    %c0_i32 = arith.constant 0 : i32
    %c0_i32_0 = arith.constant 0 : i32
    return %c0_i32, %arg0 : i32, i32
  }
  func.func @transform_3(%arg0: i32) -> (i32, i32) {
    %c0_i32 = arith.constant 0 : i32
    %c0_i32_0 = arith.constant 0 : i32
    return %c0_i32, %arg0 : i32, i32
  }
}

module attributes {stable_mosaic.version = 11 : i64} {
  func.func @_convmm_kernel(%arg0: i32, %arg1: memref<48x900xbf16, #tpu.memory_space<vmem>>, %arg2: memref<48x1xf32, #tpu.memory_space<vmem>>, %arg3: memref<900x256xbf16, #tpu.memory_space<vmem>>, %arg4: memref<48x256xbf16, #tpu.memory_space<vmem>>) attributes {dimension_semantics = [#tpu.dimension_semantics<parallel>], iteration_bounds = array<i64: 1>, scalar_prefetch = 0 : i64, scratch_operands = 0 : i64, tpu.core_type = #tpu.core_type<tc>, window_params = [{pipeline_mode = #tpu.pipeline_mode<synchronous>, transform_indices = @transform_0, window_bounds = array<i64: 48, 900>}, {pipeline_mode = #tpu.pipeline_mode<synchronous>, transform_indices = @transform_1, window_bounds = array<i64: 48, 1>}, {transform_indices = @transform_2, window_bounds = array<i64: 900, 256>}, {transform_indices = @transform_3, window_bounds = array<i64: 48, 256>}]} {
    %c0 = arith.constant 0 : index
    %c0_0 = arith.constant 0 : index
    %0 = vector.load %arg1[%c0, %c0_0] : memref<48x900xbf16, #tpu.memory_space<vmem>>, vector<48x900xbf16>
    %c0_1 = arith.constant 0 : index
    %c0_2 = arith.constant 0 : index
    %1 = vector.load %arg3[%c0_1, %c0_2] : memref<900x256xbf16, #tpu.memory_space<vmem>>, vector<900x256xbf16>
    %cst = arith.constant dense<0.000000e+00> : vector<48x256xf32>
    %2 = tpu.matmul %0, %1, %cst {dimension_numbers = #tpu.dot_dimension_numbers<[1], [0], [0], [1], [0, 0, 1, 1], [], []>} : vector<48x900xbf16>, vector<900x256xbf16>, vector<48x256xf32> -> vector<48x256xf32>
    %c0_3 = arith.constant 0 : index
    %c0_4 = arith.constant 0 : index
    %3 = vector.load %arg2[%c0_3, %c0_4] : memref<48x1xf32, #tpu.memory_space<vmem>>, vector<48x1xf32>
    %4 = vector.broadcast %3 : vector<48x1xf32> to vector<48x256xf32>
    %5 = arith.addf %2, %4 : vector<48x256xf32>
    %cst_5 = arith.constant 0.000000e+00 : f32
    %6 = vector.broadcast %cst_5 : f32 to vector<48x256xf32>
    %7 = arith.maximumf %5, %6 : vector<48x256xf32>
    %8 = arith.truncf %7 : vector<48x256xf32> to vector<48x256xbf16>
    %c0_6 = arith.constant 0 : index
    %c0_7 = arith.constant 0 : index
    %9 = vector.load %arg4[%c0_6, %c0_7] : memref<48x256xbf16, #tpu.memory_space<vmem>>, vector<48x256xbf16>
    tpu.vector_store %arg4[%c0_6, %c0_7], %8 {strides = array<i32>} : memref<48x256xbf16, #tpu.memory_space<vmem>>, vector<48x256xbf16>,
    return
  }
  func.func @transform_0(%arg0: i32) -> (i32, i32) {
    %c0_i32 = arith.constant 0 : i32
    %c0_i32_0 = arith.constant 0 : i32
    %c0_i32_1 = arith.constant 0 : i32
    return %c0_i32, %c0_i32_0 : i32, i32
  }
  func.func @transform_1(%arg0: i32) -> (i32, i32) {
    %c0_i32 = arith.constant 0 : i32
    %c0_i32_0 = arith.constant 0 : i32
    %c0_i32_1 = arith.constant 0 : i32
    return %c0_i32, %c0_i32_0 : i32, i32
  }
  func.func @transform_2(%arg0: i32) -> (i32, i32) {
    %c0_i32 = arith.constant 0 : i32
    %c0_i32_0 = arith.constant 0 : i32
    return %c0_i32, %arg0 : i32, i32
  }
  func.func @transform_3(%arg0: i32) -> (i32, i32) {
    %c0_i32 = arith.constant 0 : i32
    %c0_i32_0 = arith.constant 0 : i32
    return %c0_i32, %arg0 : i32, i32
  }
}

module attributes {stable_mosaic.version = 11 : i64} {
  func.func @_convmm_kernel(%arg0: i32, %arg1: memref<64x432xbf16, #tpu.memory_space<vmem>>, %arg2: memref<64x1xf32, #tpu.memory_space<vmem>>, %arg3: memref<432x128xbf16, #tpu.memory_space<vmem>>, %arg4: memref<64x128xbf16, #tpu.memory_space<vmem>>) attributes {dimension_semantics = [#tpu.dimension_semantics<parallel>], iteration_bounds = array<i64: 1>, scalar_prefetch = 0 : i64, scratch_operands = 0 : i64, tpu.core_type = #tpu.core_type<tc>, window_params = [{pipeline_mode = #tpu.pipeline_mode<synchronous>, transform_indices = @transform_0, window_bounds = array<i64: 64, 432>}, {pipeline_mode = #tpu.pipeline_mode<synchronous>, transform_indices = @transform_1, window_bounds = array<i64: 64, 1>}, {transform_indices = @transform_2, window_bounds = array<i64: 432, 128>}, {transform_indices = @transform_3, window_bounds = array<i64: 64, 128>}]} {
    %c0 = arith.constant 0 : index
    %c0_0 = arith.constant 0 : index
    %0 = vector.load %arg1[%c0, %c0_0] : memref<64x432xbf16, #tpu.memory_space<vmem>>, vector<64x432xbf16>
    %c0_1 = arith.constant 0 : index
    %c0_2 = arith.constant 0 : index
    %1 = vector.load %arg3[%c0_1, %c0_2] : memref<432x128xbf16, #tpu.memory_space<vmem>>, vector<432x128xbf16>
    %cst = arith.constant dense<0.000000e+00> : vector<64x128xf32>
    %2 = tpu.matmul %0, %1, %cst {dimension_numbers = #tpu.dot_dimension_numbers<[1], [0], [0], [1], [0, 0, 1, 1], [], []>} : vector<64x432xbf16>, vector<432x128xbf16>, vector<64x128xf32> -> vector<64x128xf32>
    %c0_3 = arith.constant 0 : index
    %c0_4 = arith.constant 0 : index
    %3 = vector.load %arg2[%c0_3, %c0_4] : memref<64x1xf32, #tpu.memory_space<vmem>>, vector<64x1xf32>
    %4 = vector.broadcast %3 : vector<64x1xf32> to vector<64x128xf32>
    %5 = arith.addf %2, %4 : vector<64x128xf32>
    %cst_5 = arith.constant 0.000000e+00 : f32
    %6 = vector.broadcast %cst_5 : f32 to vector<64x128xf32>
    %7 = arith.maximumf %5, %6 : vector<64x128xf32>
    %8 = arith.truncf %7 : vector<64x128xf32> to vector<64x128xbf16>
    %c0_6 = arith.constant 0 : index
    %c0_7 = arith.constant 0 : index
    %9 = vector.load %arg4[%c0_6, %c0_7] : memref<64x128xbf16, #tpu.memory_space<vmem>>, vector<64x128xbf16>
    tpu.vector_store %arg4[%c0_6, %c0_7], %8 {strides = array<i32>} : memref<64x128xbf16, #tpu.memory_space<vmem>>, vector<64x128xbf16>,
    return
  }
  func.func @transform_0(%arg0: i32) -> (i32, i32) {
    %c0_i32 = arith.constant 0 : i32
    %c0_i32_0 = arith.constant 0 : i32
    %c0_i32_1 = arith.constant 0 : i32
    return %c0_i32, %c0_i32_0 : i32, i32
  }
  func.func @transform_1(%arg0: i32) -> (i32, i32) {
    %c0_i32 = arith.constant 0 : i32
    %c0_i32_0 = arith.constant 0 : i32
    %c0_i32_1 = arith.constant 0 : i32
    return %c0_i32, %c0_i32_0 : i32, i32
  }
  func.func @transform_2(%arg0: i32) -> (i32, i32) {
    %c0_i32 = arith.constant 0 : i32
    %c0_i32_0 = arith.constant 0 : i32
    return %c0_i32, %arg0 : i32, i32
  }
  func.func @transform_3(%arg0: i32) -> (i32, i32) {
    %c0_i32 = arith.constant 0 : i32
    %c0_i32_0 = arith.constant 0 : i32
    return %c0_i32, %arg0 : i32, i32
  }
}

module attributes {stable_mosaic.version = 11 : i64} {
  func.func @_convmm_kernel(%arg0: i32, %arg1: memref<64x576xbf16, #tpu.memory_space<vmem>>, %arg2: memref<64x1xf32, #tpu.memory_space<vmem>>, %arg3: memref<576x128xbf16, #tpu.memory_space<vmem>>, %arg4: memref<64x128xbf16, #tpu.memory_space<vmem>>) attributes {dimension_semantics = [#tpu.dimension_semantics<parallel>], iteration_bounds = array<i64: 1>, scalar_prefetch = 0 : i64, scratch_operands = 0 : i64, tpu.core_type = #tpu.core_type<tc>, window_params = [{pipeline_mode = #tpu.pipeline_mode<synchronous>, transform_indices = @transform_0, window_bounds = array<i64: 64, 576>}, {pipeline_mode = #tpu.pipeline_mode<synchronous>, transform_indices = @transform_1, window_bounds = array<i64: 64, 1>}, {transform_indices = @transform_2, window_bounds = array<i64: 576, 128>}, {transform_indices = @transform_3, window_bounds = array<i64: 64, 128>}]} {
    %c0 = arith.constant 0 : index
    %c0_0 = arith.constant 0 : index
    %0 = vector.load %arg1[%c0, %c0_0] : memref<64x576xbf16, #tpu.memory_space<vmem>>, vector<64x576xbf16>
    %c0_1 = arith.constant 0 : index
    %c0_2 = arith.constant 0 : index
    %1 = vector.load %arg3[%c0_1, %c0_2] : memref<576x128xbf16, #tpu.memory_space<vmem>>, vector<576x128xbf16>
    %cst = arith.constant dense<0.000000e+00> : vector<64x128xf32>
    %2 = tpu.matmul %0, %1, %cst {dimension_numbers = #tpu.dot_dimension_numbers<[1], [0], [0], [1], [0, 0, 1, 1], [], []>} : vector<64x576xbf16>, vector<576x128xbf16>, vector<64x128xf32> -> vector<64x128xf32>
    %c0_3 = arith.constant 0 : index
    %c0_4 = arith.constant 0 : index
    %3 = vector.load %arg2[%c0_3, %c0_4] : memref<64x1xf32, #tpu.memory_space<vmem>>, vector<64x1xf32>
    %4 = vector.broadcast %3 : vector<64x1xf32> to vector<64x128xf32>
    %5 = arith.addf %2, %4 : vector<64x128xf32>
    %cst_5 = arith.constant 0.000000e+00 : f32
    %6 = vector.broadcast %cst_5 : f32 to vector<64x128xf32>
    %7 = arith.maximumf %5, %6 : vector<64x128xf32>
    %8 = arith.truncf %7 : vector<64x128xf32> to vector<64x128xbf16>
    %c0_6 = arith.constant 0 : index
    %c0_7 = arith.constant 0 : index
    %9 = vector.load %arg4[%c0_6, %c0_7] : memref<64x128xbf16, #tpu.memory_space<vmem>>, vector<64x128xbf16>
    tpu.vector_store %arg4[%c0_6, %c0_7], %8 {strides = array<i32>} : memref<64x128xbf16, #tpu.memory_space<vmem>>, vector<64x128xbf16>,
    return
  }
  func.func @transform_0(%arg0: i32) -> (i32, i32) {
    %c0_i32 = arith.constant 0 : i32
    %c0_i32_0 = arith.constant 0 : i32
    %c0_i32_1 = arith.constant 0 : i32
    return %c0_i32, %c0_i32_0 : i32, i32
  }
  func.func @transform_1(%arg0: i32) -> (i32, i32) {
    %c0_i32 = arith.constant 0 : i32
    %c0_i32_0 = arith.constant 0 : i32
    %c0_i32_1 = arith.constant 0 : i32
    return %c0_i32, %c0_i32_0 : i32, i32
  }
  func.func @transform_2(%arg0: i32) -> (i32, i32) {
    %c0_i32 = arith.constant 0 : i32
    %c0_i32_0 = arith.constant 0 : i32
    return %c0_i32, %arg0 : i32, i32
  }
  func.func @transform_3(%arg0: i32) -> (i32, i32) {
    %c0_i32 = arith.constant 0 : i32
    %c0_i32_0 = arith.constant 0 : i32
    return %c0_i32, %arg0 : i32, i32
  }
}

module attributes {stable_mosaic.version = 11 : i64} {
  func.func @_fc_tail_kernel(%arg0: memref<2x1152xbf16, #tpu.memory_space<vmem>>, %arg1: memref<1152x100xbf16, #tpu.memory_space<vmem>>, %arg2: memref<1x100xf32, #tpu.memory_space<vmem>>, %arg3: memref<100x50xbf16, #tpu.memory_space<vmem>>, %arg4: memref<1x50xf32, #tpu.memory_space<vmem>>, %arg5: memref<50x10xbf16, #tpu.memory_space<vmem>>, %arg6: memref<1x10xf32, #tpu.memory_space<vmem>>, %arg7: memref<10x3xbf16, #tpu.memory_space<vmem>>, %arg8: memref<1x3xf32, #tpu.memory_space<vmem>>, %arg9: memref<2x3xf32, #tpu.memory_space<vmem>>) attributes {dimension_semantics = [], scalar_prefetch = 0 : i64, scratch_operands = 0 : i64, tpu.core_type = #tpu.core_type<tc>} {
    %c0 = arith.constant 0 : index
    %c0_0 = arith.constant 0 : index
    %0 = vector.load %arg0[%c0, %c0_0] : memref<2x1152xbf16, #tpu.memory_space<vmem>>, vector<2x1152xbf16>
    %c0_1 = arith.constant 0 : index
    %c0_2 = arith.constant 0 : index
    %1 = vector.load %arg1[%c0_1, %c0_2] : memref<1152x100xbf16, #tpu.memory_space<vmem>>, vector<1152x100xbf16>
    %cst = arith.constant dense<0.000000e+00> : vector<2x100xf32>
    %2 = tpu.matmul %0, %1, %cst {dimension_numbers = #tpu.dot_dimension_numbers<[1], [0], [0], [1], [0, 0, 1, 1], [], []>} : vector<2x1152xbf16>, vector<1152x100xbf16>, vector<2x100xf32> -> vector<2x100xf32>
    %c0_3 = arith.constant 0 : index
    %c0_4 = arith.constant 0 : index
    %3 = vector.load %arg2[%c0_3, %c0_4] : memref<1x100xf32, #tpu.memory_space<vmem>>, vector<1x100xf32>
    %4 = vector.broadcast %3 : vector<1x100xf32> to vector<2x100xf32>
    %5 = arith.addf %2, %4 : vector<2x100xf32>
    %cst_5 = arith.constant 0.000000e+00 : f32
    %6 = vector.broadcast %cst_5 : f32 to vector<2x100xf32>
    %7 = arith.maximumf %5, %6 : vector<2x100xf32>
    %8 = arith.truncf %7 : vector<2x100xf32> to vector<2x100xbf16>
    %c0_6 = arith.constant 0 : index
    %c0_7 = arith.constant 0 : index
    %9 = vector.load %arg3[%c0_6, %c0_7] : memref<100x50xbf16, #tpu.memory_space<vmem>>, vector<100x50xbf16>
    %cst_8 = arith.constant dense<0.000000e+00> : vector<2x50xf32>
    %10 = tpu.matmul %8, %9, %cst_8 {dimension_numbers = #tpu.dot_dimension_numbers<[1], [0], [0], [1], [0, 0, 1, 1], [], []>} : vector<2x100xbf16>, vector<100x50xbf16>, vector<2x50xf32> -> vector<2x50xf32>
    %c0_9 = arith.constant 0 : index
    %c0_10 = arith.constant 0 : index
    %11 = vector.load %arg4[%c0_9, %c0_10] : memref<1x50xf32, #tpu.memory_space<vmem>>, vector<1x50xf32>
    %12 = vector.broadcast %11 : vector<1x50xf32> to vector<2x50xf32>
    %13 = arith.addf %10, %12 : vector<2x50xf32>
    %cst_11 = arith.constant 0.000000e+00 : f32
    %14 = vector.broadcast %cst_11 : f32 to vector<2x50xf32>
    %15 = arith.maximumf %13, %14 : vector<2x50xf32>
    %16 = arith.truncf %15 : vector<2x50xf32> to vector<2x50xbf16>
    %c0_12 = arith.constant 0 : index
    %c0_13 = arith.constant 0 : index
    %17 = vector.load %arg5[%c0_12, %c0_13] : memref<50x10xbf16, #tpu.memory_space<vmem>>, vector<50x10xbf16>
    %cst_14 = arith.constant dense<0.000000e+00> : vector<2x10xf32>
    %18 = tpu.matmul %16, %17, %cst_14 {dimension_numbers = #tpu.dot_dimension_numbers<[1], [0], [0], [1], [0, 0, 1, 1], [], []>} : vector<2x50xbf16>, vector<50x10xbf16>, vector<2x10xf32> -> vector<2x10xf32>
    %c0_15 = arith.constant 0 : index
    %c0_16 = arith.constant 0 : index
    %19 = vector.load %arg6[%c0_15, %c0_16] : memref<1x10xf32, #tpu.memory_space<vmem>>, vector<1x10xf32>
    %20 = vector.broadcast %19 : vector<1x10xf32> to vector<2x10xf32>
    %21 = arith.addf %18, %20 : vector<2x10xf32>
    %cst_17 = arith.constant 0.000000e+00 : f32
    %22 = vector.broadcast %cst_17 : f32 to vector<2x10xf32>
    %23 = arith.maximumf %21, %22 : vector<2x10xf32>
    %24 = arith.truncf %23 : vector<2x10xf32> to vector<2x10xbf16>
    %c0_18 = arith.constant 0 : index
    %c0_19 = arith.constant 0 : index
    %25 = vector.load %arg7[%c0_18, %c0_19] : memref<10x3xbf16, #tpu.memory_space<vmem>>, vector<10x3xbf16>
    %cst_20 = arith.constant dense<0.000000e+00> : vector<2x3xf32>
    %26 = tpu.matmul %24, %25, %cst_20 {dimension_numbers = #tpu.dot_dimension_numbers<[1], [0], [0], [1], [0, 0, 1, 1], [], []>} : vector<2x10xbf16>, vector<10x3xbf16>, vector<2x3xf32> -> vector<2x3xf32>
    %c0_21 = arith.constant 0 : index
    %c0_22 = arith.constant 0 : index
    %27 = vector.load %arg8[%c0_21, %c0_22] : memref<1x3xf32, #tpu.memory_space<vmem>>, vector<1x3xf32>
    %28 = vector.broadcast %27 : vector<1x3xf32> to vector<2x3xf32>
    %29 = arith.addf %26, %28 : vector<2x3xf32>
    %30 = arith.negf %29 : vector<2x3xf32>
    %31 = math.exp %30 : vector<2x3xf32>
    %cst_23 = arith.constant 1.000000e+00 : f32
    %32 = vector.broadcast %cst_23 : f32 to vector<2x3xf32>
    %33 = arith.addf %32, %31 : vector<2x3xf32>
    %34 = arith.divf %32, %33 : vector<2x3xf32>
    %c0_24 = arith.constant 0 : index
    %c0_25 = arith.constant 0 : index
    %35 = vector.load %arg9[%c0_24, %c0_25] : memref<2x3xf32, #tpu.memory_space<vmem>>, vector<2x3xf32>
    tpu.vector_store %arg9[%c0_24, %c0_25], %34 {strides = array<i32>} : memref<2x3xf32, #tpu.memory_space<vmem>>, vector<2x3xf32>,
    return
  }
}

</mosaic_0001>

<bundles_post_ra>
// kernel: policy_forward.6
= control target key start
LH: loop header
LB: loop body
LE: loop exit
PB: predicated region body
PF: predicated region fallthrough
CT: control target
= control target key end

     0   :  { %s807_s12 = smov 0   ;;  %s809_s13 = smov 0   ;;  %s972_s0 = inlined_call_operand.vmem [shape: bf16[24,75], index: 0, kind: input, shape index: {}]   ;;  %s973_s1 = inlined_call_operand.vmem [shape: f32[24,1], index: 1, kind: input, shape index: {}]   ;;  %s974_s2 = inlined_call_operand.vmem [shape: bf16[75,6144], index: 2, kind: input, shape index: {}]   ;;  %s975_s3 = inlined_call_operand.vmem [shape: bf16[24,6144], index: 3, kind: output, shape index: {}]  }
   0x1   :  { %s811_s14 = smov 0  }
   0x2 LB: > { %s647_s15 = sadd.s32 4294967295, %s783_s14   ;;  %s824_s16 = sadd.s32 1, %s783_s14   ;;  %s783_s14 = sphi %s811_s14, %s979_s14   ;;  %s779_s13 = sphi %s809_s13, %s978_s13   ;;  %s775_s12 = sphi %s807_s12, %s977_s12  }
   0x3   : > { %s59_s17 = ssub.s32 %s783_s14, %s824_s16  ;;  %s62_s18 = sadd.s32 1, %s779_s13 }
   0x4   : > { %p60_p0 = scmp.eq.s32.totalorder %s59_s17, 0  ;;  %p69_p1 = scmp.ne.s32.totalorder %s779_s13, %s775_s12 }
   0x5   : > { %p70_p2 = scmp.eq.s32.totalorder %s783_s14, 0  ;;  %p99_p3 = scmp.eq.s32.totalorder %s647_s15, 11 }
   0x6   : > { %s835_s19 = scalar_select %p60_p0, %s779_s13, %s62_s18  }
   0x7   : > { %p71_p4 = por %p70_p2, %p69_p1  ;;  %p837_p5 = por %p99_p3, %p69_p1 }
   0x8   : > { %p650_p6 = scmp.ge.s32.totalorder %s783_s14, 12 }
   0xa   : > { %127 = sbr.rel (%p650_p6) target bundleno = 31 (0x1f), region = 24 }
  0x11   : > { %130 = sbr.rel (!%p71_p4) target bundleno = 31 (0x1f), region = 28  ;;  %s132_s21 = sand.u32 (%p71_p4), 1, %s779_s13  }
  0x12   : > { %s690_s22 = sshll.u32 (%p71_p4), %s783_s14, 4  ;;  %s698_s23 = smul.u32 (%p71_p4), 160, %s132_s21 }
  0x13   : > { %s847_s26 = scalar_lea.vmem (%p71_p4), %s974_s2, %s690_s22 }
  0x14   : > { %v150_v0 = vld [vmem:[%s847_s26] sm:$0xff] (%p71_p4)  ;;  %v152_v1 = vld [vmem:[%s847_s26 + $0x8] sm:$0xff] (%p71_p4)  ;;  %s855_s27 = scalar_lea.vmem (%p71_p4), [#allocation2], %s698_s23 }
  0x15   : > { %v154_v2 = vld [vmem:[%s847_s26 + $0xc0] sm:$0xff] (%p71_p4)  ;;  %v156_v3 = vld [vmem:[%s847_s26 + $0xc8] sm:$0xff] (%p71_p4)  ;;  %151 = vst [vmem:[%s855_s27] sm:$0xff] (%p71_p4), %v150_v0  ;;  %153 = vst [vmem:[%s855_s27 + $0x8] sm:$0xff] (%p71_p4), %v152_v1 }
  0x16   : > { %v158_v4 = vld [vmem:[%s847_s26 + $0x180] sm:$0xff] (%p71_p4)  ;;  %v160_v5 = vld [vmem:[%s847_s26 + $0x188] sm:$0xff] (%p71_p4)  ;;  %155 = vst [vmem:[%s855_s27 + $0x10] sm:$0xff] (%p71_p4), %v154_v2  ;;  %157 = vst [vmem:[%s855_s27 + $0x18] sm:$0xff] (%p71_p4), %v156_v3 }
  0x17   : > { %159 = vst [vmem:[%s855_s27 + $0x20] sm:$0xff] (%p71_p4), %v158_v4  ;;  %161 = vst [vmem:[%s855_s27 + $0x28] sm:$0xff] (%p71_p4), %v160_v5  ;;  %v162_v6 = vld [vmem:[%s847_s26 + $0x240] sm:$0xff] (%p71_p4)  ;;  %v164_v7 = vld [vmem:[%s847_s26 + $0x248] sm:$0xff] (%p71_p4) }
  0x18   : > { %v166_v8 = vld [vmem:[%s847_s26 + $0x300] sm:$0xff]  ;;  %163 = vst [vmem:[%s855_s27 + $0x30] sm:$0xff] %v162_v6  ;;  %165 = vst [vmem:[%s855_s27 + $0x38] sm:$0xff] %v164_v7  ;;  %v168_v9 = vld [vmem:[%s847_s26 + $0x308] sm:$0xff] }
  0x19   : > { %167 = vst [vmem:[%s855_s27 + $0x40] sm:$0xff] %v166_v8  ;;  %v170_v10 = vld [vmem:[%s847_s26 + $0x3c0] sm:$0xff]  ;;  %v172_v11 = vld [vmem:[%s847_s26 + $0x3c8] sm:$0xff]  ;;  %169 = vst [vmem:[%s855_s27 + $0x48] sm:$0xff] %v168_v9 }
  0x1a   : > { %171 = vst [vmem:[%s855_s27 + $0x50] sm:$0xff] %v170_v10  ;;  %173 = vst [vmem:[%s855_s27 + $0x58] sm:$0xff] %v172_v11  ;;  %v174_v12 = vld [vmem:[%s847_s26 + $0x480] sm:$0xff]  ;;  %v176_v13 = vld [vmem:[%s847_s26 + $0x488] sm:$0xff] }
  0x1b   : > { %v178_v14 = vld [vmem:[%s847_s26 + $0x540] sm:$0xff]  ;;  %175 = vst [vmem:[%s855_s27 + $0x60] sm:$0xff] %v174_v12  ;;  %177 = vst [vmem:[%s855_s27 + $0x68] sm:$0xff] %v176_v13  ;;  %v180_v15 = vld [vmem:[%s847_s26 + $0x548] sm:$0xff] }
  0x1c   : > { %179 = vst [vmem:[%s855_s27 + $0x70] sm:$0xff] %v178_v14  ;;  %v182_v16 = vld [vmem:[%s847_s26 + $0x600] sm:$0xff]  ;;  %v184_v17 = vld [vmem:[%s847_s26 + $0x608] sm:$0xff]  ;;  %181 = vst [vmem:[%s855_s27 + $0x78] sm:$0xff] %v180_v15 }
  0x1d   : > { %183 = vst [vmem:[%s855_s27 + $0x80] sm:$0xff] %v182_v16  ;;  %185 = vst [vmem:[%s855_s27 + $0x88] sm:$0xff] %v184_v17  ;;  %v186_v18 = vld [vmem:[%s847_s26 + $0x6c0] sm:$0xff]  ;;  %v188_v19 = vld [vmem:[%s847_s26 + $0x6c8] sm:$0xff] }
  0x1e   : > { %187 = vst [vmem:[%s855_s27 + $0x90] sm:$0xff] %v186_v18  ;;  %189 = vst [vmem:[%s855_s27 + $0x98] sm:$0xff] %v188_v19 }
  0x1f PF: > { %p653_p7 = scmp.ge.s32.totalorder %s783_s14, 1  ;;  %p194_p8 = scmp.lt.s32.totalorder %s783_s14, 13 }
  0x21   : > { %p195_p9 = pnand %p653_p7, %p194_p8 }
  0x22   : > { %s201_s28 = sand.u32 (!%p195_p9), 1, %s775_s12   ;;  %v785_v20 = vmov (!%p195_p9), 0   ;;  %v249_v21 = vld [vmem:[%s973_s1] sm:$0xff] (!%p195_p9)  ;;  %v251_v22 = vld [vmem:[%s973_s1 + $0x10] sm:$0xff] (!%p195_p9)  ;;  %v250_v24 = vld [vmem:[%s973_s1 + $0x8] sm:$0xff] (!%p195_p9)  ;;  %vm378_vm0 = vcmask (!%p195_p9), 1044480  }
  0x23   : > { %198 = sbr.rel (%p195_p9) target bundleno = 296 (0x128), region = 51  ;;  %426 = vmatprep.mubr.bf16.mxu0 (!%p195_p9), %v785_v20  ;;  %477 = vmatprep.mubr.bf16.mxu1 (!%p195_p9), %v785_v20  ;;  %vm379_vm1 = vcmask (!%p195_p9), 1045504   ;;  %v786_v33 = vmov (!%p195_p9), 65535   ;;  %v759_v51 = vld [vmem:[%s972_s0] sm:$0xff] (!%p195_p9)   ;;  %vm371_vm2 = vcmask (!%p195_p9), 613376  }
  0x24   : > { %s699_s29 = smul.u32 (!%p195_p9), 160, %s201_s28  ;;  %727 = vset.pattern.permute.xlu0 (!%p195_p9), %v785_v20  ;;  %728 = vset.pattern.permute.xlu1 (!%p195_p9), %v785_v20  ;;  %v380_v34 = vsel (!%p195_p9), %vm378_vm0, 4294967295, %v786_v33  ;;  %v760_v52 = vld [vmem:[%s972_s0 + $0x8] ss:$0 sps:$4 sm:$0xff] (!%p195_p9)  }
  0x25   : > { %254 = vperm.xlu0 (!%p195_p9), %727, %v249_v21   ;;  %264 = vperm.xlu1 (!%p195_p9), %728, %v251_v22   ;;  %v381_v42 = vsel (!%p195_p9), %vm379_vm1, %v380_v34, 0  ;;  %s700_s21 = smul.u32 (!%p195_p9), 48, %s201_s28 }
  0x26   : > { %s906_s7 = scalar_lea.vmem (!%p195_p9), [#allocation2], %s699_s29 }
  0x27   : > { %v729_v23 = vld [vmem:[%s906_s7 + $0x4] ss:$16 sps:$4 sm:$0xff] (!%p195_p9)   ;;  %v731_v25 = vld [vmem:[%s906_s7 + $0xc] ss:$16 sps:$4 sm:$0xff] (!%p195_p9)   ;;  %v733_v26 = vld [vmem:[%s906_s7] ss:$16 sps:$4 sm:$0xff] (!%p195_p9)  }
  0x28   : > { %394 = vmatprep.subr.bf16.mxu0 (!%p195_p9), %v729_v23  ;;  %v734_v27 = vld [vmem:[%s906_s7 + $0x8] ss:$16 sps:$4 sm:$0xff] (!%p195_p9)   ;;  %445 = vmatprep.subr.bf16.mxu1 (!%p195_p9), %v731_v25  ;;  %v735_v28 = vld [vmem:[%s906_s7 + $0x24] ss:$16 sps:$4 sm:$0xff] (!%p195_p9)   ;;  %v737_v29 = vld [vmem:[%s906_s7 + $0x2c] ss:$16 sps:$4 sm:$0xff] (!%p195_p9)  }
  0x29   : > { %395 = vmatpush1.bf16.msra.mxu0 (!%p195_p9), %v733_v26  ;;  %446 = vmatpush1.bf16.msra.mxu1 (!%p195_p9), %v734_v27  ;;  %v739_v30 = vld [vmem:[%s906_s7 + $0x20] ss:$16 sps:$4 sm:$0xff] (!%p195_p9)   ;;  %v740_v31 = vld [vmem:[%s906_s7 + $0x28] ss:$16 sps:$4 sm:$0xff] (!%p195_p9)   ;;  %v741_v32 = vld [vmem:[%s906_s7 + $0x44] ss:$16 sps:$4 sm:$0xff] (!%p195_p9)  }
  0x2a   : > { %396 = vmatprep.subr.bf16.mxu0 %v735_v28  ;;  %259 = vperm.xlu0 %727, %v250_v24   ;;  %v743_v35 = vld [vmem:[%s906_s7 + $0x4c] ss:$16 sps:$4 sm:$0xff]   ;;  %v745_v36 = vld [vmem:[%s906_s7 + $0x40] ss:$16 sps:$4 sm:$0xff]   ;;  %v746_v37 = vld [vmem:[%s906_s7 + $0x48] ss:$16 sps:$4 sm:$0xff]  }
  0x2b   : > { %447 = vmatprep.subr.bf16.mxu1 %v737_v29  ;;  %v747_v38 = vld [vmem:[%s906_s7 + $0x64] ss:$16 sps:$4 sm:$0xff]   ;;  %v749_v39 = vld [vmem:[%s906_s7 + $0x6c] ss:$16 sps:$4 sm:$0xff]   ;;  %v751_v40 = vld [vmem:[%s906_s7 + $0x60] ss:$16 sps:$4 sm:$0xff]  }
  0x2c   : > { %v752_v41 = vld [vmem:[%s906_s7 + $0x68] ss:$16 sps:$4 sm:$0xff]   ;;  %v753_v43 = vld [vmem:[%s906_s7 + $0x84] ss:$16 sps:$4 sm:$0x3f]   ;;  %s941_s12 = scalar_lea.vmem [#allocation3], %s700_s21 }
  0x2d   : > { %397 = vmatpush1.bf16.msra.mxu0 %v739_v30  ;;  %448 = vmatpush1.bf16.msra.mxu1 %v740_v31  ;;  %v755_v44 = vld [vmem:[%s906_s7 + $0x8c] ss:$16 sps:$4 sm:$0x3f]   ;;  %v386_v45 = vand.u32 %v753_v43, %v381_v42  ;;  %v757_v46 = vld [vmem:[%s906_s7 + $0x80] ss:$16 sps:$4 sm:$0x3f]  }
  0x2e   : > { %398 = vmatprep.subr.bf16.mxu0 %v741_v32  ;;  %449 = vmatprep.subr.bf16.mxu1 %v743_v35  ;;  %v758_v47 = vld [vmem:[%s906_s7 + $0x88] ss:$16 sps:$4 sm:$0x3f]   ;;  %v392_v48 = vand.u32 %v755_v44, %v381_v42  ;;  %v383_v49 = vand.u32 %v757_v46, %v381_v42  ;;  %s697_s22 = sshll.u32 (%p837_p5), %s647_s15, 4 }
  0x2f   : > { %v389_v50 = vand.u32 %v758_v47, %v381_v42  ;;  %s563_s25 = scalar_lea.vmem (%p837_p5), %s975_s3, %s697_s22 }
  0x31   : > { %399 = vmatpush1.bf16.msra.mxu0 %v745_v36  ;;  %450 = vmatpush1.bf16.msra.mxu1 %v746_v37 }
  0x32   : > { %400 = vmatprep.subr.bf16.mxu0 %v747_v38  ;;  %451 = vmatprep.subr.bf16.mxu1 %v749_v39 }
  0x35   : > { %401 = vmatpush1.bf16.msra.mxu0 %v751_v40  ;;  %452 = vmatpush1.bf16.msra.mxu1 %v752_v41 }
  0x36   : > { %402 = vmatprep.subr.bf16.mxu0 %v386_v45  ;;  %453 = vmatprep.subr.bf16.mxu1 %v392_v48 }
  0x39   : > { %403 = vmatpush1.bf16.msra.mxu0 %v383_v49  ;;  %454 = vmatpush1.bf16.msra.mxu1 %v389_v50 }
  0x3c   : > { %676 = vmatmul.mubr.msk.bf16.vlgmr.msra.gmra.mrb[0].mxu0 %vm371_vm2, %v759_v51  ;;  %678 = vmatmul.mubr.msk.bf16.vlgmr.msra.gmra.mrb[0].mxu1 %vm371_vm2, %v759_v51 }
  0x3d   : > { %436 = vmatprep.mubr.bf16.mxu0 %v785_v20  ;;  %487 = vmatprep.mubr.bf16.mxu1 %v785_v20 }
  0x44   : > { %677 = vmatmul.mubr.msk.bf16.gmra.mrb[4].mxu0 %vm371_vm2, %v760_v52  ;;  %679 = vmatmul.mubr.msk.bf16.gmra.mrb[4].mxu1 %vm371_vm2, %v760_v52 }
  0xa4   : > { %v255_v53 = vpop.permute.xlu0 %254  ;;  %v265_v17 = vpop.permute.xlu1 %264 }
  0xa9   : > { %v260_v54 = vpop.permute.xlu0 %259 }
 0x10f   : > { %v428_v55 = vpop.f32.mrb[0].mxu0  ;;  %v479_v56 = vpop.f32.mrb[0].mxu1 }
 0x110   : > { %v429_v57 = vadd.f32 %v428_v55, %v255_v53  ;;  %v480_v58 = vadd.f32 %v479_v56, %v255_v53  ;;  %v430_v59 = vpop.f32.mrb[1].mxu0  ;;  %v481_v60 = vpop.f32.mrb[1].mxu1 }
 0x111   : > { %v431_v61 = vadd.f32 %v430_v59, %v255_v53  ;;  %v482_v62 = vadd.f32 %v481_v60, %v255_v53  ;;  %v432_v63 = vpop.f32.mrb[2].mxu0  ;;  %v483_v0 = vpop.f32.mrb[2].mxu1 }
 0x112   : > { %v496_v1 = vmax.f32 %v429_v57, 0.0  ;;  %v498_v2 = vmax.f32 %v480_v58, 0.0  ;;  %v433_v3 = vadd.f32 %v432_v63, %v260_v54  ;;  %v484_v4 = vadd.f32 %v483_v0, %v260_v54  ;;  %v434_v5 = vpop.f32.mrb[3].mxu0  ;;  %v485_v6 = vpop.f32.mrb[3].mxu1 }
 0x113   : > { %v497_v7 = vmax.f32 %v431_v61, 0.0  ;;  %v499_v8 = vmax.f32 %v482_v62, 0.0  ;;  %v435_v9 = vadd.f32 %v434_v5, %v260_v54  ;;  %v486_v10 = vadd.f32 %v485_v6, %v260_v54 }
 0x114   : > { %v500_v11 = vmax.f32 %v433_v3, 0.0  ;;  %v502_v12 = vmax.f32 %v484_v4, 0.0 }
 0x115   : > { %v691_v13 = vpack.c.bf16 %v497_v7, %v496_v1  ;;  %v692_v14 = vpack.c.bf16 %v499_v8, %v498_v2  ;;  %v501_v15 = vmax.f32 %v435_v9, 0.0  ;;  %v503_v16 = vmax.f32 %v486_v10, 0.0 }
 0x117   : > { %548 = vst [vmem:[%s941_s12] sm:$0xff] %v691_v13  ;;  %549 = vst [vmem:[%s941_s12 + $0x8] sm:$0xff] %v692_v14  ;;  %v693_v18 = vpack.c.bf16 %v501_v15, %v500_v11  ;;  %v694_v19 = vpack.c.bf16 %v503_v16, %v502_v12  ;;  %v438_v20 = vpop.f32.mrb[4].mxu0  ;;  %v489_v21 = vpop.f32.mrb[4].mxu1 }
 0x118   : > { %v439_v22 = vadd.f32 %v438_v20, %v265_v17  ;;  %v490_v23 = vadd.f32 %v489_v21, %v265_v17  ;;  %v440_v24 = vpop.f32.mrb[5].mxu0  ;;  %v491_v25 = vpop.f32.mrb[5].mxu1 }
 0x119   : > { %550 = vst [vmem:[%s941_s12 + $0x10] sm:$0xff] %v693_v18  ;;  %551 = vst [vmem:[%s941_s12 + $0x18] sm:$0xff] %v694_v19  ;;  %v441_v26 = vadd.f32 %v440_v24, %v265_v17  ;;  %v492_v27 = vadd.f32 %v491_v25, %v265_v17  ;;  %v442_v28 = vpop.f32.mrb[6].mxu0  ;;  %v493_v29 = vpop.f32.mrb[6].mxu1  ;;  %560 = sbr.rel (!%p837_p5) target bundleno = 296 (0x128), region = 59 }
 0x11a   : > { %v504_v30 = vmax.f32 %v439_v22, 0.0  ;;  %v506_v31 = vmax.f32 %v490_v23, 0.0  ;;  %v443_v32 = vpop.f32.mrb[7].mxu0  ;;  %v494_v33 = vpop.f32.mrb[7].mxu1 }
 0x11b   : > { %v505_v34 = vmax.f32 %v441_v26, 0.0  ;;  %v507_v35 = vmax.f32 %v492_v27, 0.0 }
 0x11d   : > { %v695_v36 = vpack.c.bf16 %v505_v34, %v504_v30  ;;  %v696_v37 = vpack.c.bf16 %v507_v35, %v506_v31 }
 0x11e   : > { %v576_v38 = vld [vmem:[%s941_s12] sm:$0xff] (%p837_p5)  ;;  %v578_v39 = vld [vmem:[%s941_s12 + $0x8] sm:$0xff] (%p837_p5) }
 0x11f   : > { %552 = vst [vmem:[%s941_s12 + $0x20] sm:$0xff] %v695_v36  ;;  %553 = vst [vmem:[%s941_s12 + $0x28] sm:$0xff] %v696_v37 }
 0x120   : > { %v580_v40 = vld [vmem:[%s941_s12 + $0x10] sm:$0xff]  ;;  %v582_v41 = vld [vmem:[%s941_s12 + $0x18] sm:$0xff]  ;;  %577 = vst [vmem:[%s563_s25] sm:$0xff] %v576_v38  ;;  %579 = vst [vmem:[%s563_s25 + $0x8] sm:$0xff] %v578_v39 }
 0x121   : > { %581 = vst [vmem:[%s563_s25 + $0xc0] sm:$0xff] %v580_v40  ;;  %583 = vst [vmem:[%s563_s25 + $0xc8] sm:$0xff] %v582_v41 }
 0x126   : > { %v584_v42 = vld [vmem:[%s941_s12 + $0x20] sm:$0xff]  ;;  %v586_v43 = vld [vmem:[%s941_s12 + $0x28] sm:$0xff] }
 0x127   : > { %585 = vst [vmem:[%s563_s25 + $0x180] sm:$0xff] %v584_v42  ;;  %587 = vst [vmem:[%s563_s25 + $0x188] sm:$0xff] %v586_v43 }
 0x128 PF: > { %p10_p10 = scmp.ge.s32.totalorder %s824_s16, 14   ;;  %s977_s12 = smov %s779_s13 }
 0x129   : > { %s978_s13 = smov %s835_s19  ;;  %s979_s14 = smov %s824_s16 }
 0x12a   :  { %12 = sbr.rel (!%p10_p10) target bundleno = 2 (0x2), region = 113 }

// kernel: policy_forward.7
= control target key start
LH: loop header
LB: loop body
LE: loop exit
PB: predicated region body
PF: predicated region fallthrough
CT: control target
= control target key end

     0   :  { %s2678_s12 = smov 0   ;;  %s2680_s13 = smov 0   ;;  %s3282_s0 = inlined_call_operand.vmem [shape: bf16[36,600], index: 0, kind: input, shape index: {}]   ;;  %s3283_s1 = inlined_call_operand.vmem [shape: f32[36,1], index: 1, kind: input, shape index: {}]   ;;  %s3284_s2 = inlined_call_operand.vmem [shape: bf16[600,1536], index: 2, kind: input, shape index: {}]   ;;  %s3285_s3 = inlined_call_operand.vmem [shape: bf16[36,1536], index: 3, kind: output, shape index: {}]  }
   0x1   :  { %s2682_s14 = smov 0  }
   0x2 LB: > { %s2082_s15 = sadd.s32 4294967295, %s2655_s14   ;;  %s2695_s16 = sadd.s32 1, %s2655_s14   ;;  %s2655_s14 = sphi %s2682_s14, %s3289_s14   ;;  %s2651_s13 = sphi %s2680_s13, %s3288_s13   ;;  %s2647_s12 = sphi %s2678_s12, %s3287_s12  }
   0x3   : > { %s59_s17 = ssub.s32 %s2655_s14, %s2695_s16  ;;  %s62_s18 = sadd.s32 1, %s2651_s13 }
   0x4   : > { %p60_p0 = scmp.eq.s32.totalorder %s59_s17, 0  ;;  %p69_p1 = scmp.ne.s32.totalorder %s2651_s13, %s2647_s12 }
   0x5   : > { %p70_p2 = scmp.eq.s32.totalorder %s2655_s14, 0  ;;  %p99_p3 = scmp.eq.s32.totalorder %s2082_s15, 2 }
   0x6   : > { %s2706_s19 = scalar_select %p60_p0, %s2651_s13, %s62_s18  }
   0x7   : > { %p71_p4 = por %p70_p2, %p69_p1  ;;  %p2708_p5 = por %p99_p3, %p69_p1 }
   0x8   : > { %p2085_p6 = scmp.ge.s32.totalorder %s2655_s14, 3 }
   0xa   : > { %127 = sbr.rel (%p2085_p6) target bundleno = 97 (0x61), region = 24 }
  0x11   : > { %130 = sbr.rel (!%p71_p4) target bundleno = 97 (0x61), region = 28  ;;  %s132_s21 = sand.u32 (%p71_p4), 1, %s2651_s13  }
  0x12   : > { %s2278_s22 = sshll.u32 (%p71_p4), %s2655_s14, 4  ;;  %s2358_s23 = smul.u32 (%p71_p4), 1200, %s132_s21 }
  0x13   : > { %s2718_s26 = scalar_lea.vmem (%p71_p4), %s3284_s2, %s2278_s22 }
  0x14   : > { %v150_v0 = vld [vmem:[%s2718_s26] sm:$0xff] (%p71_p4)  ;;  %v152_v1 = vld [vmem:[%s2718_s26 + $0x8] sm:$0xff] (%p71_p4)  ;;  %v154_v2 = vld [vmem:[%s2718_s26 + $0x30] sm:$0xff] (%p71_p4)  ;;  %s2726_s27 = scalar_lea.vmem (%p71_p4), [#allocation2], %s2358_s23 }
  0x15   : > { %v156_v3 = vld [vmem:[%s2718_s26 + $0x38] sm:$0xff] (%p71_p4)  ;;  %v158_v4 = vld [vmem:[%s2718_s26 + $0x60] sm:$0xff] (%p71_p4)  ;;  %v160_v5 = vld [vmem:[%s2718_s26 + $0x68] sm:$0xff] (%p71_p4)  ;;  %151 = vst [vmem:[%s2726_s27] sm:$0xff] (%p71_p4), %v150_v0 }
  0x16   : > { %153 = vst [vmem:[%s2726_s27 + $0x8] sm:$0xff] (%p71_p4), %v152_v1  ;;  %155 = vst [vmem:[%s2726_s27 + $0x10] sm:$0xff] (%p71_p4), %v154_v2  ;;  %v162_v6 = vld [vmem:[%s2718_s26 + $0x90] sm:$0xff] (%p71_p4)  ;;  %v164_v7 = vld [vmem:[%s2718_s26 + $0x98] sm:$0xff] (%p71_p4) }
  0x17   : > { %157 = vst [vmem:[%s2726_s27 + $0x18] sm:$0xff] (%p71_p4), %v156_v3  ;;  %159 = vst [vmem:[%s2726_s27 + $0x20] sm:$0xff] (%p71_p4), %v158_v4  ;;  %v166_v8 = vld [vmem:[%s2718_s26 + $0xc0] sm:$0xff] (%p71_p4)  ;;  %v168_v9 = vld [vmem:[%s2718_s26 + $0xc8] sm:$0xff] (%p71_p4) }
  0x18   : > { %161 = vst [vmem:[%s2726_s27 + $0x28] sm:$0xff] %v160_v5  ;;  %163 = vst [vmem:[%s2726_s27 + $0x30] sm:$0xff] %v162_v6  ;;  %v170_v10 = vld [vmem:[%s2718_s26 + $0xf0] sm:$0xff]  ;;  %v172_v11 = vld [vmem:[%s2718_s26 + $0xf8] sm:$0xff] }
  0x19   : > { %165 = vst [vmem:[%s2726_s27 + $0x38] sm:$0xff] %v164_v7  ;;  %167 = vst [vmem:[%s2726_s27 + $0x40] sm:$0xff] %v166_v8  ;;  %v174_v12 = vld [vmem:[%s2718_s26 + $0x120] sm:$0xff]  ;;  %v176_v13 = vld [vmem:[%s2718_s26 + $0x128] sm:$0xff] }
  0x1a   : > { %169 = vst [vmem:[%s2726_s27 + $0x48] sm:$0xff] %v168_v9  ;;  %171 = vst [vmem:[%s2726_s27 + $0x50] sm:$0xff] %v170_v10  ;;  %v178_v14 = vld [vmem:[%s2718_s26 + $0x150] sm:$0xff]  ;;  %v180_v15 = vld [vmem:[%s2718_s26 + $0x158] sm:$0xff] }
  0x1b   : > { %173 = vst [vmem:[%s2726_s27 + $0x58] sm:$0xff] %v172_v11  ;;  %175 = vst [vmem:[%s2726_s27 + $0x60] sm:$0xff] %v174_v12  ;;  %v182_v16 = vld [vmem:[%s2718_s26 + $0x180] sm:$0xff]  ;;  %v184_v17 = vld [vmem:[%s2718_s26 + $0x188] sm:$0xff] }
  0x1c   : > { %177 = vst [vmem:[%s2726_s27 + $0x68] sm:$0xff] %v176_v13  ;;  %179 = vst [vmem:[%s2726_s27 + $0x70] sm:$0xff] %v178_v14  ;;  %v186_v18 = vld [vmem:[%s2718_s26 + $0x1b0] sm:$0xff]  ;;  %v188_v19 = vld [vmem:[%s2718_s26 + $0x1b8] sm:$0xff] }
  0x1d   : > { %181 = vst [vmem:[%s2726_s27 + $0x78] sm:$0xff] %v180_v15  ;;  %183 = vst [vmem:[%s2726_s27 + $0x80] sm:$0xff] %v182_v16  ;;  %v190_v20 = vld [vmem:[%s2718_s26 + $0x1e0] sm:$0xff]  ;;  %v192_v21 = vld [vmem:[%s2718_s26 + $0x1e8] sm:$0xff] }
  0x1e   : > { %185 = vst [vmem:[%s2726_s27 + $0x88] sm:$0xff] %v184_v17  ;;  %187 = vst [vmem:[%s2726_s27 + $0x90] sm:$0xff] %v186_v18  ;;  %v194_v22 = vld [vmem:[%s2718_s26 + $0x210] sm:$0xff]  ;;  %v196_v23 = vld [vmem:[%s2718_s26 + $0x218] sm:$0xff] }
  0x1f   : > { %189 = vst [vmem:[%s2726_s27 + $0x98] sm:$0xff] %v188_v19  ;;  %191 = vst [vmem:[%s2726_s27 + $0xa0] sm:$0xff] %v190_v20  ;;  %v198_v24 = vld [vmem:[%s2718_s26 + $0x240] sm:$0xff]  ;;  %v200_v25 = vld [vmem:[%s2718_s26 + $0x248] sm:$0xff] }
  0x20   : > { %193 = vst [vmem:[%s2726_s27 + $0xa8] sm:$0xff] %v192_v21  ;;  %195 = vst [vmem:[%s2726_s27 + $0xb0] sm:$0xff] %v194_v22  ;;  %v202_v26 = vld [vmem:[%s2718_s26 + $0x270] sm:$0xff]  ;;  %v204_v27 = vld [vmem:[%s2718_s26 + $0x278] sm:$0xff] }
  0x21   : > { %197 = vst [vmem:[%s2726_s27 + $0xb8] sm:$0xff] %v196_v23  ;;  %199 = vst [vmem:[%s2726_s27 + $0xc0] sm:$0xff] %v198_v24  ;;  %v206_v28 = vld [vmem:[%s2718_s26 + $0x2a0] sm:$0xff]  ;;  %v208_v29 = vld [vmem:[%s2718_s26 + $0x2a8] sm:$0xff] }
  0x22   : > { %201 = vst [vmem:[%s2726_s27 + $0xc8] sm:$0xff] %v200_v25  ;;  %203 = vst [vmem:[%s2726_s27 + $0xd0] sm:$0xff] %v202_v26  ;;  %v210_v30 = vld [vmem:[%s2718_s26 + $0x2d0] sm:$0xff]  ;;  %v212_v31 = vld [vmem:[%s2718_s26 + $0x2d8] sm:$0xff] }
  0x23   : > { %205 = vst [vmem:[%s2726_s27 + $0xd8] sm:$0xff] %v204_v27  ;;  %207 = vst [vmem:[%s2726_s27 + $0xe0] sm:$0xff] %v206_v28  ;;  %v214_v32 = vld [vmem:[%s2718_s26 + $0x300] sm:$0xff]  ;;  %v216_v33 = vld [vmem:[%s2718_s26 + $0x308] sm:$0xff] }
  0x24   : > { %209 = vst [vmem:[%s2726_s27 + $0xe8] sm:$0xff] %v208_v29  ;;  %211 = vst [vmem:[%s2726_s27 + $0xf0] sm:$0xff] %v210_v30  ;;  %v218_v34 = vld [vmem:[%s2718_s26 + $0x330] sm:$0xff]  ;;  %v220_v35 = vld [vmem:[%s2718_s26 + $0x338] sm:$0xff] }
  0x25   : > { %213 = vst [vmem:[%s2726_s27 + $0xf8] sm:$0xff] %v212_v31  ;;  %215 = vst [vmem:[%s2726_s27 + $0x100] sm:$0xff] %v214_v32  ;;  %v222_v36 = vld [vmem:[%s2718_s26 + $0x360] sm:$0xff]  ;;  %v224_v37 = vld [vmem:[%s2718_s26 + $0x368] sm:$0xff] }
  0x26   : > { %217 = vst [vmem:[%s2726_s27 + $0x108] sm:$0xff] %v216_v33  ;;  %219 = vst [vmem:[%s2726_s27 + $0x110] sm:$0xff] %v218_v34  ;;  %v226_v38 = vld [vmem:[%s2718_s26 + $0x390] sm:$0xff]  ;;  %v228_v39 = vld [vmem:[%s2718_s26 + $0x398] sm:$0xff] }
  0x27   : > { %221 = vst [vmem:[%s2726_s27 + $0x118] sm:$0xff] %v220_v35  ;;  %223 = vst [vmem:[%s2726_s27 + $0x120] sm:$0xff] %v222_v36  ;;  %v230_v40 = vld [vmem:[%s2718_s26 + $0x3c0] sm:$0xff]  ;;  %v232_v41 = vld [vmem:[%s2718_s26 + $0x3c8] sm:$0xff] }
  0x28   : > { %225 = vst [vmem:[%s2726_s27 + $0x128] sm:$0xff] %v224_v37  ;;  %227 = vst [vmem:[%s2726_s27 + $0x130] sm:$0xff] %v226_v38  ;;  %v234_v42 = vld [vmem:[%s2718_s26 + $0x3f0] sm:$0xff]  ;;  %v236_v43 = vld [vmem:[%s2718_s26 + $0x3f8] sm:$0xff] }
  0x29   : > { %229 = vst [vmem:[%s2726_s27 + $0x138] sm:$0xff] %v228_v39  ;;  %231 = vst [vmem:[%s2726_s27 + $0x140] sm:$0xff] %v230_v40  ;;  %v238_v44 = vld [vmem:[%s2718_s26 + $0x420] sm:$0xff]  ;;  %v240_v45 = vld [vmem:[%s2718_s26 + $0x428] sm:$0xff] }
  0x2a   : > { %233 = vst [vmem:[%s2726_s27 + $0x148] sm:$0xff] %v232_v41  ;;  %235 = vst [vmem:[%s2726_s27 + $0x150] sm:$0xff] %v234_v42  ;;  %v242_v46 = vld [vmem:[%s2718_s26 + $0x450] sm:$0xff]  ;;  %v244_v47 = vld [vmem:[%s2718_s26 + $0x458] sm:$0xff] }
  0x2b   : > { %237 = vst [vmem:[%s2726_s27 + $0x158] sm:$0xff] %v236_v43  ;;  %239 = vst [vmem:[%s2726_s27 + $0x160] sm:$0xff] %v238_v44  ;;  %v246_v48 = vld [vmem:[%s2718_s26 + $0x480] sm:$0xff]  ;;  %v248_v49 = vld [vmem:[%s2718_s26 + $0x488] sm:$0xff] }
  0x2c   : > { %241 = vst [vmem:[%s2726_s27 + $0x168] sm:$0xff] %v240_v45  ;;  %243 = vst [vmem:[%s2726_s27 + $0x170] sm:$0xff] %v242_v46  ;;  %v250_v50 = vld [vmem:[%s2718_s26 + $0x4b0] sm:$0xff]  ;;  %v252_v51 = vld [vmem:[%s2718_s26 + $0x4b8] sm:$0xff] }
  0x2d   : > { %245 = vst [vmem:[%s2726_s27 + $0x178] sm:$0xff] %v244_v47  ;;  %247 = vst [vmem:[%s2726_s27 + $0x180] sm:$0xff] %v246_v48  ;;  %v254_v52 = vld [vmem:[%s2718_s26 + $0x4e0] sm:$0xff]  ;;  %v256_v53 = vld [vmem:[%s2718_s26 + $0x4e8] sm:$0xff] }
  0x2e   : > { %249 = vst [vmem:[%s2726_s27 + $0x188] sm:$0xff] %v248_v49  ;;  %251 = vst [vmem:[%s2726_s27 + $0x190] sm:$0xff] %v250_v50  ;;  %v258_v54 = vld [vmem:[%s2718_s26 + $0x510] sm:$0xff]  ;;  %v260_v55 = vld [vmem:[%s2718_s26 + $0x518] sm:$0xff] }
  0x2f   : > { %253 = vst [vmem:[%s2726_s27 + $0x198] sm:$0xff] %v252_v51  ;;  %255 = vst [vmem:[%s2726_s27 + $0x1a0] sm:$0xff] %v254_v52  ;;  %v262_v56 = vld [vmem:[%s2718_s26 + $0x540] sm:$0xff]  ;;  %v264_v57 = vld [vmem:[%s2718_s26 + $0x548] sm:$0xff] }
  0x30   : > { %257 = vst [vmem:[%s2726_s27 + $0x1a8] sm:$0xff] %v256_v53  ;;  %259 = vst [vmem:[%s2726_s27 + $0x1b0] sm:$0xff] %v258_v54  ;;  %v266_v58 = vld [vmem:[%s2718_s26 + $0x570] sm:$0xff]  ;;  %v268_v59 = vld [vmem:[%s2718_s26 + $0x578] sm:$0xff] }
  0x31   : > { %261 = vst [vmem:[%s2726_s27 + $0x1b8] sm:$0xff] %v260_v55  ;;  %263 = vst [vmem:[%s2726_s27 + $0x1c0] sm:$0xff] %v262_v56  ;;  %v270_v60 = vld [vmem:[%s2718_s26 + $0x5a0] sm:$0xff]  ;;  %v272_v61 = vld [vmem:[%s2718_s26 + $0x5a8] sm:$0xff] }
  0x32   : > { %265 = vst [vmem:[%s2726_s27 + $0x1c8] sm:$0xff] %v264_v57  ;;  %267 = vst [vmem:[%s2726_s27 + $0x1d0] sm:$0xff] %v266_v58  ;;  %v274_v62 = vld [vmem:[%s2718_s26 + $0x5d0] sm:$0xff]  ;;  %v276_v63 = vld [vmem:[%s2718_s26 + $0x5d8] sm:$0xff] }
  0x33   : > { %269 = vst [vmem:[%s2726_s27 + $0x1d8] sm:$0xff] %v268_v59  ;;  %271 = vst [vmem:[%s2726_s27 + $0x1e0] sm:$0xff] %v270_v60  ;;  %v278_v0 = vld [vmem:[%s2718_s26 + $0x600] sm:$0xff]  ;;  %v280_v1 = vld [vmem:[%s2718_s26 + $0x608] sm:$0xff] }
  0x34   : > { %273 = vst [vmem:[%s2726_s27 + $0x1e8] sm:$0xff] %v272_v61  ;;  %275 = vst [vmem:[%s2726_s27 + $0x1f0] sm:$0xff] %v274_v62  ;;  %v282_v2 = vld [vmem:[%s2718_s26 + $0x630] sm:$0xff]  ;;  %v284_v3 = vld [vmem:[%s2718_s26 + $0x638] sm:$0xff] }
  0x35   : > { %277 = vst [vmem:[%s2726_s27 + $0x1f8] sm:$0xff] %v276_v63  ;;  %279 = vst [vmem:[%s2726_s27 + $0x200] sm:$0xff] %v278_v0  ;;  %v286_v4 = vld [vmem:[%s2718_s26 + $0x660] sm:$0xff]  ;;  %v288_v5 = vld [vmem:[%s2718_s26 + $0x668] sm:$0xff] }
  0x36   : > { %281 = vst [vmem:[%s2726_s27 + $0x208] sm:$0xff] %v280_v1  ;;  %283 = vst [vmem:[%s2726_s27 + $0x210] sm:$0xff] %v282_v2  ;;  %v290_v6 = vld [vmem:[%s2718_s26 + $0x690] sm:$0xff]  ;;  %v292_v7 = vld [vmem:[%s2718_s26 + $0x698] sm:$0xff] }
  0x37   : > { %285 = vst [vmem:[%s2726_s27 + $0x218] sm:$0xff] %v284_v3  ;;  %287 = vst [vmem:[%s2726_s27 + $0x220] sm:$0xff] %v286_v4  ;;  %v294_v8 = vld [vmem:[%s2718_s26 + $0x6c0] sm:$0xff]  ;;  %v296_v9 = vld [vmem:[%s2718_s26 + $0x6c8] sm:$0xff] }
  0x38   : > { %289 = vst [vmem:[%s2726_s27 + $0x228] sm:$0xff] %v288_v5  ;;  %291 = vst [vmem:[%s2726_s27 + $0x230] sm:$0xff] %v290_v6  ;;  %v298_v10 = vld [vmem:[%s2718_s26 + $0x6f0] sm:$0xff]  ;;  %v300_v11 = vld [vmem:[%s2718_s26 + $0x6f8] sm:$0xff] }
  0x39   : > { %293 = vst [vmem:[%s2726_s27 + $0x238] sm:$0xff] %v292_v7  ;;  %295 = vst [vmem:[%s2726_s27 + $0x240] sm:$0xff] %v294_v8  ;;  %v302_v12 = vld [vmem:[%s2718_s26 + $0x720] sm:$0xff]  ;;  %v304_v13 = vld [vmem:[%s2718_s26 + $0x728] sm:$0xff] }
  0x3a   : > { %297 = vst [vmem:[%s2726_s27 + $0x248] sm:$0xff] %v296_v9  ;;  %299 = vst [vmem:[%s2726_s27 + $0x250] sm:$0xff] %v298_v10  ;;  %v306_v14 = vld [vmem:[%s2718_s26 + $0x750] sm:$0xff]  ;;  %v308_v15 = vld [vmem:[%s2718_s26 + $0x758] sm:$0xff] }
  0x3b   : > { %301 = vst [vmem:[%s2726_s27 + $0x258] sm:$0xff] %v300_v11  ;;  %303 = vst [vmem:[%s2726_s27 + $0x260] sm:$0xff] %v302_v12  ;;  %v310_v16 = vld [vmem:[%s2718_s26 + $0x780] sm:$0xff]  ;;  %v312_v17 = vld [vmem:[%s2718_s26 + $0x788] sm:$0xff] }
  0x3c   : > { %305 = vst [vmem:[%s2726_s27 + $0x268] sm:$0xff] %v304_v13  ;;  %307 = vst [vmem:[%s2726_s27 + $0x270] sm:$0xff] %v306_v14  ;;  %v314_v18 = vld [vmem:[%s2718_s26 + $0x7b0] sm:$0xff]  ;;  %v316_v19 = vld [vmem:[%s2718_s26 + $0x7b8] sm:$0xff] }
  0x3d   : > { %309 = vst [vmem:[%s2726_s27 + $0x278] sm:$0xff] %v308_v15  ;;  %311 = vst [vmem:[%s2726_s27 + $0x280] sm:$0xff] %v310_v16  ;;  %v318_v20 = vld [vmem:[%s2718_s26 + $0x7e0] sm:$0xff]  ;;  %v320_v21 = vld [vmem:[%s2718_s26 + $0x7e8] sm:$0xff] }
  0x3e   : > { %313 = vst [vmem:[%s2726_s27 + $0x288] sm:$0xff] %v312_v17  ;;  %315 = vst [vmem:[%s2726_s27 + $0x290] sm:$0xff] %v314_v18  ;;  %v322_v22 = vld [vmem:[%s2718_s26 + $0x810] sm:$0xff]  ;;  %v324_v23 = vld [vmem:[%s2718_s26 + $0x818] sm:$0xff] }
  0x3f   : > { %317 = vst [vmem:[%s2726_s27 + $0x298] sm:$0xff] %v316_v19  ;;  %319 = vst [vmem:[%s2726_s27 + $0x2a0] sm:$0xff] %v318_v20  ;;  %v326_v24 = vld [vmem:[%s2718_s26 + $0x840] sm:$0xff]  ;;  %v328_v25 = vld [vmem:[%s2718_s26 + $0x848] sm:$0xff] }
  0x40   : > { %321 = vst [vmem:[%s2726_s27 + $0x2a8] sm:$0xff] %v320_v21  ;;  %323 = vst [vmem:[%s2726_s27 + $0x2b0] sm:$0xff] %v322_v22  ;;  %v330_v26 = vld [vmem:[%s2718_s26 + $0x870] sm:$0xff]  ;;  %v332_v27 = vld [vmem:[%s2718_s26 + $0x878] sm:$0xff] }
  0x41   : > { %325 = vst [vmem:[%s2726_s27 + $0x2b8] sm:$0xff] %v324_v23  ;;  %327 = vst [vmem:[%s2726_s27 + $0x2c0] sm:$0xff] %v326_v24  ;;  %v334_v28 = vld [vmem:[%s2718_s26 + $0x8a0] sm:$0xff]  ;;  %v336_v29 = vld [vmem:[%s2718_s26 + $0x8a8] sm:$0xff] }
  0x42   : > { %329 = vst [vmem:[%s2726_s27 + $0x2c8] sm:$0xff] %v328_v25  ;;  %331 = vst [vmem:[%s2726_s27 + $0x2d0] sm:$0xff] %v330_v26  ;;  %v338_v30 = vld [vmem:[%s2718_s26 + $0x8d0] sm:$0xff]  ;;  %v340_v31 = vld [vmem:[%s2718_s26 + $0x8d8] sm:$0xff] }
  0x43   : > { %333 = vst [vmem:[%s2726_s27 + $0x2d8] sm:$0xff] %v332_v27  ;;  %335 = vst [vmem:[%s2726_s27 + $0x2e0] sm:$0xff] %v334_v28  ;;  %v342_v32 = vld [vmem:[%s2718_s26 + $0x900] sm:$0xff]  ;;  %v344_v33 = vld [vmem:[%s2718_s26 + $0x908] sm:$0xff] }
  0x44   : > { %337 = vst [vmem:[%s2726_s27 + $0x2e8] sm:$0xff] %v336_v29  ;;  %339 = vst [vmem:[%s2726_s27 + $0x2f0] sm:$0xff] %v338_v30  ;;  %v346_v34 = vld [vmem:[%s2718_s26 + $0x930] sm:$0xff]  ;;  %v348_v35 = vld [vmem:[%s2718_s26 + $0x938] sm:$0xff] }
  0x45   : > { %341 = vst [vmem:[%s2726_s27 + $0x2f8] sm:$0xff] %v340_v31  ;;  %343 = vst [vmem:[%s2726_s27 + $0x300] sm:$0xff] %v342_v32  ;;  %v350_v36 = vld [vmem:[%s2718_s26 + $0x960] sm:$0xff]  ;;  %v352_v37 = vld [vmem:[%s2718_s26 + $0x968] sm:$0xff] }
  0x46   : > { %345 = vst [vmem:[%s2726_s27 + $0x308] sm:$0xff] %v344_v33  ;;  %347 = vst [vmem:[%s2726_s27 + $0x310] sm:$0xff] %v346_v34  ;;  %v354_v38 = vld [vmem:[%s2718_s26 + $0x990] sm:$0xff]  ;;  %v356_v39 = vld [vmem:[%s2718_s26 + $0x998] sm:$0xff] }
  0x47   : > { %349 = vst [vmem:[%s2726_s27 + $0x318] sm:$0xff] %v348_v35  ;;  %351 = vst [vmem:[%s2726_s27 + $0x320] sm:$0xff] %v350_v36  ;;  %v358_v40 = vld [vmem:[%s2718_s26 + $0x9c0] sm:$0xff]  ;;  %v360_v41 = vld [vmem:[%s2718_s26 + $0x9c8] sm:$0xff] }
  0x48   : > { %353 = vst [vmem:[%s2726_s27 + $0x328] sm:$0xff] %v352_v37  ;;  %355 = vst [vmem:[%s2726_s27 + $0x330] sm:$0xff] %v354_v38  ;;  %v362_v42 = vld [vmem:[%s2718_s26 + $0x9f0] sm:$0xff]  ;;  %v364_v43 = vld [vmem:[%s2718_s26 + $0x9f8] sm:$0xff] }
  0x49   : > { %357 = vst [vmem:[%s2726_s27 + $0x338] sm:$0xff] %v356_v39  ;;  %359 = vst [vmem:[%s2726_s27 + $0x340] sm:$0xff] %v358_v40  ;;  %v366_v44 = vld [vmem:[%s2718_s26 + $0xa20] sm:$0xff]  ;;  %v368_v45 = vld [vmem:[%s2718_s26 + $0xa28] sm:$0xff] }
  0x4a   : > { %361 = vst [vmem:[%s2726_s27 + $0x348] sm:$0xff] %v360_v41  ;;  %363 = vst [vmem:[%s2726_s27 + $0x350] sm:$0xff] %v362_v42  ;;  %v370_v46 = vld [vmem:[%s2718_s26 + $0xa50] sm:$0xff]  ;;  %v372_v47 = vld [vmem:[%s2718_s26 + $0xa58] sm:$0xff] }
  0x4b   : > { %365 = vst [vmem:[%s2726_s27 + $0x358] sm:$0xff] %v364_v43  ;;  %367 = vst [vmem:[%s2726_s27 + $0x360] sm:$0xff] %v366_v44  ;;  %v374_v48 = vld [vmem:[%s2718_s26 + $0xa80] sm:$0xff]  ;;  %v376_v49 = vld [vmem:[%s2718_s26 + $0xa88] sm:$0xff] }
  0x4c   : > { %369 = vst [vmem:[%s2726_s27 + $0x368] sm:$0xff] %v368_v45  ;;  %371 = vst [vmem:[%s2726_s27 + $0x370] sm:$0xff] %v370_v46  ;;  %v378_v50 = vld [vmem:[%s2718_s26 + $0xab0] sm:$0xff]  ;;  %v380_v51 = vld [vmem:[%s2718_s26 + $0xab8] sm:$0xff] }
  0x4d   : > { %373 = vst [vmem:[%s2726_s27 + $0x378] sm:$0xff] %v372_v47  ;;  %375 = vst [vmem:[%s2726_s27 + $0x380] sm:$0xff] %v374_v48  ;;  %v382_v52 = vld [vmem:[%s2718_s26 + $0xae0] sm:$0xff]  ;;  %v384_v53 = vld [vmem:[%s2718_s26 + $0xae8] sm:$0xff] }
  0x4e   : > { %377 = vst [vmem:[%s2726_s27 + $0x388] sm:$0xff] %v376_v49  ;;  %379 = vst [vmem:[%s2726_s27 + $0x390] sm:$0xff] %v378_v50  ;;  %v386_v54 = vld [vmem:[%s2718_s26 + $0xb10] sm:$0xff]  ;;  %v388_v55 = vld [vmem:[%s2718_s26 + $0xb18] sm:$0xff] }
  0x4f   : > { %381 = vst [vmem:[%s2726_s27 + $0x398] sm:$0xff] %v380_v51  ;;  %383 = vst [vmem:[%s2726_s27 + $0x3a0] sm:$0xff] %v382_v52  ;;  %v390_v56 = vld [vmem:[%s2718_s26 + $0xb40] sm:$0xff]  ;;  %v392_v57 = vld [vmem:[%s2718_s26 + $0xb48] sm:$0xff] }
  0x50   : > { %385 = vst [vmem:[%s2726_s27 + $0x3a8] sm:$0xff] %v384_v53  ;;  %387 = vst [vmem:[%s2726_s27 + $0x3b0] sm:$0xff] %v386_v54  ;;  %v394_v58 = vld [vmem:[%s2718_s26 + $0xb70] sm:$0xff]  ;;  %v396_v59 = vld [vmem:[%s2718_s26 + $0xb78] sm:$0xff] }
  0x51   : > { %389 = vst [vmem:[%s2726_s27 + $0x3b8] sm:$0xff] %v388_v55  ;;  %391 = vst [vmem:[%s2726_s27 + $0x3c0] sm:$0xff] %v390_v56  ;;  %v398_v60 = vld [vmem:[%s2718_s26 + $0xba0] sm:$0xff]  ;;  %v400_v61 = vld [vmem:[%s2718_s26 + $0xba8] sm:$0xff] }
  0x52   : > { %393 = vst [vmem:[%s2726_s27 + $0x3c8] sm:$0xff] %v392_v57  ;;  %395 = vst [vmem:[%s2726_s27 + $0x3d0] sm:$0xff] %v394_v58  ;;  %v402_v62 = vld [vmem:[%s2718_s26 + $0xbd0] sm:$0xff]  ;;  %v404_v63 = vld [vmem:[%s2718_s26 + $0xbd8] sm:$0xff] }
  0x53   : > { %397 = vst [vmem:[%s2726_s27 + $0x3d8] sm:$0xff] %v396_v59  ;;  %399 = vst [vmem:[%s2726_s27 + $0x3e0] sm:$0xff] %v398_v60  ;;  %v406_v0 = vld [vmem:[%s2718_s26 + $0xc00] sm:$0xff]  ;;  %v408_v1 = vld [vmem:[%s2718_s26 + $0xc08] sm:$0xff] }
  0x54   : > { %401 = vst [vmem:[%s2726_s27 + $0x3e8] sm:$0xff] %v400_v61  ;;  %403 = vst [vmem:[%s2726_s27 + $0x3f0] sm:$0xff] %v402_v62  ;;  %v410_v2 = vld [vmem:[%s2718_s26 + $0xc30] sm:$0xff]  ;;  %v412_v3 = vld [vmem:[%s2718_s26 + $0xc38] sm:$0xff] }
  0x55   : > { %405 = vst [vmem:[%s2726_s27 + $0x3f8] sm:$0xff] %v404_v63  ;;  %407 = vst [vmem:[%s2726_s27 + $0x400] sm:$0xff] %v406_v0  ;;  %v414_v4 = vld [vmem:[%s2718_s26 + $0xc60] sm:$0xff]  ;;  %v416_v5 = vld [vmem:[%s2718_s26 + $0xc68] sm:$0xff] }
  0x56   : > { %409 = vst [vmem:[%s2726_s27 + $0x408] sm:$0xff] %v408_v1  ;;  %411 = vst [vmem:[%s2726_s27 + $0x410] sm:$0xff] %v410_v2  ;;  %v418_v6 = vld [vmem:[%s2718_s26 + $0xc90] sm:$0xff]  ;;  %v420_v7 = vld [vmem:[%s2718_s26 + $0xc98] sm:$0xff] }
  0x57   : > { %413 = vst [vmem:[%s2726_s27 + $0x418] sm:$0xff] %v412_v3  ;;  %415 = vst [vmem:[%s2726_s27 + $0x420] sm:$0xff] %v414_v4  ;;  %v422_v8 = vld [vmem:[%s2718_s26 + $0xcc0] sm:$0xff]  ;;  %v424_v9 = vld [vmem:[%s2718_s26 + $0xcc8] sm:$0xff] }
  0x58   : > { %417 = vst [vmem:[%s2726_s27 + $0x428] sm:$0xff] %v416_v5  ;;  %419 = vst [vmem:[%s2726_s27 + $0x430] sm:$0xff] %v418_v6  ;;  %v426_v10 = vld [vmem:[%s2718_s26 + $0xcf0] sm:$0xff]  ;;  %v428_v11 = vld [vmem:[%s2718_s26 + $0xcf8] sm:$0xff] }
  0x59   : > { %421 = vst [vmem:[%s2726_s27 + $0x438] sm:$0xff] %v420_v7  ;;  %423 = vst [vmem:[%s2726_s27 + $0x440] sm:$0xff] %v422_v8  ;;  %v430_v12 = vld [vmem:[%s2718_s26 + $0xd20] sm:$0xff]  ;;  %v432_v13 = vld [vmem:[%s2718_s26 + $0xd28] sm:$0xff] }
  0x5a   : > { %425 = vst [vmem:[%s2726_s27 + $0x448] sm:$0xff] %v424_v9  ;;  %427 = vst [vmem:[%s2726_s27 + $0x450] sm:$0xff] %v426_v10  ;;  %v434_v14 = vld [vmem:[%s2718_s26 + $0xd50] sm:$0xff]  ;;  %v436_v15 = vld [vmem:[%s2718_s26 + $0xd58] sm:$0xff] }
  0x5b   : > { %429 = vst [vmem:[%s2726_s27 + $0x458] sm:$0xff] %v428_v11  ;;  %431 = vst [vmem:[%s2726_s27 + $0x460] sm:$0xff] %v430_v12  ;;  %v438_v16 = vld [vmem:[%s2718_s26 + $0xd80] sm:$0xff]  ;;  %v440_v17 = vld [vmem:[%s2718_s26 + $0xd88] sm:$0xff] }
  0x5c   : > { %433 = vst [vmem:[%s2726_s27 + $0x468] sm:$0xff] %v432_v13  ;;  %435 = vst [vmem:[%s2726_s27 + $0x470] sm:$0xff] %v434_v14  ;;  %v442_v18 = vld [vmem:[%s2718_s26 + $0xdb0] sm:$0xff]  ;;  %v444_v19 = vld [vmem:[%s2718_s26 + $0xdb8] sm:$0xff] }
  0x5d   : > { %437 = vst [vmem:[%s2726_s27 + $0x478] sm:$0xff] %v436_v15  ;;  %439 = vst [vmem:[%s2726_s27 + $0x480] sm:$0xff] %v438_v16  ;;  %v446_v20 = vld [vmem:[%s2718_s26 + $0xde0] sm:$0xff]  ;;  %v448_v21 = vld [vmem:[%s2718_s26 + $0xde8] sm:$0xff] }
  0x5e   : > { %441 = vst [vmem:[%s2726_s27 + $0x488] sm:$0xff] %v440_v17  ;;  %443 = vst [vmem:[%s2726_s27 + $0x490] sm:$0xff] %v442_v18 }
  0x5f   : > { %445 = vst [vmem:[%s2726_s27 + $0x498] sm:$0xff] %v444_v19  ;;  %447 = vst [vmem:[%s2726_s27 + $0x4a0] sm:$0xff] %v446_v20 }
  0x60   : > { %449 = vst [vmem:[%s2726_s27 + $0x4a8] sm:$0xff] %v448_v21 }
  0x61 PF: > { %p2088_p7 = scmp.ge.s32.totalorder %s2655_s14, 1  ;;  %p454_p8 = scmp.lt.s32.totalorder %s2655_s14, 4 }
  0x63   : > { %p455_p9 = pnand %p2088_p7, %p454_p8 }
  0x64   : > { %s461_s28 = sand.u32 (!%p455_p9), 1, %s2647_s12   ;;  %v2486_v22 = vld [vmem:[%s3282_s0 + $0x4] ss:$20 sps:$4 sm:$0xff] (!%p455_p9)   ;;  %v2657_v53 = vmov (!%p455_p9), 0   ;;  %vm1508_vm0 = vcmask (!%p455_p9), 1043456   ;;  %vm1498_vm1 = vcmask (!%p455_p9), 719872  }
  0x65   : > { %458 = sbr.rel (%p455_p9) target bundleno = 502 (0x1f6), region = 51  ;;  %1553 = vmatprep.mubr.bf16.mxu0 (!%p455_p9), %v2486_v22  ;;  %1736 = vmatprep.mubr.bf16.mxu1 (!%p455_p9), %v2486_v22 }
  0x66   : > { %s2359_s29 = smul.u32 (!%p455_p9), 1200, %s461_s28  ;;  %2386 = vset.pattern.permute.xlu0 (!%p455_p9), %v2657_v53  ;;  %2387 = vset.pattern.permute.xlu1 (!%p455_p9), %v2657_v53 }
  0x68   : > { %s3030_s5 = scalar_lea.vmem (!%p455_p9), [#allocation2], %s2359_s29  ;;  %s2360_s29 = smul.u32 (!%p455_p9), 80, %s461_s28 }
  0x69   : > { %v2388_v23 = vld [vmem:[%s3030_s5 + $0x4] ss:$16 sps:$4 sm:$0xff] (!%p455_p9)   ;;  %v2390_v24 = vld [vmem:[%s3030_s5 + $0xc] ss:$16 sps:$4 sm:$0xff] (!%p455_p9)   ;;  %v2392_v25 = vld [vmem:[%s3030_s5] ss:$16 sps:$4 sm:$0xff] (!%p455_p9)  }
  0x6a   : > { %1521 = vmatprep.subr.bf16.mxu0 (!%p455_p9), %v2388_v23  ;;  %v2393_v26 = vld [vmem:[%s3030_s5 + $0x8] ss:$16 sps:$4 sm:$0xff] (!%p455_p9)   ;;  %1704 = vmatprep.subr.bf16.mxu1 (!%p455_p9), %v2390_v24  ;;  %v2394_v27 = vld [vmem:[%s3030_s5 + $0x24] ss:$16 sps:$4 sm:$0xff] (!%p455_p9)   ;;  %v2396_v28 = vld [vmem:[%s3030_s5 + $0x2c] ss:$16 sps:$4 sm:$0xff] (!%p455_p9)  }
  0x6b   : > { %1522 = vmatpush1.bf16.msra.mxu0 (!%p455_p9), %v2392_v25  ;;  %1705 = vmatpush1.bf16.msra.mxu1 (!%p455_p9), %v2393_v26  ;;  %v2398_v29 = vld [vmem:[%s3030_s5 + $0x20] ss:$16 sps:$4 sm:$0xff] (!%p455_p9)   ;;  %v2399_v30 = vld [vmem:[%s3030_s5 + $0x28] ss:$16 sps:$4 sm:$0xff] (!%p455_p9)   ;;  %v2400_v31 = vld [vmem:[%s3030_s5 + $0x44] ss:$16 sps:$4 sm:$0xff] (!%p455_p9)  }
  0x6c   : > { %1523 = vmatprep.subr.bf16.mxu0 %v2394_v27  ;;  %1706 = vmatprep.subr.bf16.mxu1 %v2396_v28  ;;  %v2402_v32 = vld [vmem:[%s3030_s5 + $0x4c] ss:$16 sps:$4 sm:$0xff]   ;;  %v2404_v33 = vld [vmem:[%s3030_s5 + $0x40] ss:$16 sps:$4 sm:$0xff]   ;;  %v2405_v34 = vld [vmem:[%s3030_s5 + $0x48] ss:$16 sps:$4 sm:$0xff]  }
  0x6d   : > { %v2406_v35 = vld [vmem:[%s3030_s5 + $0x64] ss:$16 sps:$4 sm:$0xff]   ;;  %v2408_v36 = vld [vmem:[%s3030_s5 + $0x6c] ss:$16 sps:$4 sm:$0xff]   ;;  %v2410_v37 = vld [vmem:[%s3030_s5 + $0x60] ss:$16 sps:$4 sm:$0xff]  }
  0x6e   : > { %v2411_v38 = vld [vmem:[%s3030_s5 + $0x68] ss:$16 sps:$4 sm:$0xff]   ;;  %v2412_v39 = vld [vmem:[%s3030_s5 + $0x84] ss:$16 sps:$4 sm:$0xff]   ;;  %v2414_v40 = vld [vmem:[%s3030_s5 + $0x8c] ss:$16 sps:$4 sm:$0xff]  }
  0x6f   : > { %1524 = vmatpush1.bf16.msra.mxu0 %v2398_v29  ;;  %1707 = vmatpush1.bf16.msra.mxu1 %v2399_v30  ;;  %v2416_v41 = vld [vmem:[%s3030_s5 + $0x80] ss:$16 sps:$4 sm:$0xff]   ;;  %v2417_v42 = vld [vmem:[%s3030_s5 + $0x88] ss:$16 sps:$4 sm:$0xff]   ;;  %v2418_v43 = vld [vmem:[%s3030_s5 + $0xa4] ss:$16 sps:$4 sm:$0xff]  }
  0x70   : > { %1525 = vmatprep.subr.bf16.mxu0 %v2400_v31  ;;  %1708 = vmatprep.subr.bf16.mxu1 %v2402_v32  ;;  %v2420_v44 = vld [vmem:[%s3030_s5 + $0xac] ss:$16 sps:$4 sm:$0xff]   ;;  %v2422_v45 = vld [vmem:[%s3030_s5 + $0xa0] ss:$16 sps:$4 sm:$0xff]   ;;  %v2423_v46 = vld [vmem:[%s3030_s5 + $0xa8] ss:$16 sps:$4 sm:$0xff]  }
  0x71   : > { %v2424_v47 = vld [vmem:[%s3030_s5 + $0xc4] ss:$16 sps:$4 sm:$0xff]   ;;  %v2426_v48 = vld [vmem:[%s3030_s5 + $0xcc] ss:$16 sps:$4 sm:$0xff]   ;;  %v2428_v49 = vld [vmem:[%s3030_s5 + $0xc0] ss:$16 sps:$4 sm:$0xff]  }
  0x72   : > { %v2429_v50 = vld [vmem:[%s3030_s5 + $0xc8] ss:$16 sps:$4 sm:$0xff]   ;;  %v2430_v51 = vld [vmem:[%s3030_s5 + $0xe4] ss:$16 sps:$4 sm:$0xff]   ;;  %v2432_v52 = vld [vmem:[%s3030_s5 + $0xec] ss:$16 sps:$4 sm:$0xff]  }
  0x73   : > { %1526 = vmatpush1.bf16.msra.mxu0 %v2404_v33  ;;  %1709 = vmatpush1.bf16.msra.mxu1 %v2405_v34  ;;  %v2434_v54 = vld [vmem:[%s3030_s5 + $0xe0] ss:$16 sps:$4 sm:$0xff]   ;;  %v2435_v55 = vld [vmem:[%s3030_s5 + $0xe8] ss:$16 sps:$4 sm:$0xff]   ;;  %v2436_v56 = vld [vmem:[%s3030_s5 + $0x104] ss:$16 sps:$4 sm:$0xff]  }
  0x74   : > { %1527 = vmatprep.subr.bf16.mxu0 %v2406_v35  ;;  %1710 = vmatprep.subr.bf16.mxu1 %v2408_v36  ;;  %v2438_v57 = vld [vmem:[%s3030_s5 + $0x10c] ss:$16 sps:$4 sm:$0xff]   ;;  %v2440_v58 = vld [vmem:[%s3030_s5 + $0x100] ss:$16 sps:$4 sm:$0xff]   ;;  %v2441_v59 = vld [vmem:[%s3030_s5 + $0x108] ss:$16 sps:$4 sm:$0xff]  }
  0x75   : > { %v2442_v60 = vld [vmem:[%s3030_s5 + $0x124] ss:$16 sps:$4 sm:$0xff]   ;;  %v2444_v61 = vld [vmem:[%s3030_s5 + $0x12c] ss:$16 sps:$4 sm:$0xff]   ;;  %v2446_v62 = vld [vmem:[%s3030_s5 + $0x120] ss:$16 sps:$4 sm:$0xff]  }
  0x76   : > { %v2447_v63 = vld [vmem:[%s3030_s5 + $0x128] ss:$16 sps:$4 sm:$0xff]   ;;  %v2448_v0 = vld [vmem:[%s3030_s5 + $0x144] ss:$16 sps:$4 sm:$0xff]   ;;  %v2450_v1 = vld [vmem:[%s3030_s5 + $0x14c] ss:$16 sps:$4 sm:$0xff]  }
  0x77   : > { %1528 = vmatpush1.bf16.msra.mxu0 %v2410_v37  ;;  %1711 = vmatpush1.bf16.msra.mxu1 %v2411_v38  ;;  %v2452_v2 = vld [vmem:[%s3030_s5 + $0x140] ss:$16 sps:$4 sm:$0xff]   ;;  %v2453_v3 = vld [vmem:[%s3030_s5 + $0x148] ss:$16 sps:$4 sm:$0xff]   ;;  %v2454_v4 = vld [vmem:[%s3030_s5 + $0x164] ss:$16 sps:$4 sm:$0xff]  }
  0x78   : > { %1529 = vmatprep.subr.bf16.mxu0 %v2412_v39  ;;  %1712 = vmatprep.subr.bf16.mxu1 %v2414_v40  ;;  %v2456_v5 = vld [vmem:[%s3030_s5 + $0x16c] ss:$16 sps:$4 sm:$0xff]   ;;  %v2458_v6 = vld [vmem:[%s3030_s5 + $0x160] ss:$16 sps:$4 sm:$0xff]   ;;  %v2459_v7 = vld [vmem:[%s3030_s5 + $0x168] ss:$16 sps:$4 sm:$0xff]  }
  0x79   : > { %v2460_v8 = vld [vmem:[%s3030_s5 + $0x184] ss:$16 sps:$4 sm:$0xff]   ;;  %v2462_v9 = vld [vmem:[%s3030_s5 + $0x18c] ss:$16 sps:$4 sm:$0xff]   ;;  %v2464_v10 = vld [vmem:[%s3030_s5 + $0x180] ss:$16 sps:$4 sm:$0xff]  }
  0x7a   : > { %v2465_v11 = vld [vmem:[%s3030_s5 + $0x188] ss:$16 sps:$4 sm:$0xff]   ;;  %v2466_v12 = vld [vmem:[%s3030_s5 + $0x1a4] ss:$16 sps:$4 sm:$0xff]   ;;  %v2468_v13 = vld [vmem:[%s3030_s5 + $0x1ac] ss:$16 sps:$4 sm:$0xff]  }
  0x7b   : > { %1530 = vmatpush1.bf16.msra.mxu0 %v2416_v41  ;;  %1713 = vmatpush1.bf16.msra.mxu1 %v2417_v42  ;;  %v2470_v14 = vld [vmem:[%s3030_s5 + $0x1a0] ss:$16 sps:$4 sm:$0xff]   ;;  %v2471_v15 = vld [vmem:[%s3030_s5 + $0x1a8] ss:$16 sps:$4 sm:$0xff]   ;;  %v2472_v16 = vld [vmem:[%s3030_s5 + $0x1c4] ss:$16 sps:$4 sm:$0xff]  }
  0x7c   : > { %1531 = vmatprep.subr.bf16.mxu0 %v2418_v43  ;;  %1714 = vmatprep.subr.bf16.mxu1 %v2420_v44  ;;  %v2474_v17 = vld [vmem:[%s3030_s5 + $0x1cc] ss:$16 sps:$4 sm:$0xff]   ;;  %v2476_v18 = vld [vmem:[%s3030_s5 + $0x1c0] ss:$16 sps:$4 sm:$0xff]   ;;  %v2477_v19 = vld [vmem:[%s3030_s5 + $0x1c8] ss:$16 sps:$4 sm:$0xff]  }
  0x7d   : > { %v2478_v20 = vld [vmem:[%s3030_s5 + $0x1e4] ss:$16 sps:$4 sm:$0xff]   ;;  %v2480_v21 = vld [vmem:[%s3030_s5 + $0x1ec] ss:$16 sps:$4 sm:$0xff]   ;;  %v2482_v22 = vld [vmem:[%s3030_s5 + $0x1e0] ss:$16 sps:$4 sm:$0xff]  }
  0x7e   : > { %v2483_v23 = vld [vmem:[%s3030_s5 + $0x1e8] ss:$16 sps:$4 sm:$0xff]   ;;  %v2489_v24 = vld [vmem:[%s3030_s5 + $0x204] ss:$16 sps:$4 sm:$0xff]   ;;  %v2492_v25 = vld [vmem:[%s3030_s5 + $0x20c] ss:$16 sps:$4 sm:$0xff]  }
  0x7f   : > { %1532 = vmatpush1.bf16.msra.mxu0 %v2422_v45  ;;  %1715 = vmatpush1.bf16.msra.mxu1 %v2423_v46  ;;  %v2484_v26 = vld [vmem:[%s3282_s0] ss:$20 sps:$4 sm:$0xff]   ;;  %v2490_v28 = vld [vmem:[%s3030_s5 + $0x208] ss:$16 sps:$4 sm:$0xff]   ;;  %v2498_v30 = vld [vmem:[%s3030_s5 + $0x22c] ss:$16 sps:$4 sm:$0xff]  }
  0x80   : > { %1533 = vmatprep.subr.bf16.mxu0 %v2424_v47  ;;  %1716 = vmatprep.subr.bf16.mxu1 %v2426_v48  ;;  %v2487_v27 = vld [vmem:[%s3030_s5 + $0x200] ss:$16 sps:$4 sm:$0xff]   ;;  %v2495_v29 = vld [vmem:[%s3030_s5 + $0x224] ss:$16 sps:$4 sm:$0xff]   ;;  %v2496_v33 = vld [vmem:[%s3030_s5 + $0x228] ss:$16 sps:$4 sm:$0xff]  }
  0x81   : > { %v2559_v31 = vld [vmem:[%s3282_s0 + $0x2c] ss:$20 sps:$4 sm:$0xff]   ;;  %v2501_v34 = vld [vmem:[%s3030_s5 + $0x244] ss:$16 sps:$4 sm:$0xff]   ;;  %v2561_v36 = vld [vmem:[%s3282_s0 + $0x28] ss:$20 sps:$4 sm:$0xff]  }
  0x82   : > { %v2493_v32 = vld [vmem:[%s3030_s5 + $0x220] ss:$16 sps:$4 sm:$0xff]   ;;  %v2504_v35 = vld [vmem:[%s3030_s5 + $0x24c] ss:$16 sps:$4 sm:$0xff]   ;;  %v2502_v39 = vld [vmem:[%s3030_s5 + $0x248] ss:$16 sps:$4 sm:$0xff]  }
  0x83   : > { %1534 = vmatpush1.bf16.msra.mxu0 %v2428_v49  ;;  %1717 = vmatpush1.bf16.msra.mxu1 %v2429_v50  ;;  %v498_v37 = vld [vmem:[%s3282_s0 + $0x50] sm:$0x33]  ;;  %v2510_v41 = vld [vmem:[%s3030_s5 + $0x26c] ss:$16 sps:$4 sm:$0xff]   ;;  %v2508_v44 = vld [vmem:[%s3030_s5 + $0x268] ss:$16 sps:$4 sm:$0xff]  }
  0x84   : > { %1535 = vmatprep.subr.bf16.mxu0 %v2430_v51  ;;  %1718 = vmatprep.subr.bf16.mxu1 %v2432_v52  ;;  %v2499_v38 = vld [vmem:[%s3030_s5 + $0x240] ss:$16 sps:$4 sm:$0xff]   ;;  %v2507_v40 = vld [vmem:[%s3030_s5 + $0x264] ss:$16 sps:$4 sm:$0xff]   ;;  %v2100_v42 = vcombine.high %v498_v37, %v498_v37  ;;  %v2516_v46 = vld [vmem:[%s3030_s5 + $0x28c] ss:$16 sps:$4 sm:$0xff]   ;;  %v2099_v49 = vcombine.low %v498_v37, %v498_v37 }
  0x85   : > { %v2505_v43 = vld [vmem:[%s3030_s5 + $0x260] ss:$16 sps:$4 sm:$0xff]   ;;  %v2513_v45 = vld [vmem:[%s3030_s5 + $0x284] ss:$16 sps:$4 sm:$0xff]   ;;  %v2514_v48 = vld [vmem:[%s3030_s5 + $0x288] ss:$16 sps:$4 sm:$0xff]  }
  0x86   : > { %v2511_v47 = vld [vmem:[%s3030_s5 + $0x280] ss:$16 sps:$4 sm:$0xff]   ;;  %v2519_v50 = vld [vmem:[%s3030_s5 + $0x2a4] ss:$16 sps:$4 sm:$0xff]   ;;  %v2522_v51 = vld [vmem:[%s3030_s5 + $0x2ac] ss:$16 sps:$4 sm:$0xff]  }
  0x87   : > { %1536 = vmatpush1.bf16.msra.mxu0 %v2434_v54  ;;  %1719 = vmatpush1.bf16.msra.mxu1 %v2435_v55  ;;  %v2517_v52 = vld [vmem:[%s3030_s5 + $0x2a0] ss:$16 sps:$4 sm:$0xff]   ;;  %v2520_v54 = vld [vmem:[%s3030_s5 + $0x2a8] ss:$16 sps:$4 sm:$0xff]   ;;  %v2525_v55 = vld [vmem:[%s3030_s5 + $0x2c4] ss:$16 sps:$4 sm:$0xff]  }
  0x88   : > { %1537 = vmatprep.subr.bf16.mxu0 %v2436_v56  ;;  %1720 = vmatprep.subr.bf16.mxu1 %v2438_v57  ;;  %v2528_v56 = vld [vmem:[%s3030_s5 + $0x2cc] ss:$16 sps:$4 sm:$0xff]   ;;  %v2593_v37 = vld [vmem:[%s3030_s5 + $0x404] ss:$16 sps:$4 sm:$0xff]   ;;  %s3243_s12 = scalar_lea.vmem [#allocation3], %s2360_s29  ;;  %s2289_s28 = sshll.u32 (%p2708_p5), %s2082_s15, 4 }
  0x89   : > { %v2590_v57 = vld [vmem:[%s3282_s0 + $0xc] ss:$20 sps:$4 sm:$0xff]   ;;  %s1990_s20 = scalar_lea.vmem (%p2708_p5), %s3285_s3, %s2289_s28 }
  0x8b   : > { %1538 = vmatpush1.bf16.msra.mxu0 %v2440_v58  ;;  %1721 = vmatpush1.bf16.msra.mxu1 %v2441_v59  ;;  %v2523_v58 = vld [vmem:[%s3030_s5 + $0x2c0] ss:$16 sps:$4 sm:$0xff]   ;;  %v2526_v59 = vld [vmem:[%s3030_s5 + $0x2c8] ss:$16 sps:$4 sm:$0xff]  }
  0x8c   : > { %1539 = vmatprep.subr.bf16.mxu0 %v2442_v60  ;;  %1722 = vmatprep.subr.bf16.mxu1 %v2444_v61  ;;  %v2531_v60 = vld [vmem:[%s3030_s5 + $0x2e4] ss:$16 sps:$4 sm:$0xff]   ;;  %v2534_v61 = vld [vmem:[%s3030_s5 + $0x2ec] ss:$16 sps:$4 sm:$0xff]  }
  0x8f   : > { %1540 = vmatpush1.bf16.msra.mxu0 %v2446_v62  ;;  %1723 = vmatpush1.bf16.msra.mxu1 %v2447_v63  ;;  %v2529_v62 = vld [vmem:[%s3030_s5 + $0x2e0] ss:$16 sps:$4 sm:$0xff]   ;;  %v2532_v63 = vld [vmem:[%s3030_s5 + $0x2e8] ss:$16 sps:$4 sm:$0xff]  }
  0x90   : > { %1541 = vmatprep.subr.bf16.mxu0 %v2448_v0  ;;  %1724 = vmatprep.subr.bf16.mxu1 %v2450_v1  ;;  %v2537_v0 = vld [vmem:[%s3030_s5 + $0x304] ss:$16 sps:$4 sm:$0xff]   ;;  %v2540_v1 = vld [vmem:[%s3030_s5 + $0x30c] ss:$16 sps:$4 sm:$0xff]  }
  0x93   : > { %1542 = vmatpush1.bf16.msra.mxu0 %v2452_v2  ;;  %1725 = vmatpush1.bf16.msra.mxu1 %v2453_v3  ;;  %v2535_v2 = vld [vmem:[%s3030_s5 + $0x300] ss:$16 sps:$4 sm:$0xff]   ;;  %v2538_v3 = vld [vmem:[%s3030_s5 + $0x308] ss:$16 sps:$4 sm:$0xff]  }
  0x94   : > { %1543 = vmatprep.subr.bf16.mxu0 %v2454_v4  ;;  %1726 = vmatprep.subr.bf16.mxu1 %v2456_v5  ;;  %v2543_v4 = vld [vmem:[%s3030_s5 + $0x324] ss:$16 sps:$4 sm:$0xff]   ;;  %v2546_v5 = vld [vmem:[%s3030_s5 + $0x32c] ss:$16 sps:$4 sm:$0xff]  }
  0x97   : > { %1544 = vmatpush1.bf16.msra.mxu0 %v2458_v6  ;;  %1727 = vmatpush1.bf16.msra.mxu1 %v2459_v7  ;;  %v2541_v6 = vld [vmem:[%s3030_s5 + $0x320] ss:$16 sps:$4 sm:$0xff]   ;;  %v2544_v7 = vld [vmem:[%s3030_s5 + $0x328] ss:$16 sps:$4 sm:$0xff]  }
  0x98   : > { %1545 = vmatprep.subr.bf16.mxu0 %v2460_v8  ;;  %1728 = vmatprep.subr.bf16.mxu1 %v2462_v9  ;;  %v2549_v8 = vld [vmem:[%s3030_s5 + $0x344] ss:$16 sps:$4 sm:$0xff]   ;;  %v2552_v9 = vld [vmem:[%s3030_s5 + $0x34c] ss:$16 sps:$4 sm:$0xff]  }
  0x9b   : > { %1546 = vmatpush1.bf16.msra.mxu0 %v2464_v10  ;;  %1729 = vmatpush1.bf16.msra.mxu1 %v2465_v11  ;;  %v651_v10 = vld [vmem:[%s3283_s1] sm:$0xff] }
  0x9c   : > { %1547 = vmatprep.subr.bf16.mxu0 %v2466_v12  ;;  %1730 = vmatprep.subr.bf16.mxu1 %v2468_v13  ;;  %v2547_v11 = vld [vmem:[%s3030_s5 + $0x340] ss:$16 sps:$4 sm:$0xff]   ;;  %v2550_v12 = vld [vmem:[%s3030_s5 + $0x348] ss:$16 sps:$4 sm:$0xff]  }
  0x9d   : > { %v653_v13 = vld [vmem:[%s3283_s1 + $0x10] sm:$0xff]  ;;  %658 = vperm.xlu0 %2386, %v651_v10   ;;  %v2632_v10 = vld [vmem:[%s3282_s0 + $0x60] ss:$0 sps:$4 sm:$0x33]  }
  0x9e   : > { %668 = vperm.xlu1 %2387, %v653_v13  }
  0x9f   : > { %1548 = vmatpush1.bf16.msra.mxu0 %v2470_v14  ;;  %1731 = vmatpush1.bf16.msra.mxu1 %v2471_v15  ;;  %v2555_v14 = vld [vmem:[%s3030_s5 + $0x364] ss:$16 sps:$4 sm:$0xff]   ;;  %v2558_v15 = vld [vmem:[%s3030_s5 + $0x36c] ss:$16 sps:$4 sm:$0xff]  }
  0xa0   : > { %1549 = vmatprep.subr.bf16.mxu0 %v2472_v16  ;;  %1732 = vmatprep.subr.bf16.mxu1 %v2474_v17  ;;  %v652_v16 = vld [vmem:[%s3283_s1 + $0x8] sm:$0xff]  ;;  %v654_v17 = vld [vmem:[%s3283_s1 + $0x18] sm:$0xff] }
  0xa1   : > { %663 = vperm.xlu0 %2386, %v652_v16  }
  0xa2   : > { %673 = vperm.xlu1 %2387, %v654_v17  }
  0xa3   : > { %1550 = vmatpush1.bf16.msra.mxu0 %v2476_v18  ;;  %1733 = vmatpush1.bf16.msra.mxu1 %v2477_v19  ;;  %v2553_v18 = vld [vmem:[%s3030_s5 + $0x360] ss:$16 sps:$4 sm:$0xff]   ;;  %v2556_v19 = vld [vmem:[%s3030_s5 + $0x368] ss:$16 sps:$4 sm:$0xff]  }
  0xa4   : > { %1551 = vmatprep.subr.bf16.mxu0 %v2478_v20  ;;  %1734 = vmatprep.subr.bf16.mxu1 %v2480_v21  ;;  %v2564_v20 = vld [vmem:[%s3030_s5 + $0x384] ss:$16 sps:$4 sm:$0xff]   ;;  %v2567_v21 = vld [vmem:[%s3030_s5 + $0x38c] ss:$16 sps:$4 sm:$0xff]  }
  0xa7   : > { %1552 = vmatpush1.bf16.msra.mxu0 %v2482_v22  ;;  %1735 = vmatpush1.bf16.msra.mxu1 %v2483_v23  ;;  %v655_v22 = vld [vmem:[%s3283_s1 + $0x20] sm:$0xf] }
  0xa8   : > { %1582 = vmatprep.subr.bf16.mxu0 %v2489_v24  ;;  %1765 = vmatprep.subr.bf16.mxu1 %v2492_v25  ;;  %v2562_v23 = vld [vmem:[%s3030_s5 + $0x380] ss:$16 sps:$4 sm:$0xff]   ;;  %v2565_v24 = vld [vmem:[%s3030_s5 + $0x388] ss:$16 sps:$4 sm:$0xff]   ;;  %v2570_v25 = vld [vmem:[%s3030_s5 + $0x3a4] ss:$16 sps:$4 sm:$0xff]  }
  0xa9   : > { %678 = vperm.xlu0 %2386, %v655_v22  }
  0xaa   : > { %1554 = vmatmul.mubr.bf16.vlgmr.msra.gmra.mrb[0].mxu0 %v2484_v26  ;;  %1737 = vmatmul.mubr.bf16.vlgmr.msra.gmra.mrb[0].mxu1 %v2484_v26  ;;  %v2573_v26 = vld [vmem:[%s3030_s5 + $0x3ac] ss:$16 sps:$4 sm:$0xff]  }
  0xab   : > { %1583 = vmatpush1.bf16.msra.mxu0 %v2487_v27  ;;  %1766 = vmatpush1.bf16.msra.mxu1 %v2490_v28  ;;  %v2568_v27 = vld [vmem:[%s3030_s5 + $0x3a0] ss:$16 sps:$4 sm:$0xff]   ;;  %v2571_v28 = vld [vmem:[%s3030_s5 + $0x3a8] ss:$16 sps:$4 sm:$0xff]  }
  0xac   : > { %1584 = vmatprep.subr.bf16.mxu0 %v2495_v29  ;;  %1767 = vmatprep.subr.bf16.mxu1 %v2498_v30  ;;  %v2578_v29 = vld [vmem:[%s3030_s5 + $0x3c4] ss:$16 sps:$4 sm:$0xff]   ;;  %v2581_v30 = vld [vmem:[%s3030_s5 + $0x3cc] ss:$16 sps:$4 sm:$0xff]  }
  0xad   : > { %1563 = vmatprep.mubr.bf16.mxu0 %v2559_v31  ;;  %1746 = vmatprep.mubr.bf16.mxu1 %v2559_v31  ;;  %v2576_v31 = vld [vmem:[%s3030_s5 + $0x3c0] ss:$16 sps:$4 sm:$0xff]  }
  0xaf   : > { %1585 = vmatpush1.bf16.msra.mxu0 %v2493_v32  ;;  %1768 = vmatpush1.bf16.msra.mxu1 %v2496_v33  ;;  %v2579_v32 = vld [vmem:[%s3030_s5 + $0x3c8] ss:$16 sps:$4 sm:$0xff]   ;;  %v2584_v33 = vld [vmem:[%s3030_s5 + $0x3e4] ss:$16 sps:$4 sm:$0xff]  }
  0xb0   : > { %1586 = vmatprep.subr.bf16.mxu0 %v2501_v34  ;;  %1769 = vmatprep.subr.bf16.mxu1 %v2504_v35  ;;  %v2587_v34 = vld [vmem:[%s3030_s5 + $0x3ec] ss:$16 sps:$4 sm:$0xff]   ;;  %v2582_v35 = vld [vmem:[%s3030_s5 + $0x3e0] ss:$16 sps:$4 sm:$0xff]  }
  0xb2   : > { %1564 = vmatmul.mubr.bf16.gmra.mrb[4].mxu0 %v2561_v36  ;;  %1747 = vmatmul.mubr.bf16.gmra.mrb[4].mxu1 %v2561_v36  ;;  %v2585_v36 = vld [vmem:[%s3030_s5 + $0x3e8] ss:$16 sps:$4 sm:$0xff]  }
  0xb3   : > { %1587 = vmatpush1.bf16.msra.mxu0 %v2499_v38  ;;  %1770 = vmatpush1.bf16.msra.mxu1 %v2502_v39  ;;  %v2596_v38 = vld [vmem:[%s3030_s5 + $0x40c] ss:$16 sps:$4 sm:$0xff]  }
  0xb4   : > { %1588 = vmatprep.subr.bf16.mxu0 %v2507_v40  ;;  %1771 = vmatprep.subr.bf16.mxu1 %v2510_v41  ;;  %v2588_v39 = vld [vmem:[%s3282_s0 + $0x8] ss:$20 sps:$4 sm:$0xff]   ;;  %v2591_v40 = vld [vmem:[%s3030_s5 + $0x400] ss:$16 sps:$4 sm:$0xff]  }
  0xb5   : > { %1573 = vmatprep.mubr.bf16.mxu0 %v2100_v42  ;;  %1756 = vmatprep.mubr.bf16.mxu1 %v2100_v42  ;;  %v2594_v41 = vld [vmem:[%s3030_s5 + $0x408] ss:$16 sps:$4 sm:$0xff]   ;;  %v2599_v42 = vld [vmem:[%s3030_s5 + $0x424] ss:$16 sps:$4 sm:$0xff]  }
  0xb7   : > { %1589 = vmatpush1.bf16.msra.mxu0 %v2505_v43  ;;  %1772 = vmatpush1.bf16.msra.mxu1 %v2508_v44  ;;  %v2602_v43 = vld [vmem:[%s3030_s5 + $0x42c] ss:$16 sps:$4 sm:$0xff]   ;;  %v2603_v44 = vld [vmem:[%s3282_s0 + $0x34] ss:$20 sps:$4 sm:$0xff]  }
  0xb8   : > { %1590 = vmatprep.subr.bf16.mxu0 %v2513_v45  ;;  %1773 = vmatprep.subr.bf16.mxu1 %v2516_v46  ;;  %v2597_v45 = vld [vmem:[%s3030_s5 + $0x420] ss:$16 sps:$4 sm:$0xff]   ;;  %v2600_v46 = vld [vmem:[%s3030_s5 + $0x428] ss:$16 sps:$4 sm:$0xff]  }
  0xba   : > { %1574 = vmatmul.mubr.bf16.gmra.mrb[8].mxu0 %v2099_v49  ;;  %1757 = vmatmul.mubr.bf16.gmra.mrb[8].mxu1 %v2099_v49  ;;  %v2605_v49 = vld [vmem:[%s3282_s0 + $0x30] ss:$20 sps:$4 sm:$0xff]  }
  0xbb   : > { %1591 = vmatpush1.bf16.msra.mxu0 %v2511_v47  ;;  %1774 = vmatpush1.bf16.msra.mxu1 %v2514_v48  ;;  %v2608_v47 = vld [vmem:[%s3030_s5 + $0x444] ss:$16 sps:$4 sm:$0xff]   ;;  %v2611_v48 = vld [vmem:[%s3030_s5 + $0x44c] ss:$16 sps:$4 sm:$0xff]  }
  0xbc   : > { %1592 = vmatprep.subr.bf16.mxu0 %v2519_v50  ;;  %1775 = vmatprep.subr.bf16.mxu1 %v2522_v51  ;;  %v499_v50 = vld [vmem:[%s3282_s0 + $0x58] sm:$0x33]  ;;  %v2606_v51 = vld [vmem:[%s3030_s5 + $0x440] ss:$16 sps:$4 sm:$0xff]  }
  0xbd   : > { %1614 = vmatprep.mubr.bf16.mxu0 %v2590_v57  ;;  %1797 = vmatprep.mubr.bf16.mxu1 %v2590_v57  ;;  %v2612_v57 = vld [vmem:[%s3030_s5 + $0x460] ss:$16 sps:$4 sm:$0xff]  }
  0xbf   : > { %1593 = vmatpush1.bf16.msra.mxu0 %v2517_v52  ;;  %1776 = vmatpush1.bf16.msra.mxu1 %v2520_v54  ;;  %v2609_v52 = vld [vmem:[%s3030_s5 + $0x448] ss:$16 sps:$4 sm:$0xff]   ;;  %v2614_v54 = vld [vmem:[%s3030_s5 + $0x464] ss:$16 sps:$4 sm:$0xff]  }
  0xc0   : > { %1594 = vmatprep.subr.bf16.mxu0 %v2525_v55  ;;  %1777 = vmatprep.subr.bf16.mxu1 %v2528_v56  ;;  %v2617_v55 = vld [vmem:[%s3030_s5 + $0x46c] ss:$16 sps:$4 sm:$0xff]   ;;  %v2102_v56 = vcombine.high %v499_v50, %v499_v50 }
  0xc3   : > { %1595 = vmatpush1.bf16.msra.mxu0 %v2523_v58  ;;  %1778 = vmatpush1.bf16.msra.mxu1 %v2526_v59  ;;  %v2615_v58 = vld [vmem:[%s3030_s5 + $0x468] ss:$16 sps:$4 sm:$0xff]   ;;  %v2622_v59 = vld [vmem:[%s3030_s5 + $0x484] ss:$16 sps:$4 sm:$0xff]  }
  0xc4   : > { %1596 = vmatprep.subr.bf16.mxu0 %v2531_v60  ;;  %1779 = vmatprep.subr.bf16.mxu1 %v2534_v61  ;;  %v2625_v60 = vld [vmem:[%s3030_s5 + $0x48c] ss:$16 sps:$4 sm:$0xff]   ;;  %v649_v61 = vld [vmem:[%s3030_s5 + $0x4a0] sm:$0xff] }
  0xc7   : > { %1597 = vmatpush1.bf16.msra.mxu0 %v2529_v62  ;;  %1780 = vmatpush1.bf16.msra.mxu1 %v2532_v63  ;;  %v650_v62 = vld [vmem:[%s3030_s5 + $0x4a8] sm:$0xff]  ;;  %v2101_v63 = vcombine.low %v499_v50, %v499_v50 }
  0xc8   : > { %1598 = vmatprep.subr.bf16.mxu0 %v2537_v0  ;;  %1781 = vmatprep.subr.bf16.mxu1 %v2540_v1  ;;  %v2620_v0 = vld [vmem:[%s3030_s5 + $0x480] ss:$16 sps:$4 sm:$0xff]   ;;  %v2623_v1 = vld [vmem:[%s3030_s5 + $0x488] ss:$16 sps:$4 sm:$0xff]  }
  0xcb   : > { %1599 = vmatpush1.bf16.msra.mxu0 %v2535_v2  ;;  %1782 = vmatpush1.bf16.msra.mxu1 %v2538_v3  ;;  %v2253_v2 = vcombine.high %v649_v61, %v649_v61  ;;  %v2255_v3 = vcombine.high %v650_v62, %v650_v62 }
  0xcc   : > { %1600 = vmatprep.subr.bf16.mxu0 %v2543_v4  ;;  %1783 = vmatprep.subr.bf16.mxu1 %v2546_v5  ;;  %v2252_v4 = vcombine.low %v649_v61, %v649_v61  ;;  %v2254_v5 = vcombine.low %v650_v62, %v650_v62 }
  0xcf   : > { %1601 = vmatpush1.bf16.msra.mxu0 %v2541_v6  ;;  %1784 = vmatpush1.bf16.msra.mxu1 %v2544_v7  ;;  %v1510_v6 = vsel %vm1508_vm0, %v2252_v4, 0  ;;  %v1516_v7 = vsel %vm1508_vm0, %v2254_v5, 0 }
  0xd0   : > { %1602 = vmatprep.subr.bf16.mxu0 %v2549_v8  ;;  %1785 = vmatprep.subr.bf16.mxu1 %v2552_v9  ;;  %v2630_v8 = vld [vmem:[%s3282_s0 + $0x10] ss:$20 sps:$4 sm:$0xff]   ;;  %v2631_v9 = vld [vmem:[%s3282_s0 + $0x38] ss:$20 sps:$4 sm:$0xff]  }
  0xd3   : > { %1603 = vmatpush1.bf16.msra.mxu0 %v2547_v11  ;;  %1786 = vmatpush1.bf16.msra.mxu1 %v2550_v12 }
  0xd4   : > { %1604 = vmatprep.subr.bf16.mxu0 %v2555_v14  ;;  %1787 = vmatprep.subr.bf16.mxu1 %v2558_v15 }
  0xd7   : > { %1605 = vmatpush1.bf16.msra.mxu0 %v2553_v18  ;;  %1788 = vmatpush1.bf16.msra.mxu1 %v2556_v19 }
  0xd8   : > { %1606 = vmatprep.subr.bf16.mxu0 %v2564_v20  ;;  %1789 = vmatprep.subr.bf16.mxu1 %v2567_v21 }
  0xdb   : > { %1607 = vmatpush1.bf16.msra.mxu0 %v2562_v23  ;;  %1790 = vmatpush1.bf16.msra.mxu1 %v2565_v24 }
  0xdc   : > { %1608 = vmatprep.subr.bf16.mxu0 %v2570_v25  ;;  %1791 = vmatprep.subr.bf16.mxu1 %v2573_v26 }
  0xdf   : > { %1609 = vmatpush1.bf16.msra.mxu0 %v2568_v27  ;;  %1792 = vmatpush1.bf16.msra.mxu1 %v2571_v28 }
  0xe0   : > { %1610 = vmatprep.subr.bf16.mxu0 %v2578_v29  ;;  %1793 = vmatprep.subr.bf16.mxu1 %v2581_v30 }
  0xe3   : > { %1611 = vmatpush1.bf16.msra.mxu0 %v2576_v31  ;;  %1794 = vmatpush1.bf16.msra.mxu1 %v2579_v32 }
  0xe4   : > { %1612 = vmatprep.subr.bf16.mxu0 %v2584_v33  ;;  %1795 = vmatprep.subr.bf16.mxu1 %v2587_v34 }
  0xe7   : > { %1613 = vmatpush1.bf16.msra.mxu0 %v2582_v35  ;;  %1796 = vmatpush1.bf16.msra.mxu1 %v2585_v36 }
  0xe8   : > { %1643 = vmatprep.subr.bf16.mxu0 %v2593_v37  ;;  %1826 = vmatprep.subr.bf16.mxu1 %v2596_v38 }
  0xea   : > { %1615 = vmatmul.mubr.bf16.vlgmr.msra.gmra.mrb[0].mxu0 %v2588_v39  ;;  %1798 = vmatmul.mubr.bf16.vlgmr.msra.gmra.mrb[0].mxu1 %v2588_v39 }
  0xeb   : > { %1644 = vmatpush1.bf16.msra.mxu0 %v2591_v40  ;;  %1827 = vmatpush1.bf16.msra.mxu1 %v2594_v41 }
  0xec   : > { %1645 = vmatprep.subr.bf16.mxu0 %v2599_v42  ;;  %1828 = vmatprep.subr.bf16.mxu1 %v2602_v43 }
  0xed   : > { %1624 = vmatprep.mubr.bf16.mxu0 %v2603_v44  ;;  %1807 = vmatprep.mubr.bf16.mxu1 %v2603_v44 }
  0xef   : > { %1646 = vmatpush1.bf16.msra.mxu0 %v2597_v45  ;;  %1829 = vmatpush1.bf16.msra.mxu1 %v2600_v46 }
  0xf0   : > { %1647 = vmatprep.subr.bf16.mxu0 %v2608_v47  ;;  %1830 = vmatprep.subr.bf16.mxu1 %v2611_v48 }
  0xf2   : > { %1625 = vmatmul.mubr.bf16.gmra.mrb[4].mxu0 %v2605_v49  ;;  %1808 = vmatmul.mubr.bf16.gmra.mrb[4].mxu1 %v2605_v49 }
  0xf3   : > { %1648 = vmatpush1.bf16.msra.mxu0 %v2606_v51  ;;  %1831 = vmatpush1.bf16.msra.mxu1 %v2609_v52 }
  0xf4   : > { %1649 = vmatprep.subr.bf16.mxu0 %v2614_v54  ;;  %1832 = vmatprep.subr.bf16.mxu1 %v2617_v55 }
  0xf5   : > { %1634 = vmatprep.mubr.bf16.mxu0 %v2102_v56  ;;  %1817 = vmatprep.mubr.bf16.mxu1 %v2102_v56 }
  0xf7   : > { %1650 = vmatpush1.bf16.msra.mxu0 %v2612_v57  ;;  %1833 = vmatpush1.bf16.msra.mxu1 %v2615_v58 }
  0xf8   : > { %1651 = vmatprep.subr.bf16.mxu0 %v2622_v59  ;;  %1834 = vmatprep.subr.bf16.mxu1 %v2625_v60 }
  0xfa   : > { %1635 = vmatmul.mubr.bf16.gmra.mrb[8].mxu0 %v2101_v63  ;;  %1818 = vmatmul.mubr.bf16.gmra.mrb[8].mxu1 %v2101_v63 }
  0xfb   : > { %1652 = vmatpush1.bf16.msra.mxu0 %v2620_v0  ;;  %1835 = vmatpush1.bf16.msra.mxu1 %v2623_v1 }
  0xfc   : > { %2256 = vmatprep.subr.msk.bf16.mxu0 %vm1508_vm0, %v2253_v2  ;;  %2260 = vmatprep.subr.msk.bf16.mxu1 %vm1508_vm0, %v2255_v3 }
  0xfd   : > { %1675 = vmatprep.mubr.bf16.mxu0 %v2657_v53  ;;  %1858 = vmatprep.mubr.bf16.mxu1 %v2657_v53 }
  0xff   : > { %1654 = vmatpush1.bf16.msra.mxu0 %v1510_v6  ;;  %1837 = vmatpush1.bf16.msra.mxu1 %v1516_v7 }
 0x102   : > { %2257 = vmatmul.mubr.msk.bf16.vlgmr.msra.gmra.mrb[0].mxu0 %vm1498_vm1, %v2630_v8  ;;  %2261 = vmatmul.mubr.msk.bf16.vlgmr.msra.gmra.mrb[0].mxu1 %vm1498_vm1, %v2630_v8 }
 0x103   : > { %1685 = vmatprep.mubr.bf16.mxu0 %v2657_v53  ;;  %1868 = vmatprep.mubr.bf16.mxu1 %v2657_v53 }
 0x10a   : > { %2258 = vmatmul.mubr.msk.bf16.gmra.mrb[4].mxu0 %vm1498_vm1, %v2631_v9  ;;  %2262 = vmatmul.mubr.msk.bf16.gmra.mrb[4].mxu1 %vm1498_vm1, %v2631_v9 }
 0x10b   : > { %1695 = vmatprep.mubr.bf16.mxu0 %v2657_v53  ;;  %1878 = vmatprep.mubr.bf16.mxu1 %v2657_v53 }
 0x112   : > { %2259 = vmatmul.mubr.msk.bf16.gmra.mrb[8].mxu0 %vm1498_vm1, %v2632_v10  ;;  %2263 = vmatmul.mubr.msk.bf16.gmra.mrb[8].mxu1 %vm1498_vm1, %v2632_v10 }
 0x11c   : > { %v659_v11 = vpop.permute.xlu0 %658 }
 0x11d   : > { %v669_v13 = vpop.permute.xlu1 %668 }
 0x120   : > { %v664_v12 = vpop.permute.xlu0 %663 }
 0x121   : > { %v674_v39 = vpop.permute.xlu1 %673 }
 0x128   : > { %v679_v5 = vpop.permute.xlu0 %678 }
 0x1d5   : > { %v1677_v14 = vpop.f32.mrb[0].mxu0  ;;  %v1860_v15 = vpop.f32.mrb[0].mxu1 }
 0x1d6   : > { %v2290_v16 = vadd.f32 %v1677_v14, %v659_v11  ;;  %v2300_v17 = vadd.f32 %v1860_v15, %v659_v11  ;;  %v1679_v18 = vpop.f32.mrb[1].mxu0  ;;  %v1862_v19 = vpop.f32.mrb[1].mxu1 }
 0x1d7   : > { %v2291_v20 = vadd.f32 %v1679_v18, %v659_v11  ;;  %v2301_v21 = vadd.f32 %v1862_v19, %v659_v11  ;;  %v1681_v53 = vpop.f32.mrb[2].mxu0  ;;  %v1864_v22 = vpop.f32.mrb[2].mxu1 }
 0x1d8   : > { %v1887_v23 = vmax.f32 %v2290_v16, 0.0  ;;  %v1889_v24 = vmax.f32 %v2300_v17, 0.0  ;;  %v2292_v25 = vadd.f32 %v1681_v53, %v664_v12  ;;  %v2302_v26 = vadd.f32 %v1864_v22, %v664_v12  ;;  %v1683_v27 = vpop.f32.mrb[3].mxu0  ;;  %v1866_v28 = vpop.f32.mrb[3].mxu1 }
 0x1d9   : > { %v1888_v29 = vmax.f32 %v2291_v20, 0.0  ;;  %v1890_v30 = vmax.f32 %v2301_v21, 0.0  ;;  %v2293_v31 = vadd.f32 %v1683_v27, %v664_v12  ;;  %v2303_v32 = vadd.f32 %v1866_v28, %v664_v12 }
 0x1da   : > { %v1891_v33 = vmax.f32 %v2292_v25, 0.0  ;;  %v1893_v34 = vmax.f32 %v2302_v26, 0.0 }
 0x1db   : > { %v2279_v35 = vpack.c.bf16 %v1888_v29, %v1887_v23  ;;  %v2280_v36 = vpack.c.bf16 %v1890_v30, %v1889_v24  ;;  %v1892_v37 = vmax.f32 %v2293_v31, 0.0  ;;  %v1894_v38 = vmax.f32 %v2303_v32, 0.0 }
 0x1dd   : > { %1971 = vst [vmem:[%s3243_s12] sm:$0xff] %v2279_v35  ;;  %1972 = vst [vmem:[%s3243_s12 + $0x8] sm:$0xff] %v2280_v36  ;;  %v2281_v40 = vpack.c.bf16 %v1892_v37, %v1891_v33  ;;  %v2282_v41 = vpack.c.bf16 %v1894_v38, %v1893_v34  ;;  %v1687_v42 = vpop.f32.mrb[4].mxu0  ;;  %v1870_v43 = vpop.f32.mrb[4].mxu1 }
 0x1de   : > { %v2294_v44 = vadd.f32 %v1687_v42, %v669_v13  ;;  %v2304_v45 = vadd.f32 %v1870_v43, %v669_v13  ;;  %v1689_v46 = vpop.f32.mrb[5].mxu0  ;;  %v1872_v47 = vpop.f32.mrb[5].mxu1 }
 0x1df   : > { %1973 = vst [vmem:[%s3243_s12 + $0x10] sm:$0xff] %v2281_v40  ;;  %1974 = vst [vmem:[%s3243_s12 + $0x18] sm:$0xff] %v2282_v41  ;;  %v2295_v48 = vadd.f32 %v1689_v46, %v669_v13  ;;  %v2305_v49 = vadd.f32 %v1872_v47, %v669_v13  ;;  %v1691_v50 = vpop.f32.mrb[6].mxu0  ;;  %v1874_v51 = vpop.f32.mrb[6].mxu1 }
 0x1e0   : > { %v1895_v52 = vmax.f32 %v2294_v44, 0.0  ;;  %v1897_v54 = vmax.f32 %v2304_v45, 0.0  ;;  %v2296_v55 = vadd.f32 %v1691_v50, %v674_v39  ;;  %v2306_v56 = vadd.f32 %v1874_v51, %v674_v39  ;;  %v1693_v57 = vpop.f32.mrb[7].mxu0  ;;  %v1876_v58 = vpop.f32.mrb[7].mxu1 }
 0x1e1   : > { %v1896_v59 = vmax.f32 %v2295_v48, 0.0  ;;  %v1898_v60 = vmax.f32 %v2305_v49, 0.0  ;;  %v2297_v61 = vadd.f32 %v1693_v57, %v674_v39  ;;  %v2307_v62 = vadd.f32 %v1876_v58, %v674_v39 }
 0x1e2   : > { %v1899_v63 = vmax.f32 %v2296_v55, 0.0  ;;  %v1901_v0 = vmax.f32 %v2306_v56, 0.0 }
 0x1e3   : > { %v2283_v1 = vpack.c.bf16 %v1896_v59, %v1895_v52  ;;  %v2284_v2 = vpack.c.bf16 %v1898_v60, %v1897_v54  ;;  %v1900_v3 = vmax.f32 %v2297_v61, 0.0  ;;  %v1902_v4 = vmax.f32 %v2307_v62, 0.0 }
 0x1e4   : > { %v2003_v25 = vld [vmem:[%s3243_s12] sm:$0xff] (%p2708_p5)  ;;  %v2005_v26 = vld [vmem:[%s3243_s12 + $0x8] sm:$0xff] (%p2708_p5) }
 0x1e5   : > { %1975 = vst [vmem:[%s3243_s12 + $0x20] sm:$0xff] %v2283_v1  ;;  %1976 = vst [vmem:[%s3243_s12 + $0x28] sm:$0xff] %v2284_v2  ;;  %v2285_v6 = vpack.c.bf16 %v1900_v3, %v1899_v63  ;;  %v2286_v7 = vpack.c.bf16 %v1902_v4, %v1901_v0  ;;  %v1697_v8 = vpop.f32.mrb[8].mxu0  ;;  %v1880_v9 = vpop.f32.mrb[8].mxu1 }
 0x1e6   : > { %v2298_v10 = vadd.f32 %v1697_v8, %v679_v5  ;;  %v2308_v11 = vadd.f32 %v1880_v9, %v679_v5  ;;  %v1699_v12 = vpop.f32.mrb[9].mxu0  ;;  %v1882_v13 = vpop.f32.mrb[9].mxu1  ;;  %v2007_v27 = vld [vmem:[%s3243_s12 + $0x10] sm:$0xff] (%p2708_p5)  ;;  %v2009_v28 = vld [vmem:[%s3243_s12 + $0x18] sm:$0xff] (%p2708_p5)  ;;  %2004 = vst [vmem:[%s1990_s20] sm:$0xff] (%p2708_p5), %v2003_v25  ;;  %2006 = vst [vmem:[%s1990_s20 + $0x8] sm:$0xff] (%p2708_p5), %v2005_v26 }
 0x1e7   : > { %1977 = vst [vmem:[%s3243_s12 + $0x30] sm:$0xff] %v2285_v6  ;;  %1978 = vst [vmem:[%s3243_s12 + $0x38] sm:$0xff] %v2286_v7  ;;  %v2299_v14 = vadd.f32 %v1699_v12, %v679_v5  ;;  %v2309_v15 = vadd.f32 %v1882_v13, %v679_v5  ;;  %v1701_v16 = vpop.f32.mrb[10].mxu0  ;;  %v1884_v17 = vpop.f32.mrb[10].mxu1  ;;  %1987 = sbr.rel (!%p2708_p5) target bundleno = 502 (0x1f6), region = 59 }
 0x1e8   : > { %v1903_v18 = vmax.f32 %v2298_v10, 0.0  ;;  %v1905_v19 = vmax.f32 %v2308_v11, 0.0  ;;  %v1702_v20 = vpop.f32.mrb[11].mxu0  ;;  %v1885_v21 = vpop.f32.mrb[11].mxu1  ;;  %2008 = vst [vmem:[%s1990_s20 + $0x30] sm:$0xff] (%p2708_p5), %v2007_v27  ;;  %2010 = vst [vmem:[%s1990_s20 + $0x38] sm:$0xff] (%p2708_p5), %v2009_v28 }
 0x1e9   : > { %v1904_v53 = vmax.f32 %v2299_v14, 0.0  ;;  %v1906_v22 = vmax.f32 %v2309_v15, 0.0 }
 0x1eb   : > { %v2287_v23 = vpack.c.bf16 %v1904_v53, %v1903_v18  ;;  %v2288_v24 = vpack.c.bf16 %v1906_v22, %v1905_v19 }
 0x1ec   : > { %v2011_v29 = vld [vmem:[%s3243_s12 + $0x20] sm:$0xff] (%p2708_p5)  ;;  %v2013_v30 = vld [vmem:[%s3243_s12 + $0x28] sm:$0xff] (%p2708_p5) }
 0x1ed   : > { %1979 = vst [vmem:[%s3243_s12 + $0x40] sm:$0x33] %v2287_v23  ;;  %1980 = vst [vmem:[%s3243_s12 + $0x48] sm:$0x33] %v2288_v24 }
 0x1ee   : > { %2012 = vst [vmem:[%s1990_s20 + $0x60] sm:$0xff] %v2011_v29  ;;  %2014 = vst [vmem:[%s1990_s20 + $0x68] sm:$0xff] %v2013_v30  ;;  %v2015_v31 = vld [vmem:[%s3243_s12 + $0x30] sm:$0xff]  ;;  %v2017_v32 = vld [vmem:[%s3243_s12 + $0x38] sm:$0xff] }
 0x1ef   : > { %2016 = vst [vmem:[%s1990_s20 + $0x90] sm:$0xff] %v2015_v31  ;;  %2018 = vst [vmem:[%s1990_s20 + $0x98] sm:$0xff] %v2017_v32 }
 0x1f4   : > { %v2019_v33 = vld [vmem:[%s3243_s12 + $0x40] sm:$0xff]  ;;  %v2021_v34 = vld [vmem:[%s3243_s12 + $0x48] sm:$0xff] }
 0x1f5   : > { %2020 = vst [vmem:[%s1990_s20 + $0xc0] sm:$0xff] %v2019_v33  ;;  %2022 = vst [vmem:[%s1990_s20 + $0xc8] sm:$0xff] %v2021_v34 }
 0x1f6 PF: > { %p10_p10 = scmp.ge.s32.totalorder %s2695_s16, 5   ;;  %s3287_s12 = smov %s2651_s13 }
 0x1f7   : > { %s3288_s13 = smov %s2706_s19  ;;  %s3289_s14 = smov %s2695_s16 }
 0x1f8   :  { %12 = sbr.rel (!%p10_p10) target bundleno = 2 (0x2), region = 113 }

// kernel: policy_forward.8
= control target key start
LH: loop header
LB: loop body
LE: loop exit
PB: predicated region body
PF: predicated region fallthrough
CT: control target
= control target key end

     0   :  { %v1572_v26 = vmov 0   ;;  %vm870_vm0 = vcmask 31744   ;;  %vm880_vm1 = vcmask 1041408   ;;  %s2059_s2 = inlined_call_operand.vmem [shape: bf16[900,256], index: 2, kind: input, shape index: {}]   ;;  %s2060_s0 = inlined_call_operand.vmem [shape: bf16[48,900], index: 0, kind: input, shape index: {}]   ;;  %s2061_s1 = inlined_call_operand.vmem [shape: f32[48,1], index: 1, kind: input, shape index: {}]   ;;  %s2062_s3 = inlined_call_operand.vmem [shape: bf16[48,256], index: 3, kind: output, shape index: {}]  }
   0x1   :  { %v1402_v0 = vld [vmem:[%s2059_s2 + $0x4] ss:$8 sps:$4 sm:$0xff]   ;;  %v1406_v2 = vld [vmem:[%s2059_s2] ss:$8 sps:$4 sm:$0xff]   ;;  %v1408_v4 = vld [vmem:[%s2059_s2 + $0x14] ss:$8 sps:$4 sm:$0xff]   ;;  %1400 = vset.pattern.permute.xlu0 %v1572_v26  ;;  %1401 = vset.pattern.permute.xlu1 %v1572_v26 }
   0x2   :  { %v1404_v1 = vld [vmem:[%s2059_s2 + $0x204] ss:$8 sps:$4 sm:$0xff]   ;;  %887 = vmatprep.subr.bf16.mxu1 %v1402_v0  ;;  %v1407_v3 = vld [vmem:[%s2059_s2 + $0x200] ss:$8 sps:$4 sm:$0xff]   ;;  %v1410_v5 = vld [vmem:[%s2059_s2 + $0x214] ss:$8 sps:$4 sm:$0xff]  }
   0x3   :  { %1013 = vmatprep.subr.bf16.mxu0 %v1404_v1  ;;  %888 = vmatpush1.bf16.msra.mxu1 %v1406_v2  ;;  %v1412_v6 = vld [vmem:[%s2059_s2 + $0x10] ss:$8 sps:$4 sm:$0xff]   ;;  %v1414_v8 = vld [vmem:[%s2059_s2 + $0x24] ss:$8 sps:$4 sm:$0xff]   ;;  %v1418_v10 = vld [vmem:[%s2059_s2 + $0x20] ss:$8 sps:$4 sm:$0xff]  }
   0x4   :  { %1014 = vmatpush1.bf16.msra.mxu0 %v1407_v3  ;;  %889 = vmatprep.subr.bf16.mxu1 %v1408_v4  ;;  %v1413_v7 = vld [vmem:[%s2059_s2 + $0x210] ss:$8 sps:$4 sm:$0xff]   ;;  %v1416_v9 = vld [vmem:[%s2059_s2 + $0x224] ss:$8 sps:$4 sm:$0xff]   ;;  %v1419_v11 = vld [vmem:[%s2059_s2 + $0x220] ss:$8 sps:$4 sm:$0xff]  }
   0x5   :  { %1015 = vmatprep.subr.bf16.mxu0 %v1410_v5  ;;  %v1420_v12 = vld [vmem:[%s2059_s2 + $0x34] ss:$8 sps:$4 sm:$0xff]   ;;  %v1424_v14 = vld [vmem:[%s2059_s2 + $0x30] ss:$8 sps:$4 sm:$0xff]   ;;  %v1426_v16 = vld [vmem:[%s2059_s2 + $0x44] ss:$8 sps:$4 sm:$0xff]  }
   0x6   :  { %v1422_v13 = vld [vmem:[%s2059_s2 + $0x234] ss:$8 sps:$4 sm:$0xff]   ;;  %v1425_v15 = vld [vmem:[%s2059_s2 + $0x230] ss:$8 sps:$4 sm:$0xff]   ;;  %v1428_v17 = vld [vmem:[%s2059_s2 + $0x244] ss:$8 sps:$4 sm:$0xff]  }
   0x7   :  { %890 = vmatpush1.bf16.msra.mxu1 %v1412_v6  ;;  %v1430_v18 = vld [vmem:[%s2059_s2 + $0x40] ss:$8 sps:$4 sm:$0xff]   ;;  %v1432_v20 = vld [vmem:[%s2059_s2 + $0x54] ss:$8 sps:$4 sm:$0xff]   ;;  %v1436_v22 = vld [vmem:[%s2059_s2 + $0x50] ss:$8 sps:$4 sm:$0xff]  }
   0x8   :  { %1016 = vmatpush1.bf16.msra.mxu0 %v1413_v7  ;;  %891 = vmatprep.subr.bf16.mxu1 %v1414_v8  ;;  %v1431_v19 = vld [vmem:[%s2059_s2 + $0x240] ss:$8 sps:$4 sm:$0xff]   ;;  %v1434_v21 = vld [vmem:[%s2059_s2 + $0x254] ss:$8 sps:$4 sm:$0xff]   ;;  %v1437_v23 = vld [vmem:[%s2059_s2 + $0x250] ss:$8 sps:$4 sm:$0xff]  }
   0x9   :  { %1017 = vmatprep.subr.bf16.mxu0 %v1416_v9  ;;  %v1438_v24 = vld [vmem:[%s2059_s2 + $0x64] ss:$8 sps:$4 sm:$0xff]   ;;  %v1442_v27 = vld [vmem:[%s2059_s2 + $0x60] ss:$8 sps:$4 sm:$0xff]   ;;  %v1444_v29 = vld [vmem:[%s2059_s2 + $0x74] ss:$8 sps:$4 sm:$0xff]  }
   0xa   :  { %v1440_v25 = vld [vmem:[%s2059_s2 + $0x264] ss:$8 sps:$4 sm:$0xff]   ;;  %v1443_v28 = vld [vmem:[%s2059_s2 + $0x260] ss:$8 sps:$4 sm:$0xff]   ;;  %v1446_v30 = vld [vmem:[%s2059_s2 + $0x274] ss:$8 sps:$4 sm:$0xff]  }
   0xb   :  { %892 = vmatpush1.bf16.msra.mxu1 %v1418_v10  ;;  %v1448_v31 = vld [vmem:[%s2059_s2 + $0x70] ss:$8 sps:$4 sm:$0xff]   ;;  %v1450_v33 = vld [vmem:[%s2059_s2 + $0x84] ss:$8 sps:$4 sm:$0xff]   ;;  %v1454_v35 = vld [vmem:[%s2059_s2 + $0x80] ss:$8 sps:$4 sm:$0xff]  }
   0xc   :  { %1018 = vmatpush1.bf16.msra.mxu0 %v1419_v11  ;;  %893 = vmatprep.subr.bf16.mxu1 %v1420_v12  ;;  %v1449_v32 = vld [vmem:[%s2059_s2 + $0x270] ss:$8 sps:$4 sm:$0xff]   ;;  %v1452_v34 = vld [vmem:[%s2059_s2 + $0x284] ss:$8 sps:$4 sm:$0xff]   ;;  %v1455_v36 = vld [vmem:[%s2059_s2 + $0x280] ss:$8 sps:$4 sm:$0xff]  }
   0xd   :  { %1019 = vmatprep.subr.bf16.mxu0 %v1422_v13  ;;  %v1456_v37 = vld [vmem:[%s2059_s2 + $0x94] ss:$8 sps:$4 sm:$0xff]   ;;  %v1460_v39 = vld [vmem:[%s2059_s2 + $0x90] ss:$8 sps:$4 sm:$0xff]   ;;  %v1462_v41 = vld [vmem:[%s2059_s2 + $0xa4] ss:$8 sps:$4 sm:$0xff]  }
   0xe   :  { %v1458_v38 = vld [vmem:[%s2059_s2 + $0x294] ss:$8 sps:$4 sm:$0xff]   ;;  %v1461_v40 = vld [vmem:[%s2059_s2 + $0x290] ss:$8 sps:$4 sm:$0xff]   ;;  %v1464_v42 = vld [vmem:[%s2059_s2 + $0x2a4] ss:$8 sps:$4 sm:$0xff]  }
   0xf   :  { %894 = vmatpush1.bf16.msra.mxu1 %v1424_v14  ;;  %v1466_v43 = vld [vmem:[%s2059_s2 + $0xa0] ss:$8 sps:$4 sm:$0xff]   ;;  %v1468_v45 = vld [vmem:[%s2059_s2 + $0xb4] ss:$8 sps:$4 sm:$0xff]   ;;  %v1472_v47 = vld [vmem:[%s2059_s2 + $0xb0] ss:$8 sps:$4 sm:$0xff]  }
  0x10   :  { %1020 = vmatpush1.bf16.msra.mxu0 %v1425_v15  ;;  %895 = vmatprep.subr.bf16.mxu1 %v1426_v16  ;;  %v1467_v44 = vld [vmem:[%s2059_s2 + $0x2a0] ss:$8 sps:$4 sm:$0xff]   ;;  %v1470_v46 = vld [vmem:[%s2059_s2 + $0x2b4] ss:$8 sps:$4 sm:$0xff]   ;;  %v1473_v48 = vld [vmem:[%s2059_s2 + $0x2b0] ss:$8 sps:$4 sm:$0xff]  }
  0x11   :  { %1021 = vmatprep.subr.bf16.mxu0 %v1428_v17  ;;  %v15_v49 = vld [vmem:[%s2060_s0] sm:$0xff]  ;;  %v17_v54 = vld [vmem:[%s2060_s0 + $0x10] sm:$0xff] }
  0x12   :  { %v19_v50 = vld [vmem:[%s2060_s0 + $0x20] sm:$0xff]  ;;  %v21_v55 = vld [vmem:[%s2060_s0 + $0x30] sm:$0xff] }
  0x13   :  { %896 = vmatpush1.bf16.msra.mxu1 %v1430_v18  ;;  %v1474_v51 = vld [vmem:[%s2059_s2 + $0xc4] ss:$8 sps:$4 sm:$0xff]   ;;  %v1198_v53 = vcombine.high %v15_v49, %v19_v50  ;;  %v1202_v56 = vcombine.high %v17_v54, %v21_v55  ;;  %v1478_v57 = vld [vmem:[%s2059_s2 + $0xc0] ss:$8 sps:$4 sm:$0xff]   ;;  %v1480_v59 = vld [vmem:[%s2059_s2 + $0xd4] ss:$8 sps:$4 sm:$0xff]   ;;  %v1197_v10 = vcombine.low %v15_v49, %v19_v50  ;;  %v1201_v11 = vcombine.low %v17_v54, %v21_v55 }
  0x14   :  { %1022 = vmatpush1.bf16.msra.mxu0 %v1431_v19  ;;  %897 = vmatprep.subr.bf16.mxu1 %v1432_v20  ;;  %v1476_v52 = vld [vmem:[%s2059_s2 + $0x2c4] ss:$8 sps:$4 sm:$0xff]   ;;  %v1479_v58 = vld [vmem:[%s2059_s2 + $0x2c0] ss:$8 sps:$4 sm:$0xff]   ;;  %v1482_v60 = vld [vmem:[%s2059_s2 + $0x2d4] ss:$8 sps:$4 sm:$0xff]  }
  0x15   :  { %1023 = vmatprep.subr.bf16.mxu0 %v1434_v21  ;;  %919 = vmatprep.mubr.bf16.mxu1 %v1198_v53  ;;  %v1484_v61 = vld [vmem:[%s2059_s2 + $0xd0] ss:$8 sps:$4 sm:$0xff]   ;;  %v1486_v63 = vld [vmem:[%s2059_s2 + $0xe4] ss:$8 sps:$4 sm:$0xff]   ;;  %v1490_v1 = vld [vmem:[%s2059_s2 + $0xe0] ss:$8 sps:$4 sm:$0xff]  }
  0x16   :  { %1045 = vmatprep.mubr.bf16.mxu0 %v1202_v56  ;;  %v1485_v62 = vld [vmem:[%s2059_s2 + $0x2d0] ss:$8 sps:$4 sm:$0xff]   ;;  %v1488_v0 = vld [vmem:[%s2059_s2 + $0x2e4] ss:$8 sps:$4 sm:$0xff]   ;;  %v1491_v2 = vld [vmem:[%s2059_s2 + $0x2e0] ss:$8 sps:$4 sm:$0xff]  }
  0x17   :  { %898 = vmatpush1.bf16.msra.mxu1 %v1436_v22  ;;  %v1492_v3 = vld [vmem:[%s2059_s2 + $0xf4] ss:$8 sps:$4 sm:$0xff]   ;;  %v1496_v5 = vld [vmem:[%s2059_s2 + $0xf0] ss:$8 sps:$4 sm:$0xff]   ;;  %v1500_v7 = vld [vmem:[%s2059_s2 + $0x104] ss:$8 sps:$4 sm:$0xff]  }
  0x18   :  { %1024 = vmatpush1.bf16.msra.mxu0 %v1437_v23  ;;  %899 = vmatprep.subr.bf16.mxu1 %v1438_v24  ;;  %v1494_v4 = vld [vmem:[%s2059_s2 + $0x2f4] ss:$8 sps:$4 sm:$0xff]   ;;  %v1497_v6 = vld [vmem:[%s2059_s2 + $0x2f0] ss:$8 sps:$4 sm:$0xff]   ;;  %v1503_v8 = vld [vmem:[%s2059_s2 + $0x304] ss:$8 sps:$4 sm:$0xff]  }
  0x19   :  { %1025 = vmatprep.subr.bf16.mxu0 %v1440_v25  ;;  %v1498_v9 = vld [vmem:[%s2059_s2 + $0x100] ss:$8 sps:$4 sm:$0xff]   ;;  %v25_v13 = vld [vmem:[%s2060_s0 + $0x50] sm:$0xff]  ;;  %v1512_v20 = vld [vmem:[%s2059_s2 + $0x124] ss:$8 sps:$4 sm:$0xff]  }
  0x1a   :  { %v1501_v12 = vld [vmem:[%s2059_s2 + $0x300] ss:$8 sps:$4 sm:$0xff]   ;;  %v29_v14 = vld [vmem:[%s2060_s0 + $0x70] sm:$0xff]  ;;  %v1515_v21 = vld [vmem:[%s2059_s2 + $0x324] ss:$8 sps:$4 sm:$0xff]  }
  0x1b   :  { %900 = vmatpush1.bf16.msra.mxu1 %v1442_v27  ;;  %v1506_v15 = vld [vmem:[%s2059_s2 + $0x114] ss:$8 sps:$4 sm:$0xff]   ;;  %v1210_v17 = vcombine.high %v25_v13, %v29_v14  ;;  %v1504_v18 = vld [vmem:[%s2059_s2 + $0x110] ss:$8 sps:$4 sm:$0xff]   ;;  %v1209_v22 = vcombine.low %v25_v13, %v29_v14  ;;  %v1510_v25 = vld [vmem:[%s2059_s2 + $0x120] ss:$8 sps:$4 sm:$0xff]  }
  0x1c   :  { %1026 = vmatpush1.bf16.msra.mxu0 %v1443_v28  ;;  %901 = vmatprep.subr.bf16.mxu1 %v1444_v29  ;;  %v1509_v16 = vld [vmem:[%s2059_s2 + $0x314] ss:$8 sps:$4 sm:$0xff]   ;;  %v1507_v19 = vld [vmem:[%s2059_s2 + $0x310] ss:$8 sps:$4 sm:$0xff]   ;;  %v1513_v26 = vld [vmem:[%s2059_s2 + $0x320] ss:$8 sps:$4 sm:$0xff]  }
  0x1d   :  { %1027 = vmatprep.subr.bf16.mxu0 %v1446_v30  ;;  %v33_v23 = vld [vmem:[%s2060_s0 + $0x90] sm:$0xff]  ;;  %v23_v29 = vld [vmem:[%s2060_s0 + $0x40] sm:$0xff]  ;;  %v1902_v50 = vld [vmem:[%s2060_s0 + $0x8] sm:$0xff] }
  0x1e   :  { %v37_v24 = vld [vmem:[%s2060_s0 + $0xb0] sm:$0xff]  ;;  %v1536_v56 = vld [vmem:[%s2059_s2 + $0x164] ss:$8 sps:$4 sm:$0xff]   ;;  %v30_v13 = vld [vmem:[%s2060_s0 + $0x78] sm:$0xff] }
  0x1f   :  { %902 = vmatpush1.bf16.msra.mxu1 %v1448_v31  ;;  %v1518_v27 = vld [vmem:[%s2059_s2 + $0x134] ss:$8 sps:$4 sm:$0xff]   ;;  %v1218_v30 = vcombine.high %v33_v23, %v37_v24  ;;  %v27_v31 = vld [vmem:[%s2060_s0 + $0x60] sm:$0xff]  ;;  %v1528_v53 = vld [vmem:[%s2059_s2 + $0x150] ss:$8 sps:$4 sm:$0xff]  }
  0x20   :  { %1028 = vmatpush1.bf16.msra.mxu0 %v1449_v32  ;;  %903 = vmatprep.subr.bf16.mxu1 %v1450_v33  ;;  %v1521_v28 = vld [vmem:[%s2059_s2 + $0x334] ss:$8 sps:$4 sm:$0xff]   ;;  %v1206_v32 = vcombine.high %v23_v29, %v27_v31  ;;  %v1205_v33 = vcombine.low %v23_v29, %v27_v31  ;;  %v1531_v54 = vld [vmem:[%s2059_s2 + $0x350] ss:$8 sps:$4 sm:$0xff]   ;;  %v1566_v31 = vld [vmem:[%s2059_s2 + $0x1e0] ss:$8 sps:$4 sm:$0xff]  }
  0x21   :  { %1029 = vmatprep.subr.bf16.mxu0 %v1452_v34  ;;  %v1516_v34 = vld [vmem:[%s2059_s2 + $0x130] ss:$8 sps:$4 sm:$0xff]  }
  0x22   :  { %v154_v55 = vld [vmem:[%s2061_s1 + $0x10] sm:$0xff] }
  0x23   :  { %904 = vmatpush1.bf16.msra.mxu1 %v1454_v35  ;;  %v1519_v35 = vld [vmem:[%s2059_s2 + $0x330] ss:$8 sps:$4 sm:$0xff]   ;;  %170 = vperm.xlu1 %1401, %v154_v55  }
  0x24   :  { %1030 = vmatpush1.bf16.msra.mxu0 %v1455_v36  ;;  %905 = vmatprep.subr.bf16.mxu1 %v1456_v37  ;;  %v1524_v36 = vld [vmem:[%s2059_s2 + $0x144] ss:$8 sps:$4 sm:$0xff]   ;;  %v1563_v29 = vld [vmem:[%s2059_s2 + $0x1d0] ss:$8 sps:$4 sm:$0xff]  }
  0x25   :  { %1031 = vmatprep.subr.bf16.mxu0 %v1458_v38  ;;  %v1527_v37 = vld [vmem:[%s2059_s2 + $0x344] ss:$8 sps:$4 sm:$0xff]  }
  0x26   :  { %v31_v38 = vld [vmem:[%s2060_s0 + $0x80] sm:$0xff] }
  0x27   :  { %906 = vmatpush1.bf16.msra.mxu1 %v1460_v39  ;;  %v35_v39 = vld [vmem:[%s2060_s0 + $0xa0] sm:$0xff] }
  0x28   :  { %1032 = vmatpush1.bf16.msra.mxu0 %v1461_v40  ;;  %907 = vmatprep.subr.bf16.mxu1 %v1462_v41  ;;  %v1217_v40 = vcombine.low %v33_v23, %v37_v24  ;;  %v1878_v41 = vld [vmem:[%s2060_s0 + $0x18] sm:$0xff]  ;;  %v1213_v49 = vcombine.low %v31_v38, %v35_v39 }
  0x29   :  { %1033 = vmatprep.subr.bf16.mxu0 %v1464_v42  ;;  %v1883_v42 = vld [vmem:[%s2060_s0 + $0x38] sm:$0xff] }
  0x2a   :  { %v1203_v14 = vcombine.low %v1878_v41, %v1883_v42  ;;  %v1557_v23 = vld [vmem:[%s2059_s2 + $0x1b0] ss:$8 sps:$4 sm:$0xff]  }
  0x2b   :  { %908 = vmatpush1.bf16.msra.mxu1 %v1466_v43  ;;  %v1214_v43 = vcombine.high %v31_v38, %v35_v39  ;;  %v32_v38 = vld [vmem:[%s2060_s0 + $0x88] sm:$0xff] }
  0x2c   :  { %1034 = vmatpush1.bf16.msra.mxu0 %v1467_v44  ;;  %909 = vmatprep.subr.bf16.mxu1 %v1468_v45  ;;  %v1522_v44 = vld [vmem:[%s2059_s2 + $0x140] ss:$8 sps:$4 sm:$0xff]  }
  0x2d   :  { %1035 = vmatprep.subr.bf16.mxu0 %v1470_v46  ;;  %v1525_v45 = vld [vmem:[%s2059_s2 + $0x340] ss:$8 sps:$4 sm:$0xff]   ;;  %v1530_v46 = vld [vmem:[%s2059_s2 + $0x154] ss:$8 sps:$4 sm:$0xff]  }
  0x2e   :  { %v36_v39 = vld [vmem:[%s2060_s0 + $0xa8] sm:$0xff] }
  0x2f   :  { %910 = vmatpush1.bf16.msra.mxu1 %v1472_v47  ;;  %v1533_v47 = vld [vmem:[%s2059_s2 + $0x354] ss:$8 sps:$4 sm:$0xff]  }
  0x30   :  { %1036 = vmatpush1.bf16.msra.mxu0 %v1473_v48  ;;  %911 = vmatprep.subr.bf16.mxu1 %v1474_v51  ;;  %v1204_v48 = vcombine.high %v1878_v41, %v1883_v42  ;;  %v1907_v51 = vld [vmem:[%s2060_s0 + $0x28] sm:$0xff]  ;;  %v1216_v41 = vcombine.high %v32_v38, %v36_v39  ;;  %v1215_v42 = vcombine.low %v32_v38, %v36_v39 }
  0x31   :  { %1037 = vmatprep.subr.bf16.mxu0 %v1476_v52  ;;  %v152_v52 = vld [vmem:[%s2061_s1] sm:$0xff] }
  0x32   :  { %160 = vperm.xlu0 %1400, %v152_v52  }
  0x33   :  { %912 = vmatpush1.bf16.msra.mxu1 %v1478_v57  ;;  %v1539_v57 = vld [vmem:[%s2059_s2 + $0x364] ss:$8 sps:$4 sm:$0xff]  }
  0x34   :  { %1038 = vmatpush1.bf16.msra.mxu0 %v1479_v58  ;;  %913 = vmatprep.subr.bf16.mxu1 %v1480_v59  ;;  %v1200_v58 = vcombine.high %v1902_v50, %v1907_v51  ;;  %v153_v59 = vld [vmem:[%s2061_s1 + $0x8] sm:$0xff] }
  0x35   :  { %1039 = vmatprep.subr.bf16.mxu0 %v1482_v60  ;;  %v1534_v60 = vld [vmem:[%s2059_s2 + $0x160] ss:$8 sps:$4 sm:$0xff]  }
  0x36   :  { %165 = vperm.xlu0 %1400, %v153_v59  }
  0x37   :  { %914 = vmatpush1.bf16.msra.mxu1 %v1484_v61  ;;  %v1537_v61 = vld [vmem:[%s2059_s2 + $0x360] ss:$8 sps:$4 sm:$0xff]  }
  0x38   :  { %1040 = vmatpush1.bf16.msra.mxu0 %v1485_v62  ;;  %915 = vmatprep.subr.bf16.mxu1 %v1486_v63  ;;  %v155_v62 = vld [vmem:[%s2061_s1 + $0x18] sm:$0xff] }
  0x39   :  { %1041 = vmatprep.subr.bf16.mxu0 %v1488_v0  ;;  %v1542_v63 = vld [vmem:[%s2059_s2 + $0x174] ss:$8 sps:$4 sm:$0xff]   ;;  %175 = vperm.xlu1 %1401, %v155_v62  }
  0x3a   :  { %v1545_v0 = vld [vmem:[%s2059_s2 + $0x374] ss:$8 sps:$4 sm:$0xff]  }
  0x3b   :  { %916 = vmatpush1.bf16.msra.mxu1 %v1490_v1  ;;  %v151_v1 = vld [vmem:[%s2059_s2 + $0x380] sm:$0x33] }
  0x3c   :  { %1042 = vmatpush1.bf16.msra.mxu0 %v1491_v2  ;;  %917 = vmatprep.subr.bf16.mxu1 %v1492_v3  ;;  %v156_v2 = vld [vmem:[%s2061_s1 + $0x20] sm:$0xff]  ;;  %v1540_v3 = vld [vmem:[%s2059_s2 + $0x170] ss:$8 sps:$4 sm:$0xff]  }
  0x3d   :  { %1043 = vmatprep.subr.bf16.mxu0 %v1494_v4  ;;  %v1543_v4 = vld [vmem:[%s2059_s2 + $0x370] ss:$8 sps:$4 sm:$0xff]   ;;  %180 = vperm.xlu0 %1400, %v156_v2  }
  0x3f   :  { %918 = vmatpush1.bf16.msra.mxu1 %v1496_v5  ;;  %v157_v5 = vld [vmem:[%s2061_s1 + $0x28] sm:$0xff] }
  0x40   :  { %1044 = vmatpush1.bf16.msra.mxu0 %v1497_v6  ;;  %950 = vmatprep.subr.bf16.mxu1 %v1500_v7  ;;  %v1548_v6 = vld [vmem:[%s2059_s2 + $0x184] ss:$8 sps:$4 sm:$0xff]   ;;  %v1334_v7 = vcombine.high %v151_v1, %v151_v1 }
  0x41   :  { %1076 = vmatprep.subr.bf16.mxu0 %v1503_v8  ;;  %v1333_v8 = vcombine.low %v151_v1, %v151_v1  ;;  %185 = vperm.xlu1 %1401, %v157_v5  }
  0x42   :  { %920 = vmatmul.mubr.bf16.vlgmr.msra.gmra.mrb[0].mxu1 %v1197_v10 }
  0x43   :  { %1046 = vmatmul.mubr.bf16.vlgmr.msra.gmra.mrb[0].mxu0 %v1201_v11  ;;  %951 = vmatpush1.bf16.msra.mxu1 %v1498_v9  ;;  %v1546_v9 = vld [vmem:[%s2059_s2 + $0x180] ss:$8 sps:$4 sm:$0xff]   ;;  %v882_v10 = vsel %vm880_vm1, %v1333_v8, 0  ;;  %v1553_v11 = vld [vmem:[%s2059_s2 + $0x194] ss:$8 sps:$4 sm:$0xff]  }
  0x44   :  { %1077 = vmatpush1.bf16.msra.mxu0 %v1501_v12  ;;  %952 = vmatprep.subr.bf16.mxu1 %v1506_v15  ;;  %v26_v12 = vld [vmem:[%s2060_s0 + $0x58] sm:$0xff] }
  0x45   :  { %1078 = vmatprep.subr.bf16.mxu0 %v1509_v16  ;;  %1055 = vmatprep.mubr.bf16.mxu0 %v1210_v17  ;;  %v1551_v15 = vld [vmem:[%s2059_s2 + $0x190] ss:$8 sps:$4 sm:$0xff]   ;;  %v1212_v16 = vcombine.high %v26_v12, %v30_v13  ;;  %v1556_v17 = vld [vmem:[%s2059_s2 + $0x1a4] ss:$8 sps:$4 sm:$0xff]  }
  0x46   :  { %929 = vmatprep.mubr.bf16.mxu1 %v1206_v32  ;;  %v1571_v32 = vld [vmem:[%s2059_s2 + $0x1f4] ss:$8 sps:$4 sm:$0xff]  }
  0x47   :  { %953 = vmatpush1.bf16.msra.mxu1 %v1504_v18  ;;  %v1554_v18 = vld [vmem:[%s2059_s2 + $0x1a0] ss:$8 sps:$4 sm:$0xff]  }
  0x48   :  { %1079 = vmatpush1.bf16.msra.mxu0 %v1507_v19  ;;  %954 = vmatprep.subr.bf16.mxu1 %v1512_v20  ;;  %v1559_v19 = vld [vmem:[%s2059_s2 + $0x1b4] ss:$8 sps:$4 sm:$0xff]  }
  0x49   :  { %1080 = vmatprep.subr.bf16.mxu0 %v1515_v21  ;;  %v34_v20 = vld [vmem:[%s2060_s0 + $0x98] sm:$0xff] }
  0x4a   :  { %930 = vmatmul.mubr.bf16.gmra.mrb[4].mxu1 %v1205_v33  ;;  %v38_v21 = vld [vmem:[%s2060_s0 + $0xb8] sm:$0xff] }
  0x4b   :  { %1056 = vmatmul.mubr.bf16.gmra.mrb[4].mxu0 %v1209_v22  ;;  %955 = vmatpush1.bf16.msra.mxu1 %v1510_v25  ;;  %v1211_v22 = vcombine.low %v26_v12, %v30_v13  ;;  %v1220_v24 = vcombine.high %v34_v20, %v38_v21  ;;  %v1562_v25 = vld [vmem:[%s2059_s2 + $0x1c4] ss:$8 sps:$4 sm:$0xff]   ;;  %v1569_v33 = vld [vmem:[%s2059_s2 + $0x1f0] ss:$8 sps:$4 sm:$0xff]  }
  0x4c   :  { %1081 = vmatpush1.bf16.msra.mxu0 %v1513_v26  ;;  %956 = vmatprep.subr.bf16.mxu1 %v1518_v27  ;;  %v1560_v26 = vld [vmem:[%s2059_s2 + $0x1c0] ss:$8 sps:$4 sm:$0xff]   ;;  %v1565_v27 = vld [vmem:[%s2059_s2 + $0x1d4] ss:$8 sps:$4 sm:$0xff]  }
  0x4d   :  { %1082 = vmatprep.subr.bf16.mxu0 %v1521_v28  ;;  %1065 = vmatprep.mubr.bf16.mxu0 %v1218_v30  ;;  %v1219_v28 = vcombine.low %v34_v20, %v38_v21  ;;  %v1568_v30 = vld [vmem:[%s2059_s2 + $0x1e4] ss:$8 sps:$4 sm:$0xff]  }
  0x4e   :  { %939 = vmatprep.mubr.bf16.mxu1 %v1214_v43 }
  0x4f   :  { %957 = vmatpush1.bf16.msra.mxu1 %v1516_v34  ;;  %v24_v34 = vld [vmem:[%s2060_s0 + $0x48] sm:$0xff] }
  0x50   :  { %1083 = vmatpush1.bf16.msra.mxu0 %v1519_v35  ;;  %958 = vmatprep.subr.bf16.mxu1 %v1524_v36  ;;  %v28_v35 = vld [vmem:[%s2060_s0 + $0x68] sm:$0xff]  ;;  %v1199_v36 = vcombine.low %v1902_v50, %v1907_v51 }
  0x51   :  { %1084 = vmatprep.subr.bf16.mxu0 %v1527_v37  ;;  %v1208_v37 = vcombine.high %v24_v34, %v28_v35 }
  0x52   :  { %940 = vmatmul.mubr.bf16.gmra.mrb[8].mxu1 %v1213_v49 }
  0x53   :  { %1066 = vmatmul.mubr.bf16.gmra.mrb[8].mxu0 %v1217_v40  ;;  %959 = vmatpush1.bf16.msra.mxu1 %v1522_v44  ;;  %v1207_v40 = vcombine.low %v24_v34, %v28_v35 }
  0x54   :  { %1085 = vmatpush1.bf16.msra.mxu0 %v1525_v45  ;;  %960 = vmatprep.subr.bf16.mxu1 %v1530_v46 }
  0x55   :  { %1086 = vmatprep.subr.bf16.mxu0 %v1533_v47  ;;  %1336 = vmatprep.mubr.msk.bf16.mxu0 %vm870_vm0, %v1204_v48 }
  0x56   :  { %982 = vmatprep.mubr.bf16.mxu1 %v1200_v58 }
  0x57   :  { %961 = vmatpush1.bf16.msra.mxu1 %v1528_v53 }
  0x58   :  { %1087 = vmatpush1.bf16.msra.mxu0 %v1531_v54  ;;  %962 = vmatprep.subr.bf16.mxu1 %v1536_v56 }
  0x59   :  { %1088 = vmatprep.subr.bf16.mxu0 %v1539_v57 }
  0x5b   :  { %963 = vmatpush1.bf16.msra.mxu1 %v1534_v60 }
  0x5c   :  { %1089 = vmatpush1.bf16.msra.mxu0 %v1537_v61  ;;  %964 = vmatprep.subr.bf16.mxu1 %v1542_v63 }
  0x5d   :  { %1090 = vmatprep.subr.bf16.mxu0 %v1545_v0 }
  0x5f   :  { %965 = vmatpush1.bf16.msra.mxu1 %v1540_v3 }
  0x60   :  { %1091 = vmatpush1.bf16.msra.mxu0 %v1543_v4  ;;  %966 = vmatprep.subr.bf16.mxu1 %v1548_v6 }
  0x61   :  { %1335 = vmatprep.subr.msk.bf16.mxu0 %vm880_vm1, %v1334_v7 }
  0x63   :  { %967 = vmatpush1.bf16.msra.mxu1 %v1546_v9 }
  0x64   :  { %1093 = vmatpush1.bf16.msra.mxu0 %v882_v10  ;;  %968 = vmatprep.subr.bf16.mxu1 %v1553_v11 }
  0x67   :  { %1109 = vmatmul.mubr.bf16.vlgmr.msra.gmra.mrb[0].mxu0 %v1203_v14  ;;  %969 = vmatpush1.bf16.msra.mxu1 %v1551_v15 }
  0x68   :  { %1337 = vmatprep.mubr.msk.bf16.mxu0 %vm870_vm0, %v1212_v16  ;;  %970 = vmatprep.subr.bf16.mxu1 %v1556_v17 }
  0x6b   :  { %971 = vmatpush1.bf16.msra.mxu1 %v1554_v18 }
  0x6c   :  { %972 = vmatprep.subr.bf16.mxu1 %v1559_v19 }
  0x6f   :  { %1119 = vmatmul.mubr.bf16.gmra.mrb[4].mxu0 %v1211_v22  ;;  %973 = vmatpush1.bf16.msra.mxu1 %v1557_v23 }
  0x70   :  { %1338 = vmatprep.mubr.msk.bf16.mxu0 %vm870_vm0, %v1220_v24  ;;  %974 = vmatprep.subr.bf16.mxu1 %v1562_v25 }
  0x73   :  { %975 = vmatpush1.bf16.msra.mxu1 %v1560_v26 }
  0x74   :  { %976 = vmatprep.subr.bf16.mxu1 %v1565_v27 }
  0x77   :  { %1129 = vmatmul.mubr.bf16.gmra.mrb[8].mxu0 %v1219_v28  ;;  %977 = vmatpush1.bf16.msra.mxu1 %v1563_v29 }
  0x78   :  { %978 = vmatprep.subr.bf16.mxu1 %v1568_v30 }
  0x7b   :  { %979 = vmatpush1.bf16.msra.mxu1 %v1566_v31 }
  0x7c   :  { %980 = vmatprep.subr.bf16.mxu1 %v1571_v32 }
  0x7f   :  { %981 = vmatpush1.bf16.msra.mxu1 %v1569_v33 }
  0x82   :  { %983 = vmatmul.mubr.bf16.vlgmr.msra.gmra.mrb[0].mxu1 %v1199_v36 }
  0x83   :  { %992 = vmatprep.mubr.bf16.mxu1 %v1208_v37 }
  0x8a   :  { %993 = vmatmul.mubr.bf16.gmra.mrb[4].mxu1 %v1207_v40 }
  0x8b   :  { %1002 = vmatprep.mubr.bf16.mxu1 %v1216_v41 }
  0x92   :  { %1003 = vmatmul.mubr.bf16.gmra.mrb[8].mxu1 %v1215_v42 }
  0xa2   :  { %v171_v2 = vpop.permute.xlu1 %170 }
  0xb1   :  { %v161_v55 = vpop.permute.xlu0 %160 }
  0xb5   :  { %v166_v57 = vpop.permute.xlu0 %165 }
  0xb8   :  { %v176_v15 = vpop.permute.xlu1 %175 }
  0xbc   :  { %v181_v29 = vpop.permute.xlu0 %180 }
  0xc0   :  { %v186_v34 = vpop.permute.xlu1 %185 }
 0x13a   :  { %v1110_v43 = vpop.f32.mrb[0].mxu0 }
 0x13b   :  { %v1112_v44 = vpop.f32.mrb[1].mxu0 }
 0x13c   :  { %v1114_v45 = vpop.f32.mrb[2].mxu0 }
 0x13d   :  { %v1116_v46 = vpop.f32.mrb[3].mxu0 }
 0x142   :  { %v1120_v47 = vpop.f32.mrb[4].mxu0 }
 0x143   :  { %v1122_v48 = vpop.f32.mrb[5].mxu0 }
 0x144   :  { %v1124_v49 = vpop.f32.mrb[6].mxu0 }
 0x145   :  { %v1126_v50 = vpop.f32.mrb[7].mxu0 }
 0x14a   :  { %v1130_v51 = vpop.f32.mrb[8].mxu0 }
 0x14b   :  { %v1132_v52 = vpop.f32.mrb[9].mxu0 }
 0x14c   :  { %v1134_v53 = vpop.f32.mrb[10].mxu0 }
 0x14d   :  { %v1136_v54 = vpop.f32.mrb[11].mxu0 }
 0x155   :  { %v984_v56 = vpop.f32.mrb[0].mxu1 }
 0x156   :  { %v1351_v58 = vadd.f32 %v984_v56, %v161_v55  ;;  %v986_v59 = vpop.f32.mrb[1].mxu1 }
 0x157   :  { %v1353_v60 = vadd.f32 %v986_v59, %v161_v55  ;;  %v988_v61 = vpop.f32.mrb[2].mxu1 }
 0x158   :  { %v1352_v62 = vadd.f32 %v1351_v58, %v1110_v43  ;;  %v1355_v63 = vadd.f32 %v988_v61, %v166_v57  ;;  %v990_v0 = vpop.f32.mrb[3].mxu1 }
 0x159   :  { %v1354_v1 = vadd.f32 %v1353_v60, %v1112_v44  ;;  %v1357_v3 = vadd.f32 %v990_v0, %v166_v57 }
 0x15a   :  { %v1139_v4 = vmax.f32 %v1352_v62, 0.0  ;;  %v1356_v5 = vadd.f32 %v1355_v63, %v1114_v45 }
 0x15b   :  { %v1140_v6 = vmax.f32 %v1354_v1, 0.0  ;;  %v1358_v7 = vadd.f32 %v1357_v3, %v1116_v46 }
 0x15c   :  { %v1141_v8 = vmax.f32 %v1356_v5, 0.0 }
 0x15d   :  { %v1345_v9 = vpack.c.bf16 %v1140_v6, %v1139_v4  ;;  %v1142_v10 = vmax.f32 %v1358_v7, 0.0  ;;  %v994_v11 = vpop.f32.mrb[4].mxu1 }
 0x15e   :  { %v1359_v12 = vadd.f32 %v994_v11, %v171_v2  ;;  %v996_v13 = vpop.f32.mrb[5].mxu1 }
 0x15f   :  { %1187 = vst [vmem:[%s2062_s3] sm:$0xff] %v1345_v9  ;;  %v1346_v14 = vpack.c.bf16 %v1142_v10, %v1141_v8  ;;  %v1361_v16 = vadd.f32 %v996_v13, %v171_v2  ;;  %v998_v17 = vpop.f32.mrb[6].mxu1 }
 0x160   :  { %v1360_v18 = vadd.f32 %v1359_v12, %v1120_v47  ;;  %v1363_v19 = vadd.f32 %v998_v17, %v176_v15  ;;  %v1000_v20 = vpop.f32.mrb[7].mxu1 }
 0x161   :  { %1188 = vst [vmem:[%s2062_s3 + $0x8] sm:$0xff] %v1346_v14  ;;  %v1362_v21 = vadd.f32 %v1361_v16, %v1122_v48  ;;  %v1365_v22 = vadd.f32 %v1000_v20, %v176_v15 }
 0x162   :  { %v1143_v23 = vmax.f32 %v1360_v18, 0.0  ;;  %v1364_v24 = vadd.f32 %v1363_v19, %v1124_v49 }
 0x163   :  { %v1144_v25 = vmax.f32 %v1362_v21, 0.0  ;;  %v1366_v26 = vadd.f32 %v1365_v22, %v1126_v50 }
 0x164   :  { %v1145_v27 = vmax.f32 %v1364_v24, 0.0 }
 0x165   :  { %v1347_v28 = vpack.c.bf16 %v1144_v25, %v1143_v23  ;;  %v1146_v30 = vmax.f32 %v1366_v26, 0.0  ;;  %v1004_v31 = vpop.f32.mrb[8].mxu1 }
 0x166   :  { %v1367_v32 = vadd.f32 %v1004_v31, %v181_v29  ;;  %v1006_v33 = vpop.f32.mrb[9].mxu1 }
 0x167   :  { %1189 = vst [vmem:[%s2062_s3 + $0x10] sm:$0xff] %v1347_v28  ;;  %v1348_v35 = vpack.c.bf16 %v1146_v30, %v1145_v27  ;;  %v1369_v36 = vadd.f32 %v1006_v33, %v181_v29  ;;  %v1008_v37 = vpop.f32.mrb[10].mxu1 }
 0x168   :  { %v1368_v38 = vadd.f32 %v1367_v32, %v1130_v51  ;;  %v1371_v39 = vadd.f32 %v1008_v37, %v186_v34  ;;  %v1010_v40 = vpop.f32.mrb[11].mxu1 }
 0x169   :  { %1190 = vst [vmem:[%s2062_s3 + $0x18] sm:$0xff] %v1348_v35  ;;  %v1370_v41 = vadd.f32 %v1369_v36, %v1132_v52  ;;  %v1373_v42 = vadd.f32 %v1010_v40, %v186_v34 }
 0x16a   :  { %v1147_v43 = vmax.f32 %v1368_v38, 0.0  ;;  %v1372_v44 = vadd.f32 %v1371_v39, %v1134_v53 }
 0x16b   :  { %v1148_v45 = vmax.f32 %v1370_v41, 0.0  ;;  %v1374_v46 = vadd.f32 %v1373_v42, %v1136_v54 }
 0x16c   :  { %v1149_v47 = vmax.f32 %v1372_v44, 0.0 }
 0x16d   :  { %v1349_v48 = vpack.c.bf16 %v1148_v45, %v1147_v43  ;;  %v1150_v49 = vmax.f32 %v1374_v46, 0.0 }
 0x16f   :  { %1191 = vst [vmem:[%s2062_s3 + $0x20] sm:$0xff] %v1349_v48  ;;  %v1350_v50 = vpack.c.bf16 %v1150_v49, %v1149_v47 }
 0x171   :  { %1192 = vst [vmem:[%s2062_s3 + $0x28] sm:$0xff] %v1350_v50 }

// kernel: policy_forward.9
= control target key start
LH: loop header
LB: loop body
LE: loop exit
PB: predicated region body
PF: predicated region fallthrough
CT: control target
= control target key end

     0   :  { %v746_v0 = vmov 0   ;;  %vm371_vm0 = vcmask 392192   ;;  %s949_s2 = inlined_call_operand.vmem [shape: bf16[432,128], index: 2, kind: input, shape index: {}]   ;;  %s950_s0 = inlined_call_operand.vmem [shape: bf16[64,432], index: 0, kind: input, shape index: {}]   ;;  %s951_s1 = inlined_call_operand.vmem [shape: f32[64,1], index: 1, kind: input, shape index: {}]   ;;  %s952_s3 = inlined_call_operand.vmem [shape: bf16[64,128], index: 3, kind: output, shape index: {}]  }
   0x1   :  { %449 = vmatprep.subr.bf16.mxu1 %v746_v0  ;;  %v695_v1 = vld [vmem:[%s949_s2 + $0x40] sm:$0xff]   ;;  %693 = vset.pattern.permute.xlu0 %v746_v0  ;;  %v698_v4 = vld [vmem:[%s949_s2 + $0x48] sm:$0xff]   ;;  %v701_v7 = vld [vmem:[%s949_s2 + $0x50] sm:$0xff]  }
   0x2   :  { %v696_v2 = vld [vmem:[%s949_s2 + $0x80] sm:$0xff]   ;;  %694 = vset.pattern.permute.xlu1 %v746_v0  ;;  %652 = vmatprep.subr.bf16.mxu0 %v695_v1  ;;  %v699_v5 = vld [vmem:[%s949_s2 + $0x88] sm:$0xff]   ;;  %v702_v8 = vld [vmem:[%s949_s2 + $0x90] sm:$0xff]  }
   0x3   :  { %v697_v3 = vld [vmem:[%s949_s2] sm:$0xff]   ;;  %450 = vmatpush1.bf16.msra.mxu1 %v696_v2  ;;  %v700_v6 = vld [vmem:[%s949_s2 + $0x8] sm:$0xff]   ;;  %v703_v9 = vld [vmem:[%s949_s2 + $0x10] sm:$0xff]  }
   0x4   :  { %653 = vmatpush3.bf16.msra.mxu0 %v697_v3  ;;  %451 = vmatprep.subr.bf16.mxu1 %v746_v0  ;;  %v704_v10 = vld [vmem:[%s949_s2 + $0x58] sm:$0xff]   ;;  %v707_v13 = vld [vmem:[%s949_s2 + $0x60] sm:$0xff]   ;;  %v710_v16 = vld [vmem:[%s949_s2 + $0x68] sm:$0xff]  }
   0x5   :  { %654 = vmatprep.subr.bf16.mxu0 %v698_v4  ;;  %v705_v11 = vld [vmem:[%s949_s2 + $0x98] sm:$0xff]   ;;  %v708_v14 = vld [vmem:[%s949_s2 + $0xa0] sm:$0xff]   ;;  %v711_v17 = vld [vmem:[%s949_s2 + $0xa8] sm:$0xff]  }
   0x6   :  { %v706_v12 = vld [vmem:[%s949_s2 + $0x18] sm:$0xff]   ;;  %v709_v15 = vld [vmem:[%s949_s2 + $0x20] sm:$0xff]   ;;  %v712_v18 = vld [vmem:[%s949_s2 + $0x28] sm:$0xff]  }
   0x7   :  { %452 = vmatpush1.bf16.msra.mxu1 %v699_v5  ;;  %v713_v19 = vld [vmem:[%s949_s2 + $0x70] sm:$0xff]   ;;  %v716_v22 = vld [vmem:[%s949_s2 + $0x78] sm:$0xff]   ;;  %v722_v28 = vld [vmem:[%s949_s2 + $0xc0] sm:$0xff]  }
   0x8   :  { %655 = vmatpush3.bf16.msra.mxu0 %v700_v6  ;;  %453 = vmatprep.subr.bf16.mxu1 %v746_v0  ;;  %v714_v20 = vld [vmem:[%s949_s2 + $0xb0] sm:$0xff]   ;;  %v717_v24 = vld [vmem:[%s949_s2 + $0xb8] sm:$0xff]   ;;  %v723_v30 = vld [vmem:[%s949_s2 + $0xc8] sm:$0xff]  }
   0x9   :  { %656 = vmatprep.subr.bf16.mxu0 %v701_v7  ;;  %v715_v21 = vld [vmem:[%s949_s2 + $0x30] sm:$0xff]   ;;  %v718_v25 = vld [vmem:[%s949_s2 + $0x38] sm:$0xff]   ;;  %v85_v31 = vld [vmem:[%s951_s1] sm:$0xff] }
   0xa   :  { %v721_v23 = vld [vmem:[%s950_s0 + $0x4] ss:$16 sps:$4 sm:$0xff]   ;;  %v719_v26 = vld [vmem:[%s950_s0] ss:$16 sps:$4 sm:$0xff]   ;;  %v730_v27 = vld [vmem:[%s950_s0 + $0xc] ss:$16 sps:$4 sm:$0xff]   ;;  %95 = vperm.xlu0 %693, %v85_v31  }
   0xb   :  { %454 = vmatpush1.bf16.msra.mxu1 %v702_v8  ;;  %416 = vmatprep.mubr.bf16.mxu0 %v721_v23  ;;  %v724_v29 = vld [vmem:[%s950_s0 + $0x24] ss:$16 sps:$4 sm:$0xff]   ;;  %v726_v33 = vld [vmem:[%s950_s0 + $0x20] ss:$16 sps:$4 sm:$0xff]   ;;  %v86_v35 = vld [vmem:[%s951_s1 + $0x8] sm:$0xff] }
   0xc   :  { %657 = vmatpush3.bf16.msra.mxu0 %v703_v9  ;;  %455 = vmatprep.subr.bf16.mxu1 %v746_v0  ;;  %v87_v32 = vld [vmem:[%s951_s1 + $0x10] sm:$0xff]  ;;  %v88_v37 = vld [vmem:[%s951_s1 + $0x18] sm:$0xff]  ;;  %v89_v40 = vld [vmem:[%s951_s1 + $0x20] sm:$0xff] }
   0xd   :  { %658 = vmatprep.subr.bf16.mxu0 %v704_v10  ;;  %609 = vmatprep.mubr.msk.bf16.mxu1 %vm371_vm0, %v730_v27  ;;  %v727_v34 = vld [vmem:[%s949_s2 + $0xd0] sm:$0xff]   ;;  %v728_v38 = vld [vmem:[%s950_s0 + $0x8] ss:$16 sps:$4 sm:$0xff]   ;;  %v734_v39 = vld [vmem:[%s950_s0 + $0x2c] ss:$16 sps:$4 sm:$0xff]  }
   0xe   :  { %105 = vperm.xlu1 %694, %v87_v32   ;;  %v731_v36 = vld [vmem:[%s950_s0 + $0x44] ss:$16 sps:$4 sm:$0xff]   ;;  %100 = vperm.xlu0 %693, %v86_v35   ;;  %v90_v41 = vld [vmem:[%s951_s1 + $0x28] sm:$0xff]  ;;  %v733_v42 = vld [vmem:[%s950_s0 + $0x40] ss:$16 sps:$4 sm:$0xff]  }
   0xf   :  { %456 = vmatpush1.bf16.msra.mxu1 %v705_v11  ;;  %v91_v43 = vld [vmem:[%s951_s1 + $0x30] sm:$0xff]  ;;  %v92_v45 = vld [vmem:[%s951_s1 + $0x38] sm:$0xff] }
  0x10   :  { %659 = vmatpush3.bf16.msra.mxu0 %v706_v12  ;;  %457 = vmatprep.subr.bf16.mxu1 %v746_v0  ;;  %v737_v44 = vld [vmem:[%s950_s0 + $0x64] ss:$16 sps:$4 sm:$0xff]   ;;  %v736_v46 = vld [vmem:[%s950_s0 + $0x28] ss:$16 sps:$4 sm:$0xff]   ;;  %v740_v47 = vld [vmem:[%s950_s0 + $0x4c] ss:$16 sps:$4 sm:$0xff]  }
  0x11   :  { %660 = vmatprep.subr.bf16.mxu0 %v707_v13  ;;  %v739_v48 = vld [vmem:[%s950_s0 + $0x60] ss:$16 sps:$4 sm:$0xff]   ;;  %v742_v49 = vld [vmem:[%s950_s0 + $0x48] ss:$16 sps:$4 sm:$0xff]   ;;  %v743_v50 = vld [vmem:[%s950_s0 + $0x6c] ss:$16 sps:$4 sm:$0xff]  }
  0x12   :  { %110 = vperm.xlu1 %694, %v88_v37   ;;  %115 = vperm.xlu0 %693, %v89_v40   ;;  %v745_v51 = vld [vmem:[%s950_s0 + $0x68] ss:$16 sps:$4 sm:$0xff]  }
  0x13   :  { %458 = vmatpush1.bf16.msra.mxu1 %v708_v14 }
  0x14   :  { %661 = vmatpush3.bf16.msra.mxu0 %v709_v15  ;;  %459 = vmatprep.subr.bf16.mxu1 %v746_v0 }
  0x15   :  { %662 = vmatprep.subr.bf16.mxu0 %v710_v16 }
  0x16   :  { %120 = vperm.xlu1 %694, %v90_v41   ;;  %125 = vperm.xlu0 %693, %v91_v43  }
  0x17   :  { %460 = vmatpush1.bf16.msra.mxu1 %v711_v17 }
  0x18   :  { %663 = vmatpush3.bf16.msra.mxu0 %v712_v18  ;;  %461 = vmatprep.subr.bf16.mxu1 %v746_v0 }
  0x19   :  { %664 = vmatprep.subr.bf16.mxu0 %v713_v19 }
  0x1a   :  { %130 = vperm.xlu1 %694, %v92_v45  }
  0x1b   :  { %462 = vmatpush1.bf16.msra.mxu1 %v714_v20 }
  0x1c   :  { %665 = vmatpush3.bf16.msra.mxu0 %v715_v21  ;;  %463 = vmatprep.subr.bf16.mxu1 %v746_v0 }
  0x1d   :  { %666 = vmatprep.subr.bf16.mxu0 %v716_v22 }
  0x1f   :  { %464 = vmatpush1.bf16.msra.mxu1 %v717_v24 }
  0x20   :  { %667 = vmatpush3.bf16.msra.mxu0 %v718_v25  ;;  %465 = vmatprep.subr.bf16.mxu1 %v746_v0 }
  0x23   :  { %417 = vmatmul.mubr.bf16.vlgmr.msra.gmra.mrb[0].mxu0 %v719_v26  ;;  %466 = vmatpush1.bf16.msra.mxu1 %v722_v28 }
  0x24   :  { %467 = vmatprep.subr.bf16.mxu1 %v746_v0  ;;  %424 = vmatprep.mubr.bf16.mxu0 %v724_v29 }
  0x27   :  { %468 = vmatpush1.bf16.msra.mxu1 %v723_v30 }
  0x28   :  { %469 = vmatprep.subr.bf16.mxu1 %v746_v0 }
  0x2b   :  { %425 = vmatmul.mubr.bf16.gmra.mrb[4].mxu0 %v726_v33  ;;  %470 = vmatpush1.bf16.msra.mxu1 %v727_v34 }
  0x2c   :  { %432 = vmatprep.mubr.bf16.mxu0 %v731_v36 }
  0x2e   :  { %482 = vmatmul.mubr.bf16.vlgmr.msra.gmra.mrb[0].mxu1 %v728_v38 }
  0x2f   :  { %610 = vmatprep.mubr.msk.bf16.mxu1 %vm371_vm0, %v734_v39 }
  0x33   :  { %433 = vmatmul.mubr.bf16.gmra.mrb[8].mxu0 %v733_v42 }
  0x34   :  { %440 = vmatprep.mubr.bf16.mxu0 %v737_v44 }
  0x36   :  { %490 = vmatmul.mubr.bf16.gmra.mrb[4].mxu1 %v736_v46 }
  0x37   :  { %611 = vmatprep.mubr.msk.bf16.mxu1 %vm371_vm0, %v740_v47 }
  0x3b   :  { %441 = vmatmul.mubr.bf16.gmra.mrb[12].mxu0 %v739_v48 }
  0x3e   :  { %498 = vmatmul.mubr.bf16.gmra.mrb[8].mxu1 %v742_v49 }
  0x3f   :  { %612 = vmatprep.mubr.msk.bf16.mxu1 %vm371_vm0, %v743_v50 }
  0x46   :  { %506 = vmatmul.mubr.bf16.gmra.mrb[12].mxu1 %v745_v51 }
  0x89   :  { %v96_v56 = vpop.permute.xlu0 %95 }
  0x8d   :  { %v101_v61 = vpop.permute.xlu0 %100  ;;  %v106_v63 = vpop.permute.xlu1 %105 }
  0x91   :  { %v111_v15 = vpop.permute.xlu1 %110  ;;  %v116_v32 = vpop.permute.xlu0 %115 }
  0x95   :  { %v121_v34 = vpop.permute.xlu1 %120  ;;  %v126_v50 = vpop.permute.xlu0 %125 }
  0xf6   :  { %v668_v52 = vpop.f32.mrb[0].mxu0 }
  0xf7   :  { %v669_v53 = vpop.f32.mrb[1].mxu0 }
  0xf8   :  { %v670_v54 = vadd.f32 %v669_v53, %v668_v52  ;;  %v671_v55 = vpop.f32.mrb[2].mxu0  ;;  %v131_v53 = vpop.permute.xlu1 %130 }
  0xf9   :  { %v672_v57 = vpop.f32.mrb[3].mxu0 }
  0xfa   :  { %v673_v58 = vadd.f32 %v672_v57, %v671_v55  ;;  %v419_v60 = vadd.f32 %v670_v54, %v96_v56 }
  0xfc   :  { %v422_v4 = vadd.f32 %v673_v58, %v101_v61 }
  0xfe   :  { %v674_v59 = vpop.f32.mrb[4].mxu0 }
  0xff   :  { %v675_v62 = vpop.f32.mrb[5].mxu0 }
 0x100   :  { %v676_v0 = vadd.f32 %v675_v62, %v674_v59  ;;  %v677_v1 = vpop.f32.mrb[6].mxu0 }
 0x101   :  { %v483_v2 = vpop.f32.mrb[0].mxu1  ;;  %v678_v3 = vpop.f32.mrb[7].mxu0 }
 0x102   :  { %v484_v5 = vadd.f32 %v483_v2, %v419_v60  ;;  %v485_v6 = vpop.f32.mrb[1].mxu1  ;;  %v679_v7 = vadd.f32 %v678_v3, %v677_v1  ;;  %v427_v14 = vadd.f32 %v676_v0, %v106_v63 }
 0x103   :  { %v486_v8 = vpop.f32.mrb[2].mxu1 }
 0x104   :  { %v487_v9 = vadd.f32 %v486_v8, %v422_v4  ;;  %v488_v10 = vpop.f32.mrb[3].mxu1  ;;  %v514_v11 = vmax.f32 %v484_v5, 0.0  ;;  %v430_v22 = vadd.f32 %v679_v7, %v111_v15 }
 0x106   :  { %v515_v12 = vmax.f32 %v487_v9, 0.0  ;;  %v680_v13 = vpop.f32.mrb[8].mxu0 }
 0x107   :  { %v681_v16 = vpop.f32.mrb[9].mxu0 }
 0x108   :  { %v632_v17 = vpack.c.bf16 %v515_v12, %v514_v11  ;;  %v682_v18 = vadd.f32 %v681_v16, %v680_v13  ;;  %v683_v19 = vpop.f32.mrb[10].mxu0 }
 0x109   :  { %v491_v20 = vpop.f32.mrb[4].mxu1  ;;  %v684_v21 = vpop.f32.mrb[11].mxu0 }
 0x10a   :  { %633 = vst [vmem:[%s952_s3] sm:$0xff] %v632_v17   ;;  %v492_v23 = vadd.f32 %v491_v20, %v427_v14  ;;  %v493_v24 = vpop.f32.mrb[5].mxu1  ;;  %v685_v25 = vadd.f32 %v684_v21, %v683_v19  ;;  %v435_v38 = vadd.f32 %v682_v18, %v116_v32 }
 0x10b   :  { %v494_v26 = vpop.f32.mrb[6].mxu1 }
 0x10c   :  { %v495_v27 = vadd.f32 %v494_v26, %v430_v22  ;;  %v496_v28 = vpop.f32.mrb[7].mxu1  ;;  %v516_v29 = vmax.f32 %v492_v23, 0.0  ;;  %v438_v44 = vadd.f32 %v685_v25, %v121_v34 }
 0x10e   :  { %v517_v30 = vmax.f32 %v495_v27, 0.0  ;;  %v686_v31 = vpop.f32.mrb[12].mxu0 }
 0x10f   :  { %v687_v33 = vpop.f32.mrb[13].mxu0 }
 0x110   :  { %v637_v35 = vpack.c.bf16 %v517_v30, %v516_v29  ;;  %v688_v36 = vadd.f32 %v687_v33, %v686_v31  ;;  %v689_v37 = vpop.f32.mrb[14].mxu0 }
 0x111   :  { %v690_v39 = vpop.f32.mrb[15].mxu0  ;;  %v499_v40 = vpop.f32.mrb[8].mxu1 }
 0x112   :  { %649 = vst [vmem:[%s952_s3 + $0x8] sm:$0xff] %v637_v35   ;;  %v691_v41 = vadd.f32 %v690_v39, %v689_v37  ;;  %v500_v42 = vadd.f32 %v499_v40, %v435_v38  ;;  %v501_v43 = vpop.f32.mrb[9].mxu1  ;;  %v443_v52 = vadd.f32 %v688_v36, %v126_v50 }
 0x113   :  { %v502_v45 = vpop.f32.mrb[10].mxu1 }
 0x114   :  { %v503_v46 = vadd.f32 %v502_v45, %v438_v44  ;;  %v504_v47 = vpop.f32.mrb[11].mxu1  ;;  %v518_v48 = vmax.f32 %v500_v42, 0.0  ;;  %v446_v57 = vadd.f32 %v691_v41, %v131_v53 }
 0x116   :  { %v519_v49 = vmax.f32 %v503_v46, 0.0 }
 0x118   :  { %v642_v51 = vpack.c.bf16 %v519_v49, %v518_v48 }
 0x119   :  { %v507_v54 = vpop.f32.mrb[12].mxu1 }
 0x11a   :  { %650 = vst [vmem:[%s952_s3 + $0x10] sm:$0xff] %v642_v51   ;;  %v508_v55 = vadd.f32 %v507_v54, %v443_v52  ;;  %v509_v56 = vpop.f32.mrb[13].mxu1 }
 0x11b   :  { %v510_v58 = vpop.f32.mrb[14].mxu1 }
 0x11c   :  { %v511_v59 = vadd.f32 %v510_v58, %v446_v57  ;;  %v512_v60 = vpop.f32.mrb[15].mxu1  ;;  %v520_v61 = vmax.f32 %v508_v55, 0.0 }
 0x11e   :  { %v521_v62 = vmax.f32 %v511_v59, 0.0 }
 0x120   :  { %v647_v63 = vpack.c.bf16 %v521_v62, %v520_v61 }
 0x122   :  { %651 = vst [vmem:[%s952_s3 + $0x18] sm:$0xff] %v647_v63  }

// kernel: policy_forward.10
= control target key start
LH: loop header
LB: loop body
LE: loop exit
PB: predicated region body
PF: predicated region fallthrough
CT: control target
= control target key end

     0   :  { %v1013_v1 = vmov 0   ;;  %vm475_vm0 = vcmask 523264   ;;  %s1245_s2 = inlined_call_operand.vmem [shape: bf16[576,128], index: 2, kind: input, shape index: {}]   ;;  %s1246_s0 = inlined_call_operand.vmem [shape: bf16[64,576], index: 0, kind: input, shape index: {}]   ;;  %s1247_s1 = inlined_call_operand.vmem [shape: f32[64,1], index: 1, kind: input, shape index: {}]   ;;  %s1248_s3 = inlined_call_operand.vmem [shape: bf16[64,128], index: 3, kind: output, shape index: {}]  }
   0x1   :  { %v949_v0 = vld [vmem:[%s1245_s2 + $0x40] sm:$0xff]   ;;  %947 = vset.pattern.permute.xlu0 %v1013_v1  ;;  %948 = vset.pattern.permute.xlu1 %v1013_v1  ;;  %v953_v5 = vld [vmem:[%s1245_s2 + $0x48] sm:$0xff]   ;;  %v957_v9 = vld [vmem:[%s1245_s2 + $0x50] sm:$0xff]  }
   0x2   :  { %v950_v2 = vld [vmem:[%s1245_s2 + $0xc0] sm:$0xff]   ;;  %834 = vmatprep.subr.bf16.mxu0 %v949_v0  ;;  %v954_v6 = vld [vmem:[%s1245_s2 + $0xc8] sm:$0xff]   ;;  %v958_v10 = vld [vmem:[%s1245_s2 + $0xd0] sm:$0xff]  }
   0x3   :  { %v951_v3 = vld [vmem:[%s1245_s2] sm:$0xff]   ;;  %874 = vmatprep.subr.bf16.mxu1 %v950_v2  ;;  %v955_v7 = vld [vmem:[%s1245_s2 + $0x8] sm:$0xff]   ;;  %v959_v11 = vld [vmem:[%s1245_s2 + $0x10] sm:$0xff]  }
   0x4   :  { %v952_v4 = vld [vmem:[%s1245_s2 + $0x80] sm:$0xff]   ;;  %835 = vmatpush3.bf16.msra.mxu0 %v951_v3  ;;  %v956_v8 = vld [vmem:[%s1245_s2 + $0x88] sm:$0xff]   ;;  %v960_v12 = vld [vmem:[%s1245_s2 + $0x90] sm:$0xff]  }
   0x5   :  { %875 = vmatpush3.bf16.msra.mxu1 %v952_v4  ;;  %836 = vmatprep.subr.bf16.mxu0 %v953_v5  ;;  %v961_v13 = vld [vmem:[%s1245_s2 + $0x58] sm:$0xff]   ;;  %v965_v17 = vld [vmem:[%s1245_s2 + $0x60] sm:$0xff]   ;;  %v969_v21 = vld [vmem:[%s1245_s2 + $0x68] sm:$0xff]  }
   0x6   :  { %876 = vmatprep.subr.bf16.mxu1 %v954_v6  ;;  %v962_v14 = vld [vmem:[%s1245_s2 + $0xd8] sm:$0xff]   ;;  %v966_v18 = vld [vmem:[%s1245_s2 + $0xe0] sm:$0xff]   ;;  %v970_v22 = vld [vmem:[%s1245_s2 + $0xe8] sm:$0xff]  }
   0x7   :  { %v963_v15 = vld [vmem:[%s1245_s2 + $0x18] sm:$0xff]   ;;  %v967_v19 = vld [vmem:[%s1245_s2 + $0x20] sm:$0xff]   ;;  %v971_v23 = vld [vmem:[%s1245_s2 + $0x28] sm:$0xff]  }
   0x8   :  { %837 = vmatpush3.bf16.msra.mxu0 %v955_v7  ;;  %v964_v16 = vld [vmem:[%s1245_s2 + $0x98] sm:$0xff]   ;;  %v968_v20 = vld [vmem:[%s1245_s2 + $0xa0] sm:$0xff]   ;;  %v972_v24 = vld [vmem:[%s1245_s2 + $0xa8] sm:$0xff]  }
   0x9   :  { %877 = vmatpush3.bf16.msra.mxu1 %v956_v8  ;;  %838 = vmatprep.subr.bf16.mxu0 %v957_v9  ;;  %v973_v25 = vld [vmem:[%s1245_s2 + $0x70] sm:$0xff]   ;;  %v977_v29 = vld [vmem:[%s1245_s2 + $0x78] sm:$0xff]   ;;  %v986_v36 = vld [vmem:[%s1246_s0 + $0xc] ss:$20 sps:$4 sm:$0xff]  }
   0xa   :  { %878 = vmatprep.subr.bf16.mxu1 %v958_v10  ;;  %v974_v26 = vld [vmem:[%s1245_s2 + $0xf0] sm:$0xff]   ;;  %v978_v30 = vld [vmem:[%s1245_s2 + $0xf8] sm:$0xff]   ;;  %v987_v37 = vld [vmem:[%s1245_s2 + $0x100] sm:$0xff]   ;;  %585 = vmatprep.mubr.bf16.mxu1 %v986_v36 }
   0xb   :  { %v975_v27 = vld [vmem:[%s1245_s2 + $0x30] sm:$0xff]   ;;  %v979_v31 = vld [vmem:[%s1245_s2 + $0x38] sm:$0xff]   ;;  %v988_v38 = vld [vmem:[%s1246_s0 + $0x2c] ss:$20 sps:$4 sm:$0xff]  }
   0xc   :  { %839 = vmatpush3.bf16.msra.mxu0 %v959_v11  ;;  %v976_v28 = vld [vmem:[%s1245_s2 + $0xb0] sm:$0xff]   ;;  %v980_v32 = vld [vmem:[%s1245_s2 + $0xb8] sm:$0xff]   ;;  %v994_v40 = vld [vmem:[%s1245_s2 + $0x108] sm:$0xff]  }
   0xd   :  { %879 = vmatpush3.bf16.msra.mxu1 %v960_v12  ;;  %840 = vmatprep.subr.bf16.mxu0 %v961_v13  ;;  %v981_v33 = vld [vmem:[%s1246_s0] ss:$20 sps:$4 sm:$0xff]   ;;  %v983_v34 = vld [vmem:[%s1246_s0 + $0x4] ss:$20 sps:$4 sm:$0xff]   ;;  %v984_v35 = vld [vmem:[%s1246_s0 + $0x8] ss:$20 sps:$4 sm:$0xff]  }
   0xe   :  { %880 = vmatprep.subr.bf16.mxu1 %v962_v14  ;;  %520 = vmatprep.mubr.bf16.mxu0 %v983_v34  ;;  %v990_v39 = vld [vmem:[%s1246_s0 + $0x34] ss:$20 sps:$4 sm:$0xff]   ;;  %v993_v42 = vld [vmem:[%s1246_s0 + $0x30] ss:$20 sps:$4 sm:$0xff]   ;;  %v1008_v46 = vld [vmem:[%s1245_s2 + $0x118] sm:$0xff]  }
   0xf   :  { %v992_v41 = vld [vmem:[%s1246_s0 + $0x28] ss:$20 sps:$4 sm:$0xff]   ;;  %v1001_v45 = vld [vmem:[%s1245_s2 + $0x110] sm:$0xff]   ;;  %v1000_v48 = vld [vmem:[%s1246_s0 + $0x58] ss:$20 sps:$4 sm:$0xff]  }
  0x10   :  { %841 = vmatpush3.bf16.msra.mxu0 %v963_v15  ;;  %v995_v43 = vld [vmem:[%s1246_s0 + $0x54] ss:$20 sps:$4 sm:$0xff]   ;;  %v997_v44 = vld [vmem:[%s1246_s0 + $0x5c] ss:$20 sps:$4 sm:$0xff]   ;;  %v1004_v50 = vld [vmem:[%s1246_s0 + $0x84] ss:$20 sps:$4 sm:$0xff]  }
  0x11   :  { %881 = vmatpush3.bf16.msra.mxu1 %v964_v16  ;;  %842 = vmatprep.subr.bf16.mxu0 %v965_v17  ;;  %v999_v47 = vld [vmem:[%s1246_s0 + $0x50] ss:$20 sps:$4 sm:$0xff]   ;;  %v112_v53 = vld [vmem:[%s1247_s1 + $0x8] sm:$0xff]  ;;  %v114_v54 = vld [vmem:[%s1247_s1 + $0x18] sm:$0xff] }
  0x12   :  { %882 = vmatprep.subr.bf16.mxu1 %v966_v18  ;;  %v1002_v49 = vld [vmem:[%s1246_s0 + $0x7c] ss:$20 sps:$4 sm:$0xff]   ;;  %v111_v51 = vld [vmem:[%s1247_s1] sm:$0xff]  ;;  %v1006_v55 = vld [vmem:[%s1246_s0 + $0x78] ss:$20 sps:$4 sm:$0xff]  }
  0x13   :  { %v113_v52 = vld [vmem:[%s1247_s1 + $0x10] sm:$0xff]  ;;  %121 = vperm.xlu0 %947, %v111_v51   ;;  %v115_v58 = vld [vmem:[%s1247_s1 + $0x20] sm:$0xff]  ;;  %v116_v60 = vld [vmem:[%s1247_s1 + $0x28] sm:$0xff] }
  0x14   :  { %843 = vmatpush3.bf16.msra.mxu0 %v967_v19  ;;  %131 = vperm.xlu1 %948, %v113_v52   ;;  %v1007_v56 = vld [vmem:[%s1246_s0 + $0x80] ss:$20 sps:$4 sm:$0xff]   ;;  %v1009_v57 = vld [vmem:[%s1246_s0 + $0x10] ss:$20 sps:$4 sm:$0xff]   ;;  %v118_v62 = vld [vmem:[%s1247_s1 + $0x38] sm:$0xff] }
  0x15   :  { %883 = vmatpush3.bf16.msra.mxu1 %v968_v20  ;;  %844 = vmatprep.subr.bf16.mxu0 %v969_v21  ;;  %v1010_v59 = vld [vmem:[%s1246_s0 + $0x60] ss:$20 sps:$4 sm:$0xff]   ;;  %v1011_v63 = vld [vmem:[%s1246_s0 + $0x38] ss:$20 sps:$4 sm:$0xff]   ;;  %v1012_v0 = vld [vmem:[%s1246_s0 + $0x88] ss:$20 sps:$4 sm:$0xff]  }
  0x16   :  { %884 = vmatprep.subr.bf16.mxu1 %v970_v22  ;;  %v117_v61 = vld [vmem:[%s1247_s1 + $0x30] sm:$0xff] }
  0x17   :  { %126 = vperm.xlu0 %947, %v112_v53  }
  0x18   :  { %845 = vmatpush3.bf16.msra.mxu0 %v971_v23  ;;  %136 = vperm.xlu1 %948, %v114_v54  }
  0x19   :  { %885 = vmatpush3.bf16.msra.mxu1 %v972_v24  ;;  %846 = vmatprep.subr.bf16.mxu0 %v973_v25 }
  0x1a   :  { %886 = vmatprep.subr.bf16.mxu1 %v974_v26 }
  0x1b   :  { %141 = vperm.xlu0 %947, %v115_v58  }
  0x1c   :  { %847 = vmatpush3.bf16.msra.mxu0 %v975_v27  ;;  %146 = vperm.xlu1 %948, %v116_v60  }
  0x1d   :  { %887 = vmatpush3.bf16.msra.mxu1 %v976_v28  ;;  %848 = vmatprep.subr.bf16.mxu0 %v977_v29 }
  0x1e   :  { %888 = vmatprep.subr.bf16.mxu1 %v978_v30 }
  0x1f   :  { %151 = vperm.xlu0 %947, %v117_v61  }
  0x20   :  { %849 = vmatpush3.bf16.msra.mxu0 %v979_v31  ;;  %156 = vperm.xlu1 %948, %v118_v62  }
  0x21   :  { %889 = vmatpush3.bf16.msra.mxu1 %v980_v32  ;;  %922 = vmatprep.subr.bf16.mxu0 %v987_v37 }
  0x22   :  { %938 = vmatprep.subr.bf16.mxu1 %v987_v37 }
  0x23   :  { %521 = vmatmul.mubr.bf16.vlgmr.msra.gmra.mrb[0].mxu0 %v981_v33 }
  0x24   :  { %586 = vmatmul.mubr.bf16.vlgmr.msra.gmra.mrb[0].mxu1 %v984_v35  ;;  %923 = vmatpush3.bf16.msra.mxu0 %v987_v37 }
  0x25   :  { %942 = vmatpush3.bf16.msra.mxu1 %v987_v37  ;;  %528 = vmatprep.mubr.bf16.mxu0 %v988_v38 }
  0x26   :  { %593 = vmatprep.mubr.bf16.mxu1 %v990_v39  ;;  %924 = vmatprep.subr.bf16.mxu0 %v994_v40 }
  0x27   :  { %939 = vmatprep.subr.bf16.mxu1 %v994_v40 }
  0x28   :  { %925 = vmatpush3.bf16.msra.mxu0 %v994_v40 }
  0x29   :  { %943 = vmatpush3.bf16.msra.mxu1 %v994_v40  ;;  %926 = vmatprep.subr.bf16.mxu0 %v1001_v45 }
  0x2a   :  { %940 = vmatprep.subr.bf16.mxu1 %v1001_v45 }
  0x2b   :  { %529 = vmatmul.mubr.bf16.gmra.mrb[4].mxu0 %v992_v41 }
  0x2c   :  { %594 = vmatmul.mubr.bf16.gmra.mrb[4].mxu1 %v993_v42  ;;  %536 = vmatprep.mubr.bf16.mxu0 %v995_v43 }
  0x2d   :  { %601 = vmatprep.mubr.bf16.mxu1 %v997_v44  ;;  %927 = vmatpush3.bf16.msra.mxu0 %v1001_v45 }
  0x2e   :  { %944 = vmatpush3.bf16.msra.mxu1 %v1001_v45  ;;  %928 = vmatprep.subr.bf16.mxu0 %v1008_v46 }
  0x2f   :  { %941 = vmatprep.subr.bf16.mxu1 %v1008_v46 }
  0x31   :  { %929 = vmatpush3.bf16.msra.mxu0 %v1008_v46 }
  0x32   :  { %945 = vmatpush3.bf16.msra.mxu1 %v1008_v46 }
  0x33   :  { %537 = vmatmul.mubr.bf16.gmra.mrb[8].mxu0 %v999_v47 }
  0x34   :  { %602 = vmatmul.mubr.bf16.gmra.mrb[8].mxu1 %v1000_v48  ;;  %544 = vmatprep.mubr.bf16.mxu0 %v1002_v49 }
  0x35   :  { %609 = vmatprep.mubr.bf16.mxu1 %v1004_v50 }
  0x3b   :  { %545 = vmatmul.mubr.bf16.gmra.mrb[12].mxu0 %v1006_v55 }
  0x3c   :  { %610 = vmatmul.mubr.bf16.gmra.mrb[12].mxu1 %v1007_v56  ;;  %930 = vmatprep.mubr.msk.bf16.mxu0 %vm475_vm0, %v1009_v57 }
  0x3d   :  { %934 = vmatprep.mubr.msk.bf16.mxu1 %vm475_vm0, %v1010_v59 }
  0x43   :  { %931 = vmatmul.mubr.msk.bf16.vlgmr.msra.gmra.mrb[16].mxu0 %vm475_vm0, %v1011_v63 }
  0x44   :  { %935 = vmatmul.mubr.msk.bf16.vlgmr.msra.gmra.mrb[16].mxu1 %vm475_vm0, %v1012_v0 }
  0x92   :  { %v122_v1 = vpop.permute.xlu0 %121 }
  0x93   :  { %v132_v18 = vpop.permute.xlu1 %131 }
  0x96   :  { %v127_v3 = vpop.permute.xlu0 %126 }
  0x97   :  { %v137_v33 = vpop.permute.xlu1 %136 }
  0x9a   :  { %v142_v36 = vpop.permute.xlu0 %141 }
  0x9b   :  { %v147_v50 = vpop.permute.xlu1 %146 }
  0x9e   :  { %v152_v54 = vpop.permute.xlu0 %151 }
  0xf6   :  { %v850_v2 = vpop.f32.mrb[0].mxu0 }
  0xf7   :  { %v890_v4 = vpop.f32.mrb[0].mxu1  ;;  %v851_v5 = vpop.f32.mrb[1].mxu0 }
  0xf8   :  { %v852_v6 = vadd.f32 %v851_v5, %v850_v2  ;;  %v891_v7 = vpop.f32.mrb[1].mxu1  ;;  %v853_v8 = vpop.f32.mrb[2].mxu0 }
  0xf9   :  { %v892_v9 = vadd.f32 %v891_v7, %v890_v4  ;;  %v893_v10 = vpop.f32.mrb[2].mxu1  ;;  %v854_v11 = vpop.f32.mrb[3].mxu0 }
  0xfa   :  { %v523_v12 = vadd.f32 %v852_v6, %v122_v1  ;;  %v855_v13 = vadd.f32 %v854_v11, %v853_v8  ;;  %v894_v14 = vpop.f32.mrb[3].mxu1  ;;  %v157_v4 = vpop.permute.xlu1 %156 }
  0xfb   :  { %v895_v15 = vadd.f32 %v894_v14, %v893_v10 }
  0xfc   :  { %v526_v16 = vadd.f32 %v855_v13, %v127_v3  ;;  %v588_v17 = vadd.f32 %v892_v9, %v523_v12 }
  0xfe   :  { %v856_v19 = vpop.f32.mrb[4].mxu0  ;;  %v1230_v20 = vadd.f32 %v895_v15, %v526_v16 }
  0xff   :  { %v896_v21 = vpop.f32.mrb[4].mxu1  ;;  %v857_v22 = vpop.f32.mrb[5].mxu0 }
 0x100   :  { %v858_v23 = vadd.f32 %v857_v22, %v856_v19  ;;  %v897_v24 = vpop.f32.mrb[5].mxu1  ;;  %v859_v25 = vpop.f32.mrb[6].mxu0 }
 0x101   :  { %v898_v26 = vadd.f32 %v897_v24, %v896_v21  ;;  %v899_v27 = vpop.f32.mrb[6].mxu1  ;;  %v860_v28 = vpop.f32.mrb[7].mxu0 }
 0x102   :  { %v531_v29 = vadd.f32 %v858_v23, %v132_v18  ;;  %v861_v30 = vadd.f32 %v860_v28, %v859_v25  ;;  %v900_v31 = vpop.f32.mrb[7].mxu1 }
 0x103   :  { %v901_v32 = vadd.f32 %v900_v31, %v899_v27 }
 0x104   :  { %v534_v34 = vadd.f32 %v861_v30, %v137_v33  ;;  %v596_v35 = vadd.f32 %v898_v26, %v531_v29 }
 0x106   :  { %v862_v37 = vpop.f32.mrb[8].mxu0  ;;  %v599_v38 = vadd.f32 %v901_v32, %v534_v34 }
 0x107   :  { %v902_v39 = vpop.f32.mrb[8].mxu1  ;;  %v863_v40 = vpop.f32.mrb[9].mxu0 }
 0x108   :  { %v864_v41 = vadd.f32 %v863_v40, %v862_v37  ;;  %v903_v42 = vpop.f32.mrb[9].mxu1  ;;  %v865_v43 = vpop.f32.mrb[10].mxu0 }
 0x109   :  { %v904_v44 = vadd.f32 %v903_v42, %v902_v39  ;;  %v905_v45 = vpop.f32.mrb[10].mxu1  ;;  %v866_v46 = vpop.f32.mrb[11].mxu0 }
 0x10a   :  { %v539_v47 = vadd.f32 %v864_v41, %v142_v36  ;;  %v867_v48 = vadd.f32 %v866_v46, %v865_v43  ;;  %v906_v49 = vpop.f32.mrb[11].mxu1 }
 0x10b   :  { %v907_v51 = vadd.f32 %v906_v49, %v905_v45 }
 0x10c   :  { %v542_v52 = vadd.f32 %v867_v48, %v147_v50  ;;  %v604_v53 = vadd.f32 %v904_v44, %v539_v47 }
 0x10e   :  { %v868_v55 = vpop.f32.mrb[12].mxu0  ;;  %v607_v56 = vadd.f32 %v907_v51, %v542_v52 }
 0x10f   :  { %v908_v57 = vpop.f32.mrb[12].mxu1  ;;  %v869_v58 = vpop.f32.mrb[13].mxu0 }
 0x110   :  { %v870_v59 = vadd.f32 %v869_v58, %v868_v55  ;;  %v909_v60 = vpop.f32.mrb[13].mxu1  ;;  %v871_v61 = vpop.f32.mrb[14].mxu0 }
 0x111   :  { %v910_v62 = vadd.f32 %v909_v60, %v908_v57  ;;  %v911_v63 = vpop.f32.mrb[14].mxu1  ;;  %v872_v0 = vpop.f32.mrb[15].mxu0 }
 0x112   :  { %v547_v1 = vadd.f32 %v870_v59, %v152_v54  ;;  %v873_v2 = vadd.f32 %v872_v0, %v871_v61  ;;  %v912_v3 = vpop.f32.mrb[15].mxu1 }
 0x113   :  { %v913_v5 = vadd.f32 %v912_v3, %v911_v63 }
 0x114   :  { %v550_v6 = vadd.f32 %v873_v2, %v157_v4  ;;  %v612_v7 = vadd.f32 %v910_v62, %v547_v1 }
 0x116   :  { %v932_v8 = vpop.f32.mrb[16].mxu0  ;;  %v615_v9 = vadd.f32 %v913_v5, %v550_v6 }
 0x117   :  { %v661_v10 = vadd.f32 %v932_v8, %v596_v35  ;;  %v936_v11 = vpop.f32.mrb[16].mxu1  ;;  %v652_v12 = vpop.f32.mrb[17].mxu0 }
 0x118   :  { %v677_v13 = vadd.f32 %v936_v11, %v612_v7  ;;  %v653_v14 = vadd.f32 %v652_v12, %v588_v17  ;;  %v668_v15 = vpop.f32.mrb[17].mxu1  ;;  %v933_v16 = vpop.f32.mrb[18].mxu0 }
 0x119   :  { %v669_v18 = vadd.f32 %v668_v15, %v604_v53  ;;  %v664_v19 = vadd.f32 %v933_v16, %v599_v38  ;;  %v937_v21 = vpop.f32.mrb[18].mxu1  ;;  %v655_v22 = vpop.f32.mrb[19].mxu0  ;;  %v685_v26 = vmax.f32 %v661_v10, 0.0 }
 0x11a   :  { %v680_v23 = vadd.f32 %v937_v21, %v615_v9  ;;  %v656_v24 = vadd.f32 %v655_v22, %v1230_v20  ;;  %v671_v25 = vpop.f32.mrb[19].mxu1  ;;  %v689_v29 = vmax.f32 %v677_v13, 0.0  ;;  %v683_v30 = vmax.f32 %v653_v14, 0.0 }
 0x11b   :  { %v686_v27 = vmax.f32 %v664_v19, 0.0  ;;  %v672_v28 = vadd.f32 %v671_v25, %v607_v56  ;;  %v687_v33 = vmax.f32 %v669_v18, 0.0 }
 0x11c   :  { %v690_v31 = vmax.f32 %v680_v23, 0.0  ;;  %v684_v32 = vmax.f32 %v656_v24, 0.0 }
 0x11d   :  { %v819_v34 = vpack.c.bf16 %v686_v27, %v685_v26  ;;  %v688_v17 = vmax.f32 %v672_v28, 0.0 }
 0x11e   :  { %v829_v35 = vpack.c.bf16 %v690_v31, %v689_v29  ;;  %v814_v36 = vpack.c.bf16 %v684_v32, %v683_v30 }
 0x11f   :  { %831 = vst [vmem:[%s1248_s3 + $0x8] sm:$0xff] %v819_v34   ;;  %v824_v37 = vpack.c.bf16 %v688_v17, %v687_v33 }
 0x120   :  { %833 = vst [vmem:[%s1248_s3 + $0x18] sm:$0xff] %v829_v35   ;;  %815 = vst [vmem:[%s1248_s3] sm:$0xff] %v814_v36  }
 0x121   :  { %832 = vst [vmem:[%s1248_s3 + $0x10] sm:$0xff] %v824_v37  }

// kernel: policy_forward.11
= control target key start
LH: loop header
LB: loop body
LE: loop exit
PB: predicated region body
PF: predicated region fallthrough
CT: control target
= control target key end

     0   :  { %v193_v27 = vlaneseq  ;;  %v1551_v35 = vmov 1966171168   ;;  %vm1553_vm0 = vmmov 0   ;;  %s1929_s0 = inlined_call_operand.vmem [shape: bf16[2,1152], index: 0, kind: input, shape index: {}]   ;;  %s1930_s1 = inlined_call_operand.vmem [shape: bf16[1152,100], index: 1, kind: input, shape index: {}]   ;;  %s1931_s2 = inlined_call_operand.vmem [shape: f32[1,100], index: 2, kind: input, shape index: {}]   ;;  %s1932_s3 = inlined_call_operand.vmem [shape: bf16[100,50], index: 3, kind: input, shape index: {}]   ;;  %s1933_s4 = inlined_call_operand.vmem [shape: f32[1,50], index: 4, kind: input, shape index: {}]   ;;  %s1934_s5 = inlined_call_operand.vmem [shape: bf16[50,10], index: 5, kind: input, shape index: {}]   ;;  %s1935_s6 = inlined_call_operand.vmem [shape: f32[1,10], index: 6, kind: input, shape index: {}]   ;;  %s1936_s7 = inlined_call_operand.vmem [shape: bf16[10,3], index: 7, kind: input, shape index: {}]   ;;  %s1937_s8 = inlined_call_operand.vmem [shape: f32[1,3], index: 8, kind: input, shape index: {}]   ;;  %s1938_s9 = inlined_call_operand.hbm [shape: f32[2,3], index: 9, kind: output, shape index: {}]  }
   0x1   :  { %v1438_v0 = vld [vmem:[%s1930_s1 + $0x40] sm:$0xff]   ;;  %v1442_v4 = vld [vmem:[%s1930_s1 + $0x48] sm:$0xff]   ;;  %v1446_v8 = vld [vmem:[%s1930_s1 + $0x50] sm:$0xff]   ;;  %v191_v36 = vunpack.c.l.s4 %v1551_v35 }
   0x2   :  { %v1439_v1 = vld [vmem:[%s1930_s1] sm:$0xff]   ;;  %1266 = vmatprep.subr.bf16.mxu0 %v1438_v0  ;;  %v1443_v5 = vld [vmem:[%s1930_s1 + $0x8] sm:$0xff]   ;;  %v1447_v9 = vld [vmem:[%s1930_s1 + $0x10] sm:$0xff]   ;;  %v194_v32 = vshrl.u32 %v193_v27, 7 }
   0x3   :  { %v1440_v2 = vld [vmem:[%s1930_s1 + $0xc0] sm:$0xff]   ;;  %1267 = vmatpush3.bf16.msra.mxu0 %v1439_v1  ;;  %v1444_v6 = vld [vmem:[%s1930_s1 + $0xc8] sm:$0xff]   ;;  %v1448_v10 = vld [vmem:[%s1930_s1 + $0xd0] sm:$0xff]   ;;  %v192_v39 = vunpack.c.0.s8 %v191_v36 }
   0x4   :  { %v1441_v3 = vld [vmem:[%s1930_s1 + $0x80] sm:$0xff]   ;;  %1288 = vmatprep.subr.bf16.mxu1 %v1440_v2  ;;  %1268 = vmatprep.subr.bf16.mxu0 %v1442_v4  ;;  %v1445_v7 = vld [vmem:[%s1930_s1 + $0x88] sm:$0xff]   ;;  %v1449_v11 = vld [vmem:[%s1930_s1 + $0x90] sm:$0xff]  }
   0x5   :  { %1289 = vmatpush3.bf16.msra.mxu1 %v1441_v3  ;;  %v1450_v12 = vld [vmem:[%s1930_s1 + $0x58] sm:$0xff]   ;;  %v1454_v16 = vld [vmem:[%s1930_s1 + $0x60] sm:$0xff]   ;;  %v1458_v20 = vld [vmem:[%s1930_s1 + $0x68] sm:$0xff]   ;;  %v1710_v41 = vsub.s32 %v192_v39, %v194_v32 }
   0x6   :  { %1290 = vmatprep.subr.bf16.mxu1 %v1444_v6  ;;  %v1451_v13 = vld [vmem:[%s1930_s1 + $0x18] sm:$0xff]   ;;  %v1455_v17 = vld [vmem:[%s1930_s1 + $0x20] sm:$0xff]   ;;  %v1459_v21 = vld [vmem:[%s1930_s1 + $0x28] sm:$0xff]  }
   0x7   :  { %1269 = vmatpush3.bf16.msra.mxu0 %v1443_v5  ;;  %v1452_v14 = vld [vmem:[%s1930_s1 + $0xd8] sm:$0xff]   ;;  %v1456_v18 = vld [vmem:[%s1930_s1 + $0xe0] sm:$0xff]   ;;  %v1460_v22 = vld [vmem:[%s1930_s1 + $0xe8] sm:$0xff]  }
   0x8   :  { %1270 = vmatprep.subr.bf16.mxu0 %v1446_v8  ;;  %v1453_v15 = vld [vmem:[%s1930_s1 + $0x98] sm:$0xff]   ;;  %v1457_v19 = vld [vmem:[%s1930_s1 + $0xa0] sm:$0xff]   ;;  %v1461_v23 = vld [vmem:[%s1930_s1 + $0xa8] sm:$0xff]  }
   0x9   :  { %1291 = vmatpush3.bf16.msra.mxu1 %v1445_v7  ;;  %v1462_v24 = vld [vmem:[%s1930_s1 + $0x70] sm:$0xff]   ;;  %v1466_v29 = vld [vmem:[%s1930_s1 + $0x78] sm:$0xff]   ;;  %v34_v33 = vld [vmem:[%s1929_s0] sm:$0xff] }
   0xa   :  { %1292 = vmatprep.subr.bf16.mxu1 %v1448_v10  ;;  %v1463_v25 = vld [vmem:[%s1930_s1 + $0x30] sm:$0xff]   ;;  %v1467_v30 = vld [vmem:[%s1930_s1 + $0x38] sm:$0xff]   ;;  %v1471_v37 = vld [vmem:[%s1930_s1 + $0x140] sm:$0xff]   ;;  %v189_v38 = vcombine.high %v34_v33, %v34_v33  ;;  %v196_v42 = vrot.slane %v34_v33, %v1710_v41 }
   0xb   :  { %1271 = vmatpush3.bf16.msra.mxu0 %v1447_v9  ;;  %v1464_v26 = vld [vmem:[%s1930_s1 + $0xf0] sm:$0xff]   ;;  %v1468_v31 = vld [vmem:[%s1930_s1 + $0xf8] sm:$0xff]   ;;  %v1473_v40 = vld [vmem:[%s1930_s1 + $0x1c0] sm:$0xff]  }
   0xc   :  { %1272 = vmatprep.subr.bf16.mxu0 %v1450_v12  ;;  %v1465_v28 = vld [vmem:[%s1930_s1 + $0xb0] sm:$0xff]   ;;  %v1470_v34 = vld [vmem:[%s1930_s1 + $0xb8] sm:$0xff]   ;;  %v1714_v43 = vrot.slane %v189_v38, %v1710_v41  ;;  %v204_v44 = vcombine.high %v196_v42, %v196_v42  ;;  %v212_v45 = vrot.slane %v196_v42, %v1710_v41  ;;  %v1472_v48 = vld [vmem:[%s1930_s1 + $0x100] sm:$0xff]  }
   0xd   :  { %1293 = vmatpush3.bf16.msra.mxu1 %v1449_v11  ;;  %v1475_v51 = vld [vmem:[%s1930_s1 + $0x148] sm:$0xff]   ;;  %v1474_v53 = vld [vmem:[%s1930_s1 + $0x180] sm:$0xff]   ;;  %v1479_v57 = vld [vmem:[%s1930_s1 + $0x150] sm:$0xff]  }
   0xe   :  { %1294 = vmatprep.subr.bf16.mxu1 %v1452_v14  ;;  %v205_v46 = vcombine.high %v1714_v43, %v1714_v43  ;;  %v226_v47 = vrot.slane %v204_v44, %v1710_v41  ;;  %v234_v50 = vcombine.high %v212_v45, %v212_v45  ;;  %v1477_v54 = vld [vmem:[%s1930_s1 + $0x1c8] sm:$0xff]   ;;  %v1481_v59 = vld [vmem:[%s1930_s1 + $0x1d0] sm:$0xff]   ;;  %v1483_v61 = vld [vmem:[%s1930_s1 + $0x158] sm:$0xff]  }
   0xf   :  { %1273 = vmatpush3.bf16.msra.mxu0 %v1451_v13  ;;  %v1476_v56 = vld [vmem:[%s1930_s1 + $0x108] sm:$0xff]   ;;  %v1480_v60 = vld [vmem:[%s1930_s1 + $0x110] sm:$0xff]   ;;  %v1485_v63 = vld [vmem:[%s1930_s1 + $0x1d8] sm:$0xff]  }
  0x10   :  { %1274 = vmatprep.subr.bf16.mxu0 %v1454_v16  ;;  %v233_v49 = vrot.slane %v205_v46, %v1710_v41  ;;  %725 = vmatprep.mubr.bf16.mxu0 %v226_v47  ;;  %v236_v52 = vcombine.high %v226_v47, %v226_v47  ;;  %v1478_v58 = vld [vmem:[%s1930_s1 + $0x188] sm:$0xff]   ;;  %v1482_v62 = vld [vmem:[%s1930_s1 + $0x190] sm:$0xff]   ;;  %v1484_v0 = vld [vmem:[%s1930_s1 + $0x118] sm:$0xff]  }
  0x11   :  { %1295 = vmatpush3.bf16.msra.mxu1 %v1453_v15  ;;  %v1487_v1 = vld [vmem:[%s1930_s1 + $0x160] sm:$0xff]   ;;  %v1486_v2 = vld [vmem:[%s1930_s1 + $0x198] sm:$0xff]   ;;  %v1491_v5 = vld [vmem:[%s1930_s1 + $0x168] sm:$0xff]  }
  0x12   :  { %1296 = vmatprep.subr.bf16.mxu1 %v1456_v18  ;;  %v237_v55 = vcombine.high %v233_v49, %v233_v49  ;;  %765 = vmatprep.mubr.bf16.mxu1 %v236_v52  ;;  %v1489_v3 = vld [vmem:[%s1930_s1 + $0x1e0] sm:$0xff]   ;;  %v1493_v7 = vld [vmem:[%s1930_s1 + $0x1e8] sm:$0xff]   ;;  %v1495_v9 = vld [vmem:[%s1930_s1 + $0x170] sm:$0xff]  }
  0x13   :  { %1275 = vmatpush3.bf16.msra.mxu0 %v1455_v17  ;;  %v1488_v4 = vld [vmem:[%s1930_s1 + $0x120] sm:$0xff]   ;;  %v1492_v8 = vld [vmem:[%s1930_s1 + $0x128] sm:$0xff]   ;;  %v1497_v11 = vld [vmem:[%s1930_s1 + $0x1f0] sm:$0xff]   ;;  %v219_v17 = vrot.slane %v1714_v43, %v1710_v41 }
  0x14   :  { %1276 = vmatprep.subr.bf16.mxu0 %v1458_v20  ;;  %v1490_v6 = vld [vmem:[%s1930_s1 + $0x1a0] sm:$0xff]   ;;  %v1494_v10 = vld [vmem:[%s1930_s1 + $0x1a8] sm:$0xff]   ;;  %v1496_v12 = vld [vmem:[%s1930_s1 + $0x130] sm:$0xff]   ;;  %v1552_v20 = vmov 0.0  }
  0x15   :  { %1297 = vmatpush3.bf16.msra.mxu1 %v1457_v19  ;;  %v1499_v13 = vld [vmem:[%s1930_s1 + $0x178] sm:$0xff]   ;;  %v1498_v14 = vld [vmem:[%s1930_s1 + $0x1b0] sm:$0xff]   ;;  %v1503_v19 = vld [vmem:[%s1930_s1 + $0x200] sm:$0xff]  }
  0x16   :  { %1298 = vmatprep.subr.bf16.mxu1 %v1460_v22  ;;  %v1501_v15 = vld [vmem:[%s1930_s1 + $0x1f8] sm:$0xff]   ;;  %v1504_v22 = vld [vmem:[%s1930_s1 + $0x208] sm:$0xff]  }
  0x17   :  { %1277 = vmatpush3.bf16.msra.mxu0 %v1459_v21  ;;  %v1500_v16 = vld [vmem:[%s1930_s1 + $0x138] sm:$0xff]   ;;  %v235_v21 = vcombine.high %v219_v17, %v219_v17 }
  0x18   :  { %1278 = vmatprep.subr.bf16.mxu0 %v1462_v24  ;;  %v1502_v18 = vld [vmem:[%s1930_s1 + $0x1b8] sm:$0xff]  }
  0x19   :  { %1299 = vmatpush3.bf16.msra.mxu1 %v1461_v23 }
  0x1a   :  { %1300 = vmatprep.subr.bf16.mxu1 %v1464_v26 }
  0x1b   :  { %1279 = vmatpush3.bf16.msra.mxu0 %v1463_v25 }
  0x1c   :  { %1280 = vmatprep.subr.bf16.mxu0 %v1466_v29 }
  0x1d   :  { %1301 = vmatpush3.bf16.msra.mxu1 %v1465_v28 }
  0x1e   :  { %1302 = vmatprep.subr.bf16.mxu1 %v1468_v31 }
  0x1f   :  { %1281 = vmatpush3.bf16.msra.mxu0 %v1467_v30 }
  0x20   :  { %1310 = vmatprep.subr.bf16.mxu0 %v1471_v37 }
  0x21   :  { %1303 = vmatpush3.bf16.msra.mxu1 %v1470_v34 }
  0x22   :  { %1332 = vmatprep.subr.bf16.mxu1 %v1473_v40  ;;  %726 = vmatmul.mubr.bf16.vlgmr.msra.gmra.mrb[0].mxu0 %v212_v45 }
  0x23   :  { %1311 = vmatpush3.bf16.msra.mxu0 %v1472_v48  ;;  %805 = vmatprep.mubr.bf16.mxu0 %v233_v49 }
  0x24   :  { %766 = vmatmul.mubr.bf16.vlgmr.msra.gmra.mrb[0].mxu1 %v234_v50  ;;  %1312 = vmatprep.subr.bf16.mxu0 %v1475_v51 }
  0x25   :  { %1333 = vmatpush3.bf16.msra.mxu1 %v1474_v53  ;;  %845 = vmatprep.mubr.bf16.mxu1 %v237_v55 }
  0x26   :  { %1334 = vmatprep.subr.bf16.mxu1 %v1477_v54 }
  0x27   :  { %1313 = vmatpush3.bf16.msra.mxu0 %v1476_v56 }
  0x28   :  { %1314 = vmatprep.subr.bf16.mxu0 %v1479_v57 }
  0x29   :  { %1335 = vmatpush3.bf16.msra.mxu1 %v1478_v58 }
  0x2a   :  { %1336 = vmatprep.subr.bf16.mxu1 %v1481_v59 }
  0x2b   :  { %1315 = vmatpush3.bf16.msra.mxu0 %v1480_v60 }
  0x2c   :  { %1316 = vmatprep.subr.bf16.mxu0 %v1483_v61 }
  0x2d   :  { %1337 = vmatpush3.bf16.msra.mxu1 %v1482_v62 }
  0x2e   :  { %1338 = vmatprep.subr.bf16.mxu1 %v1485_v63 }
  0x2f   :  { %1317 = vmatpush3.bf16.msra.mxu0 %v1484_v0 }
  0x30   :  { %1318 = vmatprep.subr.bf16.mxu0 %v1487_v1 }
  0x31   :  { %1339 = vmatpush3.bf16.msra.mxu1 %v1486_v2 }
  0x32   :  { %1340 = vmatprep.subr.bf16.mxu1 %v1489_v3 }
  0x33   :  { %1319 = vmatpush3.bf16.msra.mxu0 %v1488_v4 }
  0x34   :  { %1320 = vmatprep.subr.bf16.mxu0 %v1491_v5 }
  0x35   :  { %1341 = vmatpush3.bf16.msra.mxu1 %v1490_v6 }
  0x36   :  { %1342 = vmatprep.subr.bf16.mxu1 %v1493_v7 }
  0x37   :  { %1321 = vmatpush3.bf16.msra.mxu0 %v1492_v8 }
  0x38   :  { %1322 = vmatprep.subr.bf16.mxu0 %v1495_v9 }
  0x39   :  { %1343 = vmatpush3.bf16.msra.mxu1 %v1494_v10 }
  0x3a   :  { %1344 = vmatprep.subr.bf16.mxu1 %v1497_v11 }
  0x3b   :  { %1323 = vmatpush3.bf16.msra.mxu0 %v1496_v12 }
  0x3c   :  { %1324 = vmatprep.subr.bf16.mxu0 %v1499_v13 }
  0x3d   :  { %1345 = vmatpush3.bf16.msra.mxu1 %v1498_v14 }
  0x3e   :  { %1346 = vmatprep.subr.bf16.mxu1 %v1501_v15 }
  0x3f   :  { %1325 = vmatpush3.bf16.msra.mxu0 %v1500_v16 }
  0x40   :  { %1378 = vmatprep.subr.bf16.mxu0 %v1552_v20 }
  0x41   :  { %1347 = vmatpush3.bf16.msra.mxu1 %v1502_v18 }
  0x42   :  { %806 = vmatmul.mubr.bf16.vlgmr.msra.gmra.mrb[4].mxu0 %v219_v17  ;;  %1398 = vmatprep.subr.bf16.mxu1 %v1552_v20 }
  0x43   :  { %1379 = vmatpush3.bf16.msra.mxu0 %v1503_v19  ;;  %1394 = vmatprep.mubr.msk.bf16.mxu0 %vm1553_vm0, %v1552_v20 }
  0x44   :  { %846 = vmatmul.mubr.bf16.vlgmr.msra.gmra.mrb[4].mxu1 %v235_v21  ;;  %1380 = vmatprep.subr.bf16.mxu0 %v1552_v20 }
  0x45   :  { %1412 = vmatprep.mubr.msk.bf16.mxu1 %vm1553_vm0, %v1552_v20 }
  0x46   :  { %14 = vsyncpa [#allocation3], 0  ;;  %v1505_v23 = vld [vmem:[%s1930_s1 + $0x210] sm:$0xff]   ;;  %v1506_v24 = vld [vmem:[%s1930_s1 + $0x218] sm:$0xff]   ;;  %vm958_vm1 = vcmask 1041408   ;;  %vm954_vm2 = vcmask 818176  }
  0x47   :  { %1381 = vmatpush3.bf16.msra.mxu0 %v1504_v22  ;;  %v1507_v25 = vld [vmem:[%s1930_s1 + $0x220] sm:$0xff]   ;;  %v1508_v26 = vld [vmem:[%s1930_s1 + $0x228] sm:$0xff]   ;;  %v1509_v27 = vld [vmem:[%s1930_s1 + $0x230] sm:$0xff]   ;;  %vm1043_vm3 = vcmask 1040384   ;;  %vm1107_vm4 = vcmask 1044480   ;;  %vm1039_vm5 = vcmask 408576  }
  0x48   :  { %1382 = vmatprep.subr.bf16.mxu0 %v1552_v20  ;;  %v1510_v28 = vld [vmem:[%s1930_s1 + $0x238] sm:$0xff]   ;;  %v1174_v29 = vld.sshfl [vmem:[%s1929_s0 + $0x8] sm:$0x1 pattern:$0x75316420]  ;;  %v1511_v31 = vld [vmem:[%s1932_s3] sm:$0xff]  }
  0x49   :  { %v251_v30 = vrot.slane %v1174_v29, %v1710_v41  ;;  %1399 = vmatpush3.bf16.msra.mxu1 %v1511_v31  ;;  %v1512_v32 = vld [vmem:[%s1932_s3 + $0x8] sm:$0xff]   ;;  %v1513_v33 = vld [vmem:[%s1932_s3 + $0x10] sm:$0xff]   ;;  %v1514_v34 = vld [vmem:[%s1932_s3 + $0x18] sm:$0xff]   ;;  %vm1103_vm6 = vcmask 80896   ;;  %vm1157_vm7 = vcmask 17408  }
  0x4a   :  { %1400 = vmatprep.subr.bf16.mxu1 %v1552_v20  ;;  %v1515_v35 = vld [vmem:[%s1932_s3 + $0x20] sm:$0xff]   ;;  %v1516_v36 = vld [vmem:[%s1932_s3 + $0x28] sm:$0xff]   ;;  %v1517_v37 = vld [vmem:[%s1932_s3 + $0x30] ss:$0 sps:$4 sm:$0x33]  }
  0x4b   :  { %1383 = vmatpush3.bf16.msra.mxu0 %v1505_v23  ;;  %v960_v38 = vsel %vm958_vm1, %v1517_v37, 0  ;;  %v1173_v40 = vld [vmem:[%s1931_s2] ss:$0 sm:$0xff]  ;;  %v1519_v8 = vld [vmem:[%s1934_s5 + $0x8] sm:$0xff]   ;;  %v1520_v9 = vld [vmem:[%s1934_s5 + $0x10] sm:$0xff]  }
  0x4c   :  { %1384 = vmatprep.subr.bf16.mxu0 %v1552_v20  ;;  %v1518_v6 = vld [vmem:[%s1934_s5] sm:$0xff]   ;;  %v1521_v10 = vld [vmem:[%s1934_s5 + $0x18] ss:$0 sps:$4 sm:$0x11]  }
  0x4d   :  { %1401 = vmatpush3.bf16.msra.mxu1 %v1512_v32  ;;  %v1045_v11 = vsel %vm1043_vm3, %v1521_v10, 0  ;;  %v1522_v12 = vld [vmem:[%s1936_s7] sm:$0x1f]  }
  0x4e   :  { %1402 = vmatprep.subr.bf16.mxu1 %v1552_v20  ;;  %v1109_v13 = vsel %vm1107_vm4, %v1522_v12, 0  ;;  %v1247_v14 = vld [vmem:[%s1933_s4] ss:$0 sm:$0xff] }
  0x4f   :  { %1385 = vmatpush3.bf16.msra.mxu0 %v1506_v24  ;;  %v1256_v22 = vld [vmem:[%s1935_s6] ss:$0 sm:$0xff]  ;;  %s1554_s6 = smov [#allocation2]  }
  0x50   :  { %1386 = vmatprep.subr.bf16.mxu0 %v1552_v20  ;;  %s1165_s0 = sshll.u32 %s1554_s6, 4  ;;  %s1166_s0 = int_to_ptr.vmem [resolvable:$true] %s1165_s0 }
  0x51   :  { %1403 = vmatpush3.bf16.msra.mxu1 %v1513_v33  ;;  %s1527_s13 = scalar_lea.vmem %s1166_s0, 32  ;;  %p1532_p1 = scmp.lt.s32.totalorder %s1166_s0, %s1166_s0 }
  0x52   :  { %1404 = vmatprep.subr.bf16.mxu1 %v1552_v20  ;;  %p1528_p0 = scmp.ne.s32.totalorder %s1166_s0, %s1527_s13  ;;  %p1533_p2 = scmp.lt.s32.totalorder %s1527_s13, %s1527_s13 }
  0x53   :  { %1387 = vmatpush3.bf16.msra.mxu0 %v1507_v25 }
  0x54   :  { %1388 = vmatprep.subr.bf16.mxu0 %v1552_v20  ;;  %p1534_p3 = por %p1533_p2, %p1532_p1 }
  0x55   :  { %1405 = vmatpush3.bf16.msra.mxu1 %v1514_v34 }
  0x56   :  { %1406 = vmatprep.subr.bf16.mxu1 %v1552_v20  ;;  %p1535_p4 = pnand %p1534_p3, %p1528_p0 }
  0x57   :  { %1389 = vmatpush3.bf16.msra.mxu0 %v1508_v26 }
  0x58   :  { %1390 = vmatprep.subr.bf16.mxu0 %v1552_v20 }
  0x59   :  { %1407 = vmatpush3.bf16.msra.mxu1 %v1515_v35 }
  0x5a   :  { %1408 = vmatprep.subr.bf16.mxu1 %v1552_v20 }
  0x5b   :  { %1391 = vmatpush3.bf16.msra.mxu0 %v1509_v27 }
  0x5c   :  { %1392 = vmatprep.subr.bf16.mxu0 %v1552_v20 }
  0x5d   :  { %1409 = vmatpush3.bf16.msra.mxu1 %v1516_v36 }
  0x5e   :  { %1410 = vmatprep.subr.bf16.mxu1 %v1552_v20 }
  0x5f   :  { %1393 = vmatpush3.bf16.msra.mxu0 %v1510_v28 }
  0x60   :  { %1428 = vmatprep.subr.bf16.mxu0 %v1552_v20 }
  0x61   :  { %1411 = vmatpush3.bf16.msra.mxu1 %v960_v38 }
  0x62   :  { %1395 = vmatmul.mubr.bf16.vlgmr.msra.gmra.mrb[8].mxu0 %v251_v30  ;;  %1416 = vmatprep.subr.bf16.mxu1 %v1552_v20  ;;  %v1262_v30 = vld [vmem:[%s1937_s8] ss:$0 sm:$0xff] }
  0x63   :  { %1430 = vmatprep.mubr.msk.bf16.mxu0 %vm1553_vm0, %v1552_v20  ;;  %1429 = vmatpush3.bf16.msra.mxu0 %v1109_v13 }
  0xf5   :  { %v1282_v39 = vpop.f32.mrb[0].mxu0 }
  0xf6   :  { %v1283_v41 = vpop.f32.mrb[1].mxu0 }
  0xf7   :  { %v1284_v42 = vadd.f32 %v1283_v41, %v1282_v39  ;;  %v1285_v43 = vpop.f32.mrb[2].mxu0  ;;  %v1304_v44 = vpop.f32.mrb[0].mxu1 }
  0xf8   :  { %v1286_v45 = vpop.f32.mrb[3].mxu0  ;;  %v1305_v46 = vpop.f32.mrb[1].mxu1 }
  0xf9   :  { %v728_v47 = vadd.f32 %v1284_v42, %v1173_v40  ;;  %v1306_v48 = vadd.f32 %v1305_v46, %v1304_v44  ;;  %v1307_v49 = vpop.f32.mrb[2].mxu1 }
  0xfa   :  { %v1308_v50 = vpop.f32.mrb[3].mxu1 }
  0xfb   :  { %v768_v51 = vadd.f32 %v1306_v48, %v728_v47 }
 0x115   :  { %v1326_v52 = vpop.f32.mrb[4].mxu0 }
 0x116   :  { %v1327_v53 = vpop.f32.mrb[5].mxu0 }
 0x117   :  { %v1328_v54 = vadd.f32 %v1327_v53, %v1326_v52  ;;  %v1329_v55 = vpop.f32.mrb[6].mxu0  ;;  %v1348_v56 = vpop.f32.mrb[4].mxu1 }
 0x118   :  { %v1330_v57 = vpop.f32.mrb[7].mxu0  ;;  %v1349_v58 = vpop.f32.mrb[5].mxu1 }
 0x119   :  { %v808_v59 = vadd.f32 %v1328_v54, %v768_v51  ;;  %v1350_v60 = vadd.f32 %v1349_v58, %v1348_v56  ;;  %v1351_v61 = vpop.f32.mrb[6].mxu1 }
 0x11a   :  { %v1352_v62 = vpop.f32.mrb[7].mxu1 }
 0x11b   :  { %v848_v63 = vadd.f32 %v1350_v60, %v808_v59 }
 0x135   :  { %v887_v0 = vpop.f32.mrb[8].mxu0 }
 0x136   :  { %v888_v1 = vadd.f32 %v887_v0, %v848_v63  ;;  %v1396_v2 = vpop.f32.mrb[9].mxu0 }
 0x137   :  { %v890_v3 = vpop.f32.mrb[10].mxu0 }
 0x138   :  { %v893_v4 = vmax.f32 %v888_v1, 0.0  ;;  %v1397_v5 = vpop.f32.mrb[11].mxu0 }
 0x13a   :  { %v894_v7 = vpack.c.bf16 %v893_v4, %v893_v4 }
 0x13c   :  { %1413 = vmatmul.mubr.msk.bf16.vlgmr.msra.gmra.mrb[8].mxu1 %vm954_vm2, %v894_v7 }
 0x13d   :  { %1417 = vmatpush3.bf16.msra.mxu1 %v1518_v6  ;;  %1424 = vmatprep.mubr.msk.bf16.mxu1 %vm1553_vm0, %v1552_v20 }
 0x13e   :  { %1418 = vmatprep.subr.bf16.mxu1 %v1552_v20 }
 0x141   :  { %1419 = vmatpush3.bf16.msra.mxu1 %v1519_v8 }
 0x142   :  { %1420 = vmatprep.subr.bf16.mxu1 %v1552_v20 }
 0x145   :  { %1421 = vmatpush3.bf16.msra.mxu1 %v1520_v9 }
 0x146   :  { %1422 = vmatprep.subr.bf16.mxu1 %v1552_v20 }
 0x149   :  { %1423 = vmatpush3.bf16.msra.mxu1 %v1045_v11 }
 0x20f   :  { %v996_v15 = vpop.f32.mrb[8].mxu1 }
 0x210   :  { %v997_v16 = vadd.f32 %v1247_v14, %v996_v15  ;;  %v1414_v17 = vpop.f32.mrb[9].mxu1 }
 0x211   :  { %v999_v18 = vpop.f32.mrb[10].mxu1 }
 0x212   :  { %v1002_v19 = vmax.f32 %v997_v16, 0.0  ;;  %v1415_v20 = vpop.f32.mrb[11].mxu1 }
 0x214   :  { %v1003_v21 = vpack.c.bf16 %v1002_v19, %v1002_v19 }
 0x216   :  { %1425 = vmatmul.mubr.msk.bf16.vlgmr.msra.gmra.mrb[12].mxu1 %vm1039_vm5, %v1003_v21 }
 0x2e9   :  { %v1081_v23 = vpop.f32.mrb[12].mxu1 }
 0x2ea   :  { %v1082_v24 = vadd.f32 %v1256_v22, %v1081_v23  ;;  %v1426_v25 = vpop.f32.mrb[13].mxu1 }
 0x2eb   :  { %v1084_v26 = vpop.f32.mrb[14].mxu1 }
 0x2ec   :  { %v1087_v27 = vmax.f32 %v1082_v24, 0.0  ;;  %v1427_v28 = vpop.f32.mrb[15].mxu1 }
 0x2ee   :  { %v1088_v29 = vpack.c.bf16 %v1087_v27, %v1087_v27 }
 0x2f0   :  { %1431 = vmatmul.mubr.msk.bf16.vlgmr.msra.gmra.mrb[12].mxu0 %vm1103_vm6, %v1088_v29 }
 0x3c3   :  { %v1145_v31 = vpop.f32.mrb[12].mxu0 }
 0x3c4   :  { %v1146_v32 = vadd.f32 %v1262_v30, %v1145_v31  ;;  %v1432_v33 = vpop.f32.mrb[13].mxu0 }
 0x3c5   :  { %v1148_v34 = vpop.f32.mrb[14].mxu0 }
 0x3c6   :  { %v1265_v35 = vmul.f32 -1.442695, %v1146_v32  ;;  %v1433_v36 = vpop.f32.mrb[15].mxu0 }
 0x3c8   :  { %1523 = vpow2.f32 %v1265_v35 }
 0x3d2   :  { %v1524_v37 = vpop.eup %1523 }
 0x3d3   :  { %v1154_v38 = vadd.f32 1.0, %v1524_v37 }
 0x3d5   :  { %1525 = vrcp.f32 %v1154_v38 }
 0x3df   :  { %v1526_v39 = vpop.eup %1525 }
 0x3e0   :  { %1158 = vst.msk [vmem:[#allocation2] sm:$0x3] %vm1157_vm7, %v1526_v39 }
 0x3e1   :  { %1538 = shalt.err (!%p1535_p4)
}
 0x3e2   :  { %s1539_s15 = scalar_lea.hbm %s1938_s9, 32 }
 0x3e3   :  { %p1540_p5 = scmp.ne.s32.totalorder %s1938_s9, %s1539_s15  ;;  %p1543_p6 = scmp.lt.u32.totalorder %s1539_s15, %s1938_s9 }
 0x3e5   :  { %p1545_p7 = pnand %p1543_p6, %p1540_p5 }
 0x3e7   :  { %1548 = shalt.err (!%p1545_p7)
}
 0x3e8   :  { %1168 = dma.vmem_to_hbm [thread:$0]  %s1166_s0, 32, %s1938_s9, [#allocation3]  }
 0x3e9   :  { %1549 = dma.done.wait [#allocation3], 32  }
 0x3ea   :  { %1550 = vsyncadd [#allocation3], 4294967264 }
 0x3eb   :  { %1172 = vsyncpa [#allocation3], 1 }

</bundles_post_ra>
